<compile_context>
chip_gen: v5e
topology: v5e:2x2
jax: 0.10.0
libtpu: 0.0.40
codegen_flags: <defaults>
</compile_context>

<pallas_src>
import functools
import math

import jax
import jax.numpy as jnp
from jax.experimental import pallas as pl
from jax.experimental.pallas import tpu as pltpu


# ----------------------------------------------------------------------------
# helpers (mirroring the PyTorch reference)
# ----------------------------------------------------------------------------
def _make_divisible(ch, divisor=8, min_ch=None):
    if min_ch is None:
        min_ch = divisor
    new_ch = max(min_ch, int(ch + divisor / 2) // divisor * divisor)
    if new_ch < 0.9 * ch:
        new_ch += divisor
    return new_ch


def _round_up(x, m):
    return (x + m - 1) // m * m


def _cpad(c):
    # channel padding to 128 lanes (lane-dense stores across the whole net)
    return _round_up(c, 128)


def _apply_act(y, kind):
    if kind == "identity":
        return y
    if kind == "relu":
        return jnp.maximum(y, 0.0)
    if kind == "hardswish":
        return y * jnp.clip(y + 3.0, 0.0, 6.0) * (1.0 / 6.0)
    if kind == "hardsigmoid":
        return jnp.clip(y + 3.0, 0.0, 6.0) * (1.0 / 6.0)
    raise ValueError(kind)


# ----------------------------------------------------------------------------
# Pallas kernels
# ----------------------------------------------------------------------------
def _pw_kernel(*refs, act, has_se, has_res):
    """Fused (optional SE-prescale) @ W * bn_scale + bn_bias -> act (+residual)."""
    idx = 0
    x_ref = refs[idx]; idx += 1
    se_ref = None
    res_ref = None
    if has_se:
        se_ref = refs[idx]; idx += 1
    if has_res:
        res_ref = refs[idx]; idx += 1
    w_ref, s_ref, b_ref, o_ref = refs[idx:]

    x = x_ref[...]                                        # (TM, Cin) bf16
    if has_se:
        # SE channel scale applied to the projection input (f32 math)
        x = (x.astype(jnp.float32) * se_ref[...]).astype(jnp.bfloat16)
    y = jnp.dot(x, w_ref[...], preferred_element_type=jnp.float32)
    y = y * s_ref[...] + b_ref[...]                       # folded BN (f32)
    y = _apply_act(y, act)
    if has_res:
        y = y + res_ref[...].astype(jnp.float32)
    o_ref[...] = y.astype(o_ref.dtype)


def _dw_kernel(*refs, k, stride, Ho, Wo, act):
    """Depthwise conv: k*k taps generated in-kernel from stride-phase tiles."""
    nph = stride * stride
    phase_refs = refs[:nph]
    w_ref, s_ref, b_ref, o_ref = refs[nph:]
    ct = o_ref.shape[-1]
    acc = jnp.zeros((Ho, Wo, ct), jnp.float32)
    for kh in range(k):
        for kw in range(k):
            ph = phase_refs[(kh % stride) * stride + (kw % stride)]
            tap = ph[pl.ds(kh // stride, Ho), pl.ds(kw // stride, Wo), :]
            acc = acc + tap.astype(jnp.float32) * w_ref[kh * k + kw, :]
    y = acc * s_ref[...] + b_ref[...]                     # folded BN (f32)
    o_ref[...] = _apply_act(y, act).astype(o_ref.dtype)


def _pool_mlp_kernel(x_ref, w1_ref, b1_ref, w2_ref, b2_ref, o_ref, acc_ref,
                     *, inv_hw, act1, act2):
    """Global average pool over the M axis + fc1 -> act1 -> fc2 -> act2."""
    m = pl.program_id(1)

    @pl.when(m == 0)
    def _():
        acc_ref[...] = jnp.zeros_like(acc_ref)

    acc_ref[...] += jnp.sum(x_ref[...].astype(jnp.float32), axis=0,
                            keepdims=True)

    @pl.when(m == pl.num_programs(1) - 1)
    def _():
        mean = acc_ref[...] * inv_hw                              # (1, C) f32
        h = jnp.dot(mean.astype(jnp.bfloat16), w1_ref[...],
                    preferred_element_type=jnp.float32) + b1_ref[...]
        h = _apply_act(h, act1)
        y = jnp.dot(h.astype(jnp.bfloat16), w2_ref[...],
                    preferred_element_type=jnp.float32) + b2_ref[...]
        o_ref[...] = _apply_act(y, act2).astype(o_ref.dtype)


# ----------------------------------------------------------------------------
# kernel wrappers
# ----------------------------------------------------------------------------
def pointwise_conv(x, w, scale, bias, act, se=None, residual=None,
                   out_dtype=jnp.bfloat16):
    """x:(N,M,Cin) @ w:(Cin,Cout) with folded BN + act; optional fused SE
    pre-scale (se:(N,Cin)) and residual add (residual:(N,M,Cout))."""
    N, M, Cin = x.shape
    Cout = w.shape[1]
    TM = min(_round_up(M, 8), 512)
    Mp = _round_up(M, TM)
    if Mp != M:
        x = jnp.pad(x, ((0, 0), (0, Mp - M), (0, 0)))
        if residual is not None:
            residual = jnp.pad(residual, ((0, 0), (0, Mp - M), (0, 0)))

    inputs = [x]
    in_specs = [pl.BlockSpec((None, TM, Cin), lambda n, m: (n, m, 0))]
    if se is not None:
        inputs.append(se.reshape(N, 1, Cin).astype(jnp.float32))
        in_specs.append(pl.BlockSpec((None, 1, Cin), lambda n, m: (n, 0, 0)))
    if residual is not None:
        inputs.append(residual)
        in_specs.append(pl.BlockSpec((None, TM, Cout), lambda n, m: (n, m, 0)))
    inputs += [w, scale.reshape(1, Cout), bias.reshape(1, Cout)]
    in_specs += [
        pl.BlockSpec((Cin, Cout), lambda n, m: (0, 0)),
        pl.BlockSpec((1, Cout), lambda n, m: (0, 0)),
        pl.BlockSpec((1, Cout), lambda n, m: (0, 0)),
    ]

    out = pl.pallas_call(
        functools.partial(_pw_kernel, act=act, has_se=se is not None,
                          has_res=residual is not None),
        out_shape=jax.ShapeDtypeStruct((N, Mp, Cout), out_dtype),
        grid=(N, Mp // TM),
        in_specs=in_specs,
        out_specs=pl.BlockSpec((None, TM, Cout), lambda n, m: (n, m, 0)),
        compiler_params=pltpu.CompilerParams(
            dimension_semantics=("parallel", "parallel")),
    )(*inputs)
    return out[:, :M, :] if Mp != M else out


def depthwise_conv(x_nhwc, w_dw, scale, bias, k, stride, act):
    """Depthwise conv + folded BN + act, taps generated in-kernel (no HBM
    im2col).  x_nhwc:(N,H,W,C) bf16; w_dw:(k*k,C); returns (N,Ho,Wo,C) bf16."""
    N, H, W, C = x_nhwc.shape
    pad = (k - 1) // 2
    Ho = (H + 2 * pad - k) // stride + 1
    Wo = (W + 2 * pad - k) // stride + 1
    xp = jnp.pad(x_nhwc, ((0, 0), (pad, pad), (pad, pad), (0, 0)))

    if stride == 1:
        phases = [xp]
        Hph, Wph = xp.shape[1], xp.shape[2]
    else:
        # stride-phase decomposition so every in-kernel tap is a unit-stride
        # slice; phases partition the input (no data inflation).
        Hph = -(-(H + 2 * pad) // stride)
        Wph = -(-(W + 2 * pad) // stride)
        phases = []
        for a in range(stride):
            for b in range(stride):
                ph = xp[:, a::stride, b::stride, :]
                ph = jnp.pad(ph, ((0, 0), (0, Hph - ph.shape[1]),
                                  (0, Wph - ph.shape[2]), (0, 0)))
                phases.append(ph)

    CT = min(C, 128)
    in_specs = [pl.BlockSpec((None, Hph, Wph, CT), lambda n, c: (n, 0, 0, c))
                for _ in phases]
    in_specs += [
        pl.BlockSpec((k * k, CT), lambda n, c: (0, c)),
        pl.BlockSpec((1, CT), lambda n, c: (0, c)),
        pl.BlockSpec((1, CT), lambda n, c: (0, c)),
    ]
    out = pl.pallas_call(
        functools.partial(_dw_kernel, k=k, stride=stride, Ho=Ho, Wo=Wo, act=act),
        out_shape=jax.ShapeDtypeStruct((N, Ho, Wo, C), jnp.bfloat16),
        grid=(N, C // CT),
        in_specs=in_specs,
        out_specs=pl.BlockSpec((None, Ho, Wo, CT), lambda n, c: (n, 0, 0, c)),
        compiler_params=pltpu.CompilerParams(
            dimension_semantics=("parallel", "parallel")),
    )(*phases, w_dw, scale.reshape(1, C), bias.reshape(1, C))
    return out


def pool_mlp(x, w1, b1, w2, b2, act1, act2):
    """Global mean over M, then fc1->act1->fc2->act2.  Used for both the SE
    branch (relu / hardsigmoid) and the classifier head (hardswish / id)."""
    N, M, C = x.shape
    C1 = w1.shape[1]
    C2 = w2.shape[1]
    TM = min(_round_up(M, 8), 512)
    Mp = _round_up(M, TM)
    if Mp != M:
        x = jnp.pad(x, ((0, 0), (0, Mp - M), (0, 0)))   # zero rows: no effect on sum

    out = pl.pallas_call(
        functools.partial(_pool_mlp_kernel, inv_hw=1.0 / M, act1=act1, act2=act2),
        out_shape=jax.ShapeDtypeStruct((N, 1, C2), jnp.float32),
        grid=(N, Mp // TM),
        in_specs=[
            pl.BlockSpec((None, TM, C), lambda n, m: (n, m, 0)),
            pl.BlockSpec((C, C1), lambda n, m: (0, 0)),
            pl.BlockSpec((1, C1), lambda n, m: (0, 0)),
            pl.BlockSpec((C1, C2), lambda n, m: (0, 0)),
            pl.BlockSpec((1, C2), lambda n, m: (0, 0)),
        ],
        out_specs=pl.BlockSpec((None, 1, C2), lambda n, m: (n, 0, 0)),
        scratch_shapes=[pltpu.VMEM((1, C), jnp.float32)],
        compiler_params=pltpu.CompilerParams(
            dimension_semantics=("parallel", "arbitrary")),
    )(x, w1, b1.reshape(1, C1), w2, b2.reshape(1, C2))
    return out.reshape(N, C2)


# ----------------------------------------------------------------------------
# JAX glue: im2col for the (single) regular 3x3 stem conv
# ----------------------------------------------------------------------------
def extract_patches(x, k, stride):
    pad = (k - 1) // 2
    N, H, W, C = x.shape
    xp = jnp.pad(x, ((0, 0), (pad, pad), (pad, pad), (0, 0)))
    Ho = (H + 2 * pad - k) // stride + 1
    Wo = (W + 2 * pad - k) // stride + 1
    taps = []
    for kh in range(k):
        for kw in range(k):
            sl = xp[:, kh:kh + (Ho - 1) * stride + 1:stride,
                    kw:kw + (Wo - 1) * stride + 1:stride, :]
            taps.append(sl)
    return jnp.stack(taps, axis=3), Ho, Wo


# ----------------------------------------------------------------------------
# parameters (deterministic, in-script; channel dims zero-padded to 128)
# ----------------------------------------------------------------------------
def _bn_fold(c_pad, eps=1e-3):
    # fresh BatchNorm2d (eval): gamma=1, beta=0, mean=0, var=1
    scale = jnp.full((c_pad,), 1.0 / math.sqrt(1.0 + eps), jnp.float32)
    bias = jnp.zeros((c_pad,), jnp.float32)
    return scale, bias


def _dense_weight(key, rows, cols, rows_pad, cols_pad, std):
    w = std * jax.random.normal(key, (rows, cols), jnp.float32)
    w = jnp.pad(w, ((0, rows_pad - rows), (0, cols_pad - cols)))
    return w.astype(jnp.bfloat16)


def make_settings(width_multi=1.0):
    def adjust(c):
        return _make_divisible(c * width_multi, 8)
    raw = [
        # input_c, kernel, expanded_c, out_c, use_se, activation, stride
        (16, 3, 16, 16, True, "RE", 2),
        (16, 3, 72, 24, False, "RE", 2),
        (24, 5, 96, 40, True, "HS", 1),
        (40, 3, 120, 40, True, "HS", 1),   # exercises the residual connection
    ]
    settings = []
    for (ic, k, ec, oc, se, act, s) in raw:
        settings.append(dict(input_c=adjust(ic), kernel=k, expanded_c=adjust(ec),
                             out_c=adjust(oc), use_se=se, use_hs=(act == "HS"),
                             stride=s))
    return settings


def build_params(key, settings, last_channel, num_classes):
    keys = iter(jax.random.split(key, 128))
    P = {}

    first_c = settings[0]["input_c"]
    P["first"] = dict(
        w=_dense_weight(next(keys), 9 * 3, first_c, 9 * 3, _cpad(first_c),
                        std=math.sqrt(2.0 / (9 * first_c))),
        bn=_bn_fold(_cpad(first_c)))

    blocks = []
    for cnf in settings:
        ic, ec, oc, k = cnf["input_c"], cnf["expanded_c"], cnf["out_c"], cnf["kernel"]
        b = {}
        if ec != ic:
            b["expand"] = dict(
                w=_dense_weight(next(keys), ic, ec, _cpad(ic), _cpad(ec),
                                std=math.sqrt(2.0 / ec)),
                bn=_bn_fold(_cpad(ec)))
        dw = math.sqrt(2.0 / (k * k)) * jax.random.normal(
            next(keys), (k * k, ec), jnp.float32)
        b["dw"] = dict(w=jnp.pad(dw, ((0, 0), (0, _cpad(ec) - ec))),
                       bn=_bn_fold(_cpad(ec)))
        if cnf["use_se"]:
            sq = _make_divisible(ec // 4, 8)
            b["se"] = dict(
                fc1_w=_dense_weight(next(keys), ec, sq, _cpad(ec), _cpad(sq),
                                    std=math.sqrt(2.0 / sq)),
                fc1_b=jnp.zeros((_cpad(sq),), jnp.float32),
                fc2_w=_dense_weight(next(keys), sq, ec, _cpad(sq), _cpad(ec),
                                    std=math.sqrt(2.0 / ec)),
                fc2_b=jnp.zeros((_cpad(ec),), jnp.float32))
        b["project"] = dict(
            w=_dense_weight(next(keys), ec, oc, _cpad(ec), _cpad(oc),
                            std=math.sqrt(2.0 / oc)),
            bn=_bn_fold(_cpad(oc)))
        blocks.append(b)
    P["blocks"] = blocks

    lc_in = settings[-1]["out_c"]
    lc_out = 6 * lc_in
    P["last"] = dict(
        w=_dense_weight(next(keys), lc_in, lc_out, _cpad(lc_in), _cpad(lc_out),
                        std=math.sqrt(2.0 / lc_out)),
        bn=_bn_fold(_cpad(lc_out)))

    P["fc1_w"] = _dense_weight(next(keys), lc_out, last_channel,
                               _cpad(lc_out), _cpad(last_channel), std=0.01)
    P["fc1_b"] = jnp.zeros((_cpad(last_channel),), jnp.float32)
    P["fc2_w"] = _dense_weight(next(keys), last_channel, num_classes,
                               _cpad(last_channel), _cpad(num_classes), std=0.01)
    P["fc2_b"] = jnp.zeros((_cpad(num_classes),), jnp.float32)
    return P


# ----------------------------------------------------------------------------
# forward pass
# ----------------------------------------------------------------------------
def mobilenet_v3_forward(params, x_nchw, settings, num_classes):
    x = jnp.transpose(x_nchw, (0, 2, 3, 1)).astype(jnp.float32)   # NCHW -> NHWC
    N = x.shape[0]

    # first conv: 3x3 stride 2, hardswish (im2col on the tiny 3-channel input)
    patches, H, W = extract_patches(x, 3, 2)
    xm = patches.reshape(N, H * W, 9 * 3).astype(jnp.bfloat16)
    p = params["first"]
    x = pointwise_conv(xm, p["w"], p["bn"][0], p["bn"][1], act="hardswish")

    for cnf, bp in zip(settings, params["blocks"]):
        act = "hardswish" if cnf["use_hs"] else "relu"
        inp = x                                                   # (N, HW, Cin_pad)

        if "expand" in bp:
            x = pointwise_conv(x, bp["expand"]["w"], bp["expand"]["bn"][0],
                               bp["expand"]["bn"][1], act=act)

        Cexp = x.shape[-1]
        x = depthwise_conv(x.reshape(N, H, W, Cexp), bp["dw"]["w"],
                           bp["dw"]["bn"][0], bp["dw"]["bn"][1],
                           k=cnf["kernel"], stride=cnf["stride"], act=act)
        H, W = x.shape[1], x.shape[2]
        x = x.reshape(N, H * W, Cexp)

        se_scale = None
        if "se" in bp:
            # GAP + fc1(relu) + fc2(hardsigmoid) fused in one kernel
            se_scale = pool_mlp(x, bp["se"]["fc1_w"], bp["se"]["fc1_b"],
                                bp["se"]["fc2_w"], bp["se"]["fc2_b"],
                                act1="relu", act2="hardsigmoid")

        residual = inp if (cnf["stride"] == 1 and cnf["input_c"] == cnf["out_c"]) else None
        # project 1x1 with the SE channel scale and residual add fused in
        x = pointwise_conv(x, bp["project"]["w"], bp["project"]["bn"][0],
                           bp["project"]["bn"][1], act="identity",
                           se=se_scale, residual=residual)

    # last conv: 1x1, hardswish
    p = params["last"]
    x = pointwise_conv(x, p["w"], p["bn"][0], p["bn"][1], act="hardswish")

    # classifier head: GAP + Linear + hardswish + (Dropout eval = id) + Linear
    logits = pool_mlp(x, params["fc1_w"], params["fc1_b"],
                      params["fc2_w"], params["fc2_b"],
                      act1="hardswish", act2="identity")
    return logits[:, :num_classes]


# ----------------------------------------------------------------------------
if __name__ == "__main__":
    key = jax.random.PRNGKey(0)
    k_params, k_x = jax.random.split(key)

    settings = make_settings(width_multi=1.0)
    last_channel, num_classes = 128, 10
    params = build_params(k_params, settings, last_channel, num_classes)

    # small input consistent with the module (NCHW, 3 input channels)
    x = jax.random.normal(k_x, (2, 3, 16, 16), jnp.float32)

    fwd = jax.jit(functools.partial(mobilenet_v3_forward,
                                    settings=settings, num_classes=num_classes))
    out = fwd(params, x)
    jax.block_until_ready(out)
    assert out.shape == (2, num_classes)
    assert bool(jnp.all(jnp.isfinite(out)))
    print("KERNEL_OK")
</pallas_src>

<mosaic_0001>
module attributes {stable_mosaic.version = 11 : i64} {
  func.func @_pw_kernel(%arg0: i32, %arg1: i32, %arg2: memref<1x64x27xbf16, #tpu.memory_space<vmem>>, %arg3: memref<27x128xbf16, #tpu.memory_space<vmem>>, %arg4: memref<1x128xf32, #tpu.memory_space<vmem>>, %arg5: memref<1x128xf32, #tpu.memory_space<vmem>>, %arg6: memref<1x64x128xbf16, #tpu.memory_space<vmem>>) attributes {dimension_semantics = [#tpu.dimension_semantics<parallel>, #tpu.dimension_semantics<parallel>], iteration_bounds = array<i64: 2, 1>, scalar_prefetch = 0 : i64, scratch_operands = 0 : i64, tpu.core_type = #tpu.core_type<tc>, window_params = [{transform_indices = @transform_0, window_bounds = array<i64: 1, 64, 27>}, {pipeline_mode = #tpu.pipeline_mode<synchronous>, transform_indices = @transform_1, window_bounds = array<i64: 27, 128>}, {pipeline_mode = #tpu.pipeline_mode<synchronous>, transform_indices = @transform_2, window_bounds = array<i64: 1, 128>}, {pipeline_mode = #tpu.pipeline_mode<synchronous>, transform_indices = @transform_3, window_bounds = array<i64: 1, 128>}, {transform_indices = @transform_4, window_bounds = array<i64: 1, 64, 128>}]} {
    %c0 = arith.constant 0 : index
    %c0_0 = arith.constant 0 : index
    %c0_1 = arith.constant 0 : index
    %0 = vector.load %arg2[%c0, %c0_0, %c0_1] : memref<1x64x27xbf16, #tpu.memory_space<vmem>>, vector<1x64x27xbf16>
    %1 = vector.shape_cast %0 : vector<1x64x27xbf16> to vector<64x27xbf16>
    %c0_2 = arith.constant 0 : index
    %c0_3 = arith.constant 0 : index
    %2 = vector.load %arg3[%c0_2, %c0_3] : memref<27x128xbf16, #tpu.memory_space<vmem>>, vector<27x128xbf16>
    %cst = arith.constant dense<0.000000e+00> : vector<64x128xf32>
    %3 = tpu.matmul %1, %2, %cst {dimension_numbers = #tpu.dot_dimension_numbers<[1], [0], [0], [1], [0, 0, 1, 1], [], []>} : vector<64x27xbf16>, vector<27x128xbf16>, vector<64x128xf32> -> vector<64x128xf32>
    %c0_4 = arith.constant 0 : index
    %c0_5 = arith.constant 0 : index
    %4 = vector.load %arg4[%c0_4, %c0_5] : memref<1x128xf32, #tpu.memory_space<vmem>>, vector<1x128xf32>
    %5 = vector.broadcast %4 : vector<1x128xf32> to vector<64x128xf32>
    %6 = arith.mulf %3, %5 : vector<64x128xf32>
    %c0_6 = arith.constant 0 : index
    %c0_7 = arith.constant 0 : index
    %7 = vector.load %arg5[%c0_6, %c0_7] : memref<1x128xf32, #tpu.memory_space<vmem>>, vector<1x128xf32>
    %8 = vector.broadcast %7 : vector<1x128xf32> to vector<64x128xf32>
    %9 = arith.addf %6, %8 : vector<64x128xf32>
    %cst_8 = arith.constant 3.000000e+00 : f32
    %10 = vector.broadcast %cst_8 : f32 to vector<64x128xf32>
    %11 = arith.addf %9, %10 : vector<64x128xf32>
    %cst_9 = arith.constant 0.000000e+00 : f32
    %cst_10 = arith.constant 6.000000e+00 : f32
    %12 = vector.broadcast %cst_9 : f32 to vector<64x128xf32>
    %13 = arith.maximumf %12, %11 : vector<64x128xf32>
    %14 = vector.broadcast %cst_10 : f32 to vector<64x128xf32>
    %15 = arith.minimumf %14, %13 : vector<64x128xf32>
    %16 = arith.mulf %9, %15 : vector<64x128xf32>
    %cst_11 = arith.constant 0.166666672 : f32
    %17 = vector.broadcast %cst_11 : f32 to vector<64x128xf32>
    %18 = arith.mulf %16, %17 : vector<64x128xf32>
    %19 = arith.truncf %18 : vector<64x128xf32> to vector<64x128xbf16>
    %c0_12 = arith.constant 0 : index
    %c0_13 = arith.constant 0 : index
    %c0_14 = arith.constant 0 : index
    %20 = vector.load %arg6[%c0_12, %c0_13, %c0_14] : memref<1x64x128xbf16, #tpu.memory_space<vmem>>, vector<1x64x128xbf16>
    %21 = vector.shape_cast %20 : vector<1x64x128xbf16> to vector<64x128xbf16>
    %22 = vector.shape_cast %19 : vector<64x128xbf16> to vector<1x64x128xbf16>
    tpu.vector_store %arg6[%c0_12, %c0_13, %c0_14], %22 {strides = array<i32>} : memref<1x64x128xbf16, #tpu.memory_space<vmem>>, vector<1x64x128xbf16>,
    return
  }
  func.func @transform_0(%arg0: i32, %arg1: i32) -> (i32, i32, i32) {
    %c0_i32 = arith.constant 0 : i32
    %c0_i32_0 = arith.constant 0 : i32
    return %arg0, %arg1, %c0_i32 : i32, i32, i32
  }
  func.func @transform_1(%arg0: i32, %arg1: i32) -> (i32, i32) {
    %c0_i32 = arith.constant 0 : i32
    %c0_i32_0 = arith.constant 0 : i32
    %c0_i32_1 = arith.constant 0 : i32
    return %c0_i32, %c0_i32_0 : i32, i32
  }
  func.func @transform_2(%arg0: i32, %arg1: i32) -> (i32, i32) {
    %c0_i32 = arith.constant 0 : i32
    %c0_i32_0 = arith.constant 0 : i32
    %c0_i32_1 = arith.constant 0 : i32
    return %c0_i32, %c0_i32_0 : i32, i32
  }
  func.func @transform_3(%arg0: i32, %arg1: i32) -> (i32, i32) {
    %c0_i32 = arith.constant 0 : i32
    %c0_i32_0 = arith.constant 0 : i32
    %c0_i32_1 = arith.constant 0 : i32
    return %c0_i32, %c0_i32_0 : i32, i32
  }
  func.func @transform_4(%arg0: i32, %arg1: i32) -> (i32, i32, i32) {
    %c0_i32 = arith.constant 0 : i32
    %c0_i32_0 = arith.constant 0 : i32
    return %arg0, %arg1, %c0_i32 : i32, i32, i32
  }
}

module attributes {stable_mosaic.version = 11 : i64} {
  func.func @_dw_kernel(%arg0: i32, %arg1: i32, %arg2: memref<1x5x5x128xbf16, #tpu.memory_space<vmem>>, %arg3: memref<1x5x5x128xbf16, #tpu.memory_space<vmem>>, %arg4: memref<1x5x5x128xbf16, #tpu.memory_space<vmem>>, %arg5: memref<1x5x5x128xbf16, #tpu.memory_space<vmem>>, %arg6: memref<9x128xf32, #tpu.memory_space<vmem>>, %arg7: memref<1x128xf32, #tpu.memory_space<vmem>>, %arg8: memref<1x128xf32, #tpu.memory_space<vmem>>, %arg9: memref<1x4x4x128xbf16, #tpu.memory_space<vmem>>) attributes {dimension_semantics = [#tpu.dimension_semantics<parallel>, #tpu.dimension_semantics<parallel>], iteration_bounds = array<i64: 2, 1>, scalar_prefetch = 0 : i64, scratch_operands = 0 : i64, tpu.core_type = #tpu.core_type<tc>, window_params = [{transform_indices = @transform_0, window_bounds = array<i64: 1, 5, 5, 128>}, {transform_indices = @transform_1, window_bounds = array<i64: 1, 5, 5, 128>}, {transform_indices = @transform_2, window_bounds = array<i64: 1, 5, 5, 128>}, {transform_indices = @transform_3, window_bounds = array<i64: 1, 5, 5, 128>}, {transform_indices = @transform_4, window_bounds = array<i64: 9, 128>}, {transform_indices = @transform_5, window_bounds = array<i64: 1, 128>}, {transform_indices = @transform_6, window_bounds = array<i64: 1, 128>}, {transform_indices = @transform_7, window_bounds = array<i64: 1, 4, 4, 128>}]} {
    %cst = arith.constant 0.000000e+00 : f32
    %0 = vector.broadcast %cst : f32 to vector<4x4x128xf32>
    %c0 = arith.constant 0 : index
    %c0_0 = arith.constant 0 : index
    %c0_1 = arith.constant 0 : index
    %c0_2 = arith.constant 0 : index
    %1 = vector.load %arg2[%c0, %c0_0, %c0_1, %c0_2] : memref<1x5x5x128xbf16, #tpu.memory_space<vmem>>, vector<1x4x4x128xbf16>
    %2 = vector.shape_cast %1 : vector<1x4x4x128xbf16> to vector<4x4x128xbf16>
    %3 = arith.extf %2 : vector<4x4x128xbf16> to vector<4x4x128xf32>
    %c0_3 = arith.constant 0 : index
    %c0_4 = arith.constant 0 : index
    %4 = vector.load %arg6[%c0_3, %c0_4] : memref<9x128xf32, #tpu.memory_space<vmem>>, vector<1x128xf32>
    %5 = vector.shape_cast %4 : vector<1x128xf32> to vector<128xf32>
    %6 = vector.shape_cast %5 : vector<128xf32> to vector<1x1x128xf32>
    %7 = vector.broadcast %6 : vector<1x1x128xf32> to vector<4x4x128xf32>
    %8 = arith.mulf %3, %7 : vector<4x4x128xf32>
    %9 = arith.addf %0, %8 : vector<4x4x128xf32>
    %c0_5 = arith.constant 0 : index
    %c0_6 = arith.constant 0 : index
    %c0_7 = arith.constant 0 : index
    %c0_8 = arith.constant 0 : index
    %10 = vector.load %arg3[%c0_5, %c0_6, %c0_7, %c0_8] : memref<1x5x5x128xbf16, #tpu.memory_space<vmem>>, vector<1x4x4x128xbf16>
    %11 = vector.shape_cast %10 : vector<1x4x4x128xbf16> to vector<4x4x128xbf16>
    %12 = arith.extf %11 : vector<4x4x128xbf16> to vector<4x4x128xf32>
    %c1 = arith.constant 1 : index
    %c0_9 = arith.constant 0 : index
    %13 = vector.load %arg6[%c1, %c0_9] : memref<9x128xf32, #tpu.memory_space<vmem>>, vector<1x128xf32>
    %14 = vector.shape_cast %13 : vector<1x128xf32> to vector<128xf32>
    %15 = vector.shape_cast %14 : vector<128xf32> to vector<1x1x128xf32>
    %16 = vector.broadcast %15 : vector<1x1x128xf32> to vector<4x4x128xf32>
    %17 = arith.mulf %12, %16 : vector<4x4x128xf32>
    %18 = arith.addf %9, %17 : vector<4x4x128xf32>
    %c0_10 = arith.constant 0 : index
    %c0_11 = arith.constant 0 : index
    %c1_12 = arith.constant 1 : index
    %c0_13 = arith.constant 0 : index
    %19 = vector.load %arg2[%c0_10, %c0_11, %c1_12, %c0_13] : memref<1x5x5x128xbf16, #tpu.memory_space<vmem>>, vector<1x4x4x128xbf16>
    %20 = vector.shape_cast %19 : vector<1x4x4x128xbf16> to vector<4x4x128xbf16>
    %21 = arith.extf %20 : vector<4x4x128xbf16> to vector<4x4x128xf32>
    %c2 = arith.constant 2 : index
    %c0_14 = arith.constant 0 : index
    %22 = vector.load %arg6[%c2, %c0_14] : memref<9x128xf32, #tpu.memory_space<vmem>>, vector<1x128xf32>
    %23 = vector.shape_cast %22 : vector<1x128xf32> to vector<128xf32>
    %24 = vector.shape_cast %23 : vector<128xf32> to vector<1x1x128xf32>
    %25 = vector.broadcast %24 : vector<1x1x128xf32> to vector<4x4x128xf32>
    %26 = arith.mulf %21, %25 : vector<4x4x128xf32>
    %27 = arith.addf %18, %26 : vector<4x4x128xf32>
    %c0_15 = arith.constant 0 : index
    %c0_16 = arith.constant 0 : index
    %c0_17 = arith.constant 0 : index
    %c0_18 = arith.constant 0 : index
    %28 = vector.load %arg4[%c0_15, %c0_16, %c0_17, %c0_18] : memref<1x5x5x128xbf16, #tpu.memory_space<vmem>>, vector<1x4x4x128xbf16>
    %29 = vector.shape_cast %28 : vector<1x4x4x128xbf16> to vector<4x4x128xbf16>
    %30 = arith.extf %29 : vector<4x4x128xbf16> to vector<4x4x128xf32>
    %c3 = arith.constant 3 : index
    %c0_19 = arith.constant 0 : index
    %31 = vector.load %arg6[%c3, %c0_19] : memref<9x128xf32, #tpu.memory_space<vmem>>, vector<1x128xf32>
    %32 = vector.shape_cast %31 : vector<1x128xf32> to vector<128xf32>
    %33 = vector.shape_cast %32 : vector<128xf32> to vector<1x1x128xf32>
    %34 = vector.broadcast %33 : vector<1x1x128xf32> to vector<4x4x128xf32>
    %35 = arith.mulf %30, %34 : vector<4x4x128xf32>
    %36 = arith.addf %27, %35 : vector<4x4x128xf32>
    %c0_20 = arith.constant 0 : index
    %c0_21 = arith.constant 0 : index
    %c0_22 = arith.constant 0 : index
    %c0_23 = arith.constant 0 : index
    %37 = vector.load %arg5[%c0_20, %c0_21, %c0_22, %c0_23] : memref<1x5x5x128xbf16, #tpu.memory_space<vmem>>, vector<1x4x4x128xbf16>
    %38 = vector.shape_cast %37 : vector<1x4x4x128xbf16> to vector<4x4x128xbf16>
    %39 = arith.extf %38 : vector<4x4x128xbf16> to vector<4x4x128xf32>
    %c4 = arith.constant 4 : index
    %c0_24 = arith.constant 0 : index
    %40 = vector.load %arg6[%c4, %c0_24] : memref<9x128xf32, #tpu.memory_space<vmem>>, vector<1x128xf32>
    %41 = vector.shape_cast %40 : vector<1x128xf32> to vector<128xf32>
    %42 = vector.shape_cast %41 : vector<128xf32> to vector<1x1x128xf32>
    %43 = vector.broadcast %42 : vector<1x1x128xf32> to vector<4x4x128xf32>
    %44 = arith.mulf %39, %43 : vector<4x4x128xf32>
    %45 = arith.addf %36, %44 : vector<4x4x128xf32>
    %c0_25 = arith.constant 0 : index
    %c0_26 = arith.constant 0 : index
    %c1_27 = arith.constant 1 : index
    %c0_28 = arith.constant 0 : index
    %46 = vector.load %arg4[%c0_25, %c0_26, %c1_27, %c0_28] : memref<1x5x5x128xbf16, #tpu.memory_space<vmem>>, vector<1x4x4x128xbf16>
    %47 = vector.shape_cast %46 : vector<1x4x4x128xbf16> to vector<4x4x128xbf16>
    %48 = arith.extf %47 : vector<4x4x128xbf16> to vector<4x4x128xf32>
    %c5 = arith.constant 5 : index
    %c0_29 = arith.constant 0 : index
    %49 = vector.load %arg6[%c5, %c0_29] : memref<9x128xf32, #tpu.memory_space<vmem>>, vector<1x128xf32>
    %50 = vector.shape_cast %49 : vector<1x128xf32> to vector<128xf32>
    %51 = vector.shape_cast %50 : vector<128xf32> to vector<1x1x128xf32>
    %52 = vector.broadcast %51 : vector<1x1x128xf32> to vector<4x4x128xf32>
    %53 = arith.mulf %48, %52 : vector<4x4x128xf32>
    %54 = arith.addf %45, %53 : vector<4x4x128xf32>
    %c0_30 = arith.constant 0 : index
    %c1_31 = arith.constant 1 : index
    %c0_32 = arith.constant 0 : index
    %c0_33 = arith.constant 0 : index
    %55 = vector.load %arg2[%c0_30, %c1_31, %c0_32, %c0_33] : memref<1x5x5x128xbf16, #tpu.memory_space<vmem>>, vector<1x4x4x128xbf16>
    %56 = vector.shape_cast %55 : vector<1x4x4x128xbf16> to vector<4x4x128xbf16>
    %57 = arith.extf %56 : vector<4x4x128xbf16> to vector<4x4x128xf32>
    %c6 = arith.constant 6 : index
    %c0_34 = arith.constant 0 : index
    %58 = vector.load %arg6[%c6, %c0_34] : memref<9x128xf32, #tpu.memory_space<vmem>>, vector<1x128xf32>
    %59 = vector.shape_cast %58 : vector<1x128xf32> to vector<128xf32>
    %60 = vector.shape_cast %59 : vector<128xf32> to vector<1x1x128xf32>
    %61 = vector.broadcast %60 : vector<1x1x128xf32> to vector<4x4x128xf32>
    %62 = arith.mulf %57, %61 : vector<4x4x128xf32>
    %63 = arith.addf %54, %62 : vector<4x4x128xf32>
    %c0_35 = arith.constant 0 : index
    %c1_36 = arith.constant 1 : index
    %c0_37 = arith.constant 0 : index
    %c0_38 = arith.constant 0 : index
    %64 = vector.load %arg3[%c0_35, %c1_36, %c0_37, %c0_38] : memref<1x5x5x128xbf16, #tpu.memory_space<vmem>>, vector<1x4x4x128xbf16>
    %65 = vector.shape_cast %64 : vector<1x4x4x128xbf16> to vector<4x4x128xbf16>
    %66 = arith.extf %65 : vector<4x4x128xbf16> to vector<4x4x128xf32>
    %c7 = arith.constant 7 : index
    %c0_39 = arith.constant 0 : index
    %67 = vector.load %arg6[%c7, %c0_39] : memref<9x128xf32, #tpu.memory_space<vmem>>, vector<1x128xf32>
    %68 = vector.shape_cast %67 : vector<1x128xf32> to vector<128xf32>
    %69 = vector.shape_cast %68 : vector<128xf32> to vector<1x1x128xf32>
    %70 = vector.broadcast %69 : vector<1x1x128xf32> to vector<4x4x128xf32>
    %71 = arith.mulf %66, %70 : vector<4x4x128xf32>
    %72 = arith.addf %63, %71 : vector<4x4x128xf32>
    %c0_40 = arith.constant 0 : index
    %c1_41 = arith.constant 1 : index
    %c1_42 = arith.constant 1 : index
    %c0_43 = arith.constant 0 : index
    %73 = vector.load %arg2[%c0_40, %c1_41, %c1_42, %c0_43] : memref<1x5x5x128xbf16, #tpu.memory_space<vmem>>, vector<1x4x4x128xbf16>
    %74 = vector.shape_cast %73 : vector<1x4x4x128xbf16> to vector<4x4x128xbf16>
    %75 = arith.extf %74 : vector<4x4x128xbf16> to vector<4x4x128xf32>
    %c8 = arith.constant 8 : index
    %c0_44 = arith.constant 0 : index
    %76 = vector.load %arg6[%c8, %c0_44] : memref<9x128xf32, #tpu.memory_space<vmem>>, vector<1x128xf32>
    %77 = vector.shape_cast %76 : vector<1x128xf32> to vector<128xf32>
    %78 = vector.shape_cast %77 : vector<128xf32> to vector<1x1x128xf32>
    %79 = vector.broadcast %78 : vector<1x1x128xf32> to vector<4x4x128xf32>
    %80 = arith.mulf %75, %79 : vector<4x4x128xf32>
    %81 = arith.addf %72, %80 : vector<4x4x128xf32>
    %c0_45 = arith.constant 0 : index
    %c0_46 = arith.constant 0 : index
    %82 = vector.load %arg7[%c0_45, %c0_46] : memref<1x128xf32, #tpu.memory_space<vmem>>, vector<1x128xf32>
    %83 = vector.shape_cast %82 : vector<1x128xf32> to vector<1x1x128xf32>
    %84 = vector.broadcast %83 : vector<1x1x128xf32> to vector<4x4x128xf32>
    %85 = arith.mulf %81, %84 : vector<4x4x128xf32>
    %c0_47 = arith.constant 0 : index
    %c0_48 = arith.constant 0 : index
    %86 = vector.load %arg8[%c0_47, %c0_48] : memref<1x128xf32, #tpu.memory_space<vmem>>, vector<1x128xf32>
    %87 = vector.shape_cast %86 : vector<1x128xf32> to vector<1x1x128xf32>
    %88 = vector.broadcast %87 : vector<1x1x128xf32> to vector<4x4x128xf32>
    %89 = arith.addf %85, %88 : vector<4x4x128xf32>
    %cst_49 = arith.constant 0.000000e+00 : f32
    %90 = vector.broadcast %cst_49 : f32 to vector<4x4x128xf32>
    %91 = arith.maximumf %89, %90 : vector<4x4x128xf32>
    %92 = arith.truncf %91 : vector<4x4x128xf32> to vector<4x4x128xbf16>
    %c0_50 = arith.constant 0 : index
    %c0_51 = arith.constant 0 : index
    %c0_52 = arith.constant 0 : index
    %c0_53 = arith.constant 0 : index
    %93 = vector.load %arg9[%c0_50, %c0_51, %c0_52, %c0_53] : memref<1x4x4x128xbf16, #tpu.memory_space<vmem>>, vector<1x4x4x128xbf16>
    %94 = vector.shape_cast %93 : vector<1x4x4x128xbf16> to vector<4x4x128xbf16>
    %95 = vector.shape_cast %92 : vector<4x4x128xbf16> to vector<1x4x4x128xbf16>
    tpu.vector_store %arg9[%c0_50, %c0_51, %c0_52, %c0_53], %95 {strides = array<i32>} : memref<1x4x4x128xbf16, #tpu.memory_space<vmem>>, vector<1x4x4x128xbf16>,
    return
  }
  func.func @transform_0(%arg0: i32, %arg1: i32) -> (i32, i32, i32, i32) {
    %c0_i32 = arith.constant 0 : i32
    %c0_i32_0 = arith.constant 0 : i32
    %c0_i32_1 = arith.constant 0 : i32
    return %arg0, %c0_i32, %c0_i32_0, %arg1 : i32, i32, i32, i32
  }
  func.func @transform_1(%arg0: i32, %arg1: i32) -> (i32, i32, i32, i32) {
    %c0_i32 = arith.constant 0 : i32
    %c0_i32_0 = arith.constant 0 : i32
    %c0_i32_1 = arith.constant 0 : i32
    return %arg0, %c0_i32, %c0_i32_0, %arg1 : i32, i32, i32, i32
  }
  func.func @transform_2(%arg0: i32, %arg1: i32) -> (i32, i32, i32, i32) {
    %c0_i32 = arith.constant 0 : i32
    %c0_i32_0 = arith.constant 0 : i32
    %c0_i32_1 = arith.constant 0 : i32
    return %arg0, %c0_i32, %c0_i32_0, %arg1 : i32, i32, i32, i32
  }
  func.func @transform_3(%arg0: i32, %arg1: i32) -> (i32, i32, i32, i32) {
    %c0_i32 = arith.constant 0 : i32
    %c0_i32_0 = arith.constant 0 : i32
    %c0_i32_1 = arith.constant 0 : i32
    return %arg0, %c0_i32, %c0_i32_0, %arg1 : i32, i32, i32, i32
  }
  func.func @transform_4(%arg0: i32, %arg1: i32) -> (i32, i32) {
    %c0_i32 = arith.constant 0 : i32
    %c0_i32_0 = arith.constant 0 : i32
    return %c0_i32, %arg1 : i32, i32
  }
  func.func @transform_5(%arg0: i32, %arg1: i32) -> (i32, i32) {
    %c0_i32 = arith.constant 0 : i32
    %c0_i32_0 = arith.constant 0 : i32
    return %c0_i32, %arg1 : i32, i32
  }
  func.func @transform_6(%arg0: i32, %arg1: i32) -> (i32, i32) {
    %c0_i32 = arith.constant 0 : i32
    %c0_i32_0 = arith.constant 0 : i32
    return %c0_i32, %arg1 : i32, i32
  }
  func.func @transform_7(%arg0: i32, %arg1: i32) -> (i32, i32, i32, i32) {
    %c0_i32 = arith.constant 0 : i32
    %c0_i32_0 = arith.constant 0 : i32
    %c0_i32_1 = arith.constant 0 : i32
    return %arg0, %c0_i32, %c0_i32_0, %arg1 : i32, i32, i32, i32
  }
}

module attributes {stable_mosaic.version = 11 : i64} {
  func.func @_pool_mlp_kernel(%arg0: i32, %arg1: i32, %arg2: memref<1x16x128xbf16, #tpu.memory_space<vmem>>, %arg3: memref<128x128xbf16, #tpu.memory_space<vmem>>, %arg4: memref<1x128xf32, #tpu.memory_space<vmem>>, %arg5: memref<128x128xbf16, #tpu.memory_space<vmem>>, %arg6: memref<1x128xf32, #tpu.memory_space<vmem>>, %arg7: memref<1x1x128xf32, #tpu.memory_space<vmem>>, %arg8: memref<1x128xf32, #tpu.memory_space<vmem>>) attributes {dimension_semantics = [#tpu.dimension_semantics<parallel>, #tpu.dimension_semantics<arbitrary>], iteration_bounds = array<i64: 2, 1>, scalar_prefetch = 0 : i64, scratch_operands = 1 : i64, tpu.core_type = #tpu.core_type<tc>, window_params = [{transform_indices = @transform_0, window_bounds = array<i64: 1, 16, 128>}, {pipeline_mode = #tpu.pipeline_mode<synchronous>, transform_indices = @transform_1, window_bounds = array<i64: 128, 128>}, {pipeline_mode = #tpu.pipeline_mode<synchronous>, transform_indices = @transform_2, window_bounds = array<i64: 1, 128>}, {pipeline_mode = #tpu.pipeline_mode<synchronous>, transform_indices = @transform_3, window_bounds = array<i64: 128, 128>}, {pipeline_mode = #tpu.pipeline_mode<synchronous>, transform_indices = @transform_4, window_bounds = array<i64: 1, 128>}, {transform_indices = @transform_5, window_bounds = array<i64: 1, 1, 128>}]} {
    %c0_i32 = arith.constant 0 : i32
    %0 = arith.cmpi eq, %arg1, %c0_i32 : i32
    %1 = arith.extui %0 : i1 to i32
    %c0_i32_0 = arith.constant 0 : i32
    %2 = arith.cmpi ne, %1, %c0_i32_0 : i32
    scf.if %2 {
      %cst_9 = arith.constant 0.000000e+00 : f32
      %14 = vector.broadcast %cst_9 : f32 to vector<1x128xf32>
      %c0_10 = arith.constant 0 : index
      %c0_11 = arith.constant 0 : index
      %15 = vector.load %arg8[%c0_10, %c0_11] : memref<1x128xf32, #tpu.memory_space<vmem>>, vector<1x128xf32>
      tpu.vector_store %arg8[%c0_10, %c0_11], %14 {strides = array<i32>} : memref<1x128xf32, #tpu.memory_space<vmem>>, vector<1x128xf32>,
    } else {
    }
    %c0 = arith.constant 0 : index
    %c0_1 = arith.constant 0 : index
    %3 = vector.load %arg8[%c0, %c0_1] : memref<1x128xf32, #tpu.memory_space<vmem>>, vector<1x128xf32>
    %c0_2 = arith.constant 0 : index
    %c0_3 = arith.constant 0 : index
    %c0_4 = arith.constant 0 : index
    %4 = vector.load %arg2[%c0_2, %c0_3, %c0_4] : memref<1x16x128xbf16, #tpu.memory_space<vmem>>, vector<1x16x128xbf16>
    %5 = vector.shape_cast %4 : vector<1x16x128xbf16> to vector<16x128xbf16>
    %6 = arith.extf %5 : vector<16x128xbf16> to vector<16x128xf32>
    %cst = arith.constant dense<0.000000e+00> : vector<128xf32>
    %7 = vector.multi_reduction <add>, %6, %cst [0] : vector<16x128xf32> to vector<128xf32>
    %8 = vector.shape_cast %7 : vector<128xf32> to vector<1x128xf32>
    %9 = arith.addf %3, %8 : vector<1x128xf32>
    %c0_5 = arith.constant 0 : index
    %c0_6 = arith.constant 0 : index
    %10 = vector.load %arg8[%c0_5, %c0_6] : memref<1x128xf32, #tpu.memory_space<vmem>>, vector<1x128xf32>
    tpu.vector_store %arg8[%c0_5, %c0_6], %9 {strides = array<i32>} : memref<1x128xf32, #tpu.memory_space<vmem>>, vector<1x128xf32>,
    %c0_i32_7 = arith.constant 0 : i32
    %11 = arith.cmpi eq, %arg1, %c0_i32_7 : i32
    %12 = arith.extui %11 : i1 to i32
    %c0_i32_8 = arith.constant 0 : i32
    %13 = arith.cmpi ne, %12, %c0_i32_8 : i32
    scf.if %13 {
      %c0_9 = arith.constant 0 : index
      %c0_10 = arith.constant 0 : index
      %14 = vector.load %arg8[%c0_9, %c0_10] : memref<1x128xf32, #tpu.memory_space<vmem>>, vector<1x128xf32>
      %cst_11 = arith.constant 6.250000e-02 : f32
      %15 = vector.broadcast %cst_11 : f32 to vector<1x128xf32>
      %16 = arith.mulf %14, %15 : vector<1x128xf32>
      %17 = arith.truncf %16 : vector<1x128xf32> to vector<1x128xbf16>
      %c0_12 = arith.constant 0 : index
      %c0_13 = arith.constant 0 : index
      %18 = vector.load %arg3[%c0_12, %c0_13] : memref<128x128xbf16, #tpu.memory_space<vmem>>, vector<128x128xbf16>
      %cst_14 = arith.constant dense<0.000000e+00> : vector<1x128xf32>
      %19 = tpu.matmul %17, %18, %cst_14 {dimension_numbers = #tpu.dot_dimension_numbers<[1], [0], [0], [1], [0, 0, 1, 1], [], []>} : vector<1x128xbf16>, vector<128x128xbf16>, vector<1x128xf32> -> vector<1x128xf32>
      %c0_15 = arith.constant 0 : index
      %c0_16 = arith.constant 0 : index
      %20 = vector.load %arg4[%c0_15, %c0_16] : memref<1x128xf32, #tpu.memory_space<vmem>>, vector<1x128xf32>
      %21 = arith.addf %19, %20 : vector<1x128xf32>
      %cst_17 = arith.constant 0.000000e+00 : f32
      %22 = vector.broadcast %cst_17 : f32 to vector<1x128xf32>
      %23 = arith.maximumf %21, %22 : vector<1x128xf32>
      %24 = arith.truncf %23 : vector<1x128xf32> to vector<1x128xbf16>
      %c0_18 = arith.constant 0 : index
      %c0_19 = arith.constant 0 : index
      %25 = vector.load %arg5[%c0_18, %c0_19] : memref<128x128xbf16, #tpu.memory_space<vmem>>, vector<128x128xbf16>
      %cst_20 = arith.constant dense<0.000000e+00> : vector<1x128xf32>
      %26 = tpu.matmul %24, %25, %cst_20 {dimension_numbers = #tpu.dot_dimension_numbers<[1], [0], [0], [1], [0, 0, 1, 1], [], []>} : vector<1x128xbf16>, vector<128x128xbf16>, vector<1x128xf32> -> vector<1x128xf32>
      %c0_21 = arith.constant 0 : index
      %c0_22 = arith.constant 0 : index
      %27 = vector.load %arg6[%c0_21, %c0_22] : memref<1x128xf32, #tpu.memory_space<vmem>>, vector<1x128xf32>
      %28 = arith.addf %26, %27 : vector<1x128xf32>
      %cst_23 = arith.constant 3.000000e+00 : f32
      %29 = vector.broadcast %cst_23 : f32 to vector<1x128xf32>
      %30 = arith.addf %28, %29 : vector<1x128xf32>
      %cst_24 = arith.constant 0.000000e+00 : f32
      %cst_25 = arith.constant 6.000000e+00 : f32
      %31 = vector.broadcast %cst_24 : f32 to vector<1x128xf32>
      %32 = arith.maximumf %31, %30 : vector<1x128xf32>
      %33 = vector.broadcast %cst_25 : f32 to vector<1x128xf32>
      %34 = arith.minimumf %33, %32 : vector<1x128xf32>
      %cst_26 = arith.constant 0.166666672 : f32
      %35 = vector.broadcast %cst_26 : f32 to vector<1x128xf32>
      %36 = arith.mulf %34, %35 : vector<1x128xf32>
      %c0_27 = arith.constant 0 : index
      %c0_28 = arith.constant 0 : index
      %c0_29 = arith.constant 0 : index
      %37 = vector.load %arg7[%c0_27, %c0_28, %c0_29] : memref<1x1x128xf32, #tpu.memory_space<vmem>>, vector<1x1x128xf32>
      %38 = vector.shape_cast %37 : vector<1x1x128xf32> to vector<1x128xf32>
      %39 = vector.shape_cast %36 : vector<1x128xf32> to vector<1x1x128xf32>
      tpu.vector_store %arg7[%c0_27, %c0_28, %c0_29], %39 {strides = array<i32>} : memref<1x1x128xf32, #tpu.memory_space<vmem>>, vector<1x1x128xf32>,
    } else {
    }
    return
  }
  func.func @transform_0(%arg0: i32, %arg1: i32) -> (i32, i32, i32) {
    %c0_i32 = arith.constant 0 : i32
    %c0_i32_0 = arith.constant 0 : i32
    return %arg0, %arg1, %c0_i32 : i32, i32, i32
  }
  func.func @transform_1(%arg0: i32, %arg1: i32) -> (i32, i32) {
    %c0_i32 = arith.constant 0 : i32
    %c0_i32_0 = arith.constant 0 : i32
    %c0_i32_1 = arith.constant 0 : i32
    return %c0_i32, %c0_i32_0 : i32, i32
  }
  func.func @transform_2(%arg0: i32, %arg1: i32) -> (i32, i32) {
    %c0_i32 = arith.constant 0 : i32
    %c0_i32_0 = arith.constant 0 : i32
    %c0_i32_1 = arith.constant 0 : i32
    return %c0_i32, %c0_i32_0 : i32, i32
  }
  func.func @transform_3(%arg0: i32, %arg1: i32) -> (i32, i32) {
    %c0_i32 = arith.constant 0 : i32
    %c0_i32_0 = arith.constant 0 : i32
    %c0_i32_1 = arith.constant 0 : i32
    return %c0_i32, %c0_i32_0 : i32, i32
  }
  func.func @transform_4(%arg0: i32, %arg1: i32) -> (i32, i32) {
    %c0_i32 = arith.constant 0 : i32
    %c0_i32_0 = arith.constant 0 : i32
    %c0_i32_1 = arith.constant 0 : i32
    return %c0_i32, %c0_i32_0 : i32, i32
  }
  func.func @transform_5(%arg0: i32, %arg1: i32) -> (i32, i32, i32) {
    %c0_i32 = arith.constant 0 : i32
    %c0_i32_0 = arith.constant 0 : i32
    %c0_i32_1 = arith.constant 0 : i32
    return %arg0, %c0_i32, %c0_i32_0 : i32, i32, i32
  }
}

module attributes {stable_mosaic.version = 11 : i64} {
  func.func @_pw_kernel(%arg0: i32, %arg1: i32, %arg2: memref<1x16x128xbf16, #tpu.memory_space<vmem>>, %arg3: memref<1x1x128xf32, #tpu.memory_space<vmem>>, %arg4: memref<128x128xbf16, #tpu.memory_space<vmem>>, %arg5: memref<1x128xf32, #tpu.memory_space<vmem>>, %arg6: memref<1x128xf32, #tpu.memory_space<vmem>>, %arg7: memref<1x16x128xbf16, #tpu.memory_space<vmem>>) attributes {dimension_semantics = [#tpu.dimension_semantics<parallel>, #tpu.dimension_semantics<parallel>], iteration_bounds = array<i64: 2, 1>, scalar_prefetch = 0 : i64, scratch_operands = 0 : i64, tpu.core_type = #tpu.core_type<tc>, window_params = [{transform_indices = @transform_0, window_bounds = array<i64: 1, 16, 128>}, {transform_indices = @transform_1, window_bounds = array<i64: 1, 1, 128>}, {pipeline_mode = #tpu.pipeline_mode<synchronous>, transform_indices = @transform_2, window_bounds = array<i64: 128, 128>}, {pipeline_mode = #tpu.pipeline_mode<synchronous>, transform_indices = @transform_3, window_bounds = array<i64: 1, 128>}, {pipeline_mode = #tpu.pipeline_mode<synchronous>, transform_indices = @transform_4, window_bounds = array<i64: 1, 128>}, {transform_indices = @transform_5, window_bounds = array<i64: 1, 16, 128>}]} {
    %c0 = arith.constant 0 : index
    %c0_0 = arith.constant 0 : index
    %c0_1 = arith.constant 0 : index
    %0 = vector.load %arg2[%c0, %c0_0, %c0_1] : memref<1x16x128xbf16, #tpu.memory_space<vmem>>, vector<1x16x128xbf16>
    %1 = vector.shape_cast %0 : vector<1x16x128xbf16> to vector<16x128xbf16>
    %2 = arith.extf %1 : vector<16x128xbf16> to vector<16x128xf32>
    %c0_2 = arith.constant 0 : index
    %c0_3 = arith.constant 0 : index
    %c0_4 = arith.constant 0 : index
    %3 = vector.load %arg3[%c0_2, %c0_3, %c0_4] : memref<1x1x128xf32, #tpu.memory_space<vmem>>, vector<1x1x128xf32>
    %4 = vector.shape_cast %3 : vector<1x1x128xf32> to vector<1x128xf32>
    %5 = vector.broadcast %4 : vector<1x128xf32> to vector<16x128xf32>
    %6 = arith.mulf %2, %5 : vector<16x128xf32>
    %7 = arith.truncf %6 : vector<16x128xf32> to vector<16x128xbf16>
    %c0_5 = arith.constant 0 : index
    %c0_6 = arith.constant 0 : index
    %8 = vector.load %arg4[%c0_5, %c0_6] : memref<128x128xbf16, #tpu.memory_space<vmem>>, vector<128x128xbf16>
    %cst = arith.constant dense<0.000000e+00> : vector<16x128xf32>
    %9 = tpu.matmul %7, %8, %cst {dimension_numbers = #tpu.dot_dimension_numbers<[1], [0], [0], [1], [0, 0, 1, 1], [], []>} : vector<16x128xbf16>, vector<128x128xbf16>, vector<16x128xf32> -> vector<16x128xf32>
    %c0_7 = arith.constant 0 : index
    %c0_8 = arith.constant 0 : index
    %10 = vector.load %arg5[%c0_7, %c0_8] : memref<1x128xf32, #tpu.memory_space<vmem>>, vector<1x128xf32>
    %11 = vector.broadcast %10 : vector<1x128xf32> to vector<16x128xf32>
    %12 = arith.mulf %9, %11 : vector<16x128xf32>
    %c0_9 = arith.constant 0 : index
    %c0_10 = arith.constant 0 : index
    %13 = vector.load %arg6[%c0_9, %c0_10] : memref<1x128xf32, #tpu.memory_space<vmem>>, vector<1x128xf32>
    %14 = vector.broadcast %13 : vector<1x128xf32> to vector<16x128xf32>
    %15 = arith.addf %12, %14 : vector<16x128xf32>
    %16 = arith.truncf %15 : vector<16x128xf32> to vector<16x128xbf16>
    %c0_11 = arith.constant 0 : index
    %c0_12 = arith.constant 0 : index
    %c0_13 = arith.constant 0 : index
    %17 = vector.load %arg7[%c0_11, %c0_12, %c0_13] : memref<1x16x128xbf16, #tpu.memory_space<vmem>>, vector<1x16x128xbf16>
    %18 = vector.shape_cast %17 : vector<1x16x128xbf16> to vector<16x128xbf16>
    %19 = vector.shape_cast %16 : vector<16x128xbf16> to vector<1x16x128xbf16>
    tpu.vector_store %arg7[%c0_11, %c0_12, %c0_13], %19 {strides = array<i32>} : memref<1x16x128xbf16, #tpu.memory_space<vmem>>, vector<1x16x128xbf16>,
    return
  }
  func.func @transform_0(%arg0: i32, %arg1: i32) -> (i32, i32, i32) {
    %c0_i32 = arith.constant 0 : i32
    %c0_i32_0 = arith.constant 0 : i32
    return %arg0, %arg1, %c0_i32 : i32, i32, i32
  }
  func.func @transform_1(%arg0: i32, %arg1: i32) -> (i32, i32, i32) {
    %c0_i32 = arith.constant 0 : i32
    %c0_i32_0 = arith.constant 0 : i32
    %c0_i32_1 = arith.constant 0 : i32
    return %arg0, %c0_i32, %c0_i32_0 : i32, i32, i32
  }
  func.func @transform_2(%arg0: i32, %arg1: i32) -> (i32, i32) {
    %c0_i32 = arith.constant 0 : i32
    %c0_i32_0 = arith.constant 0 : i32
    %c0_i32_1 = arith.constant 0 : i32
    return %c0_i32, %c0_i32_0 : i32, i32
  }
  func.func @transform_3(%arg0: i32, %arg1: i32) -> (i32, i32) {
    %c0_i32 = arith.constant 0 : i32
    %c0_i32_0 = arith.constant 0 : i32
    %c0_i32_1 = arith.constant 0 : i32
    return %c0_i32, %c0_i32_0 : i32, i32
  }
  func.func @transform_4(%arg0: i32, %arg1: i32) -> (i32, i32) {
    %c0_i32 = arith.constant 0 : i32
    %c0_i32_0 = arith.constant 0 : i32
    %c0_i32_1 = arith.constant 0 : i32
    return %c0_i32, %c0_i32_0 : i32, i32
  }
  func.func @transform_5(%arg0: i32, %arg1: i32) -> (i32, i32, i32) {
    %c0_i32 = arith.constant 0 : i32
    %c0_i32_0 = arith.constant 0 : i32
    return %arg0, %arg1, %c0_i32 : i32, i32, i32
  }
}

module attributes {stable_mosaic.version = 11 : i64} {
  func.func @_pw_kernel(%arg0: i32, %arg1: i32, %arg2: memref<1x16x128xbf16, #tpu.memory_space<vmem>>, %arg3: memref<128x128xbf16, #tpu.memory_space<vmem>>, %arg4: memref<1x128xf32, #tpu.memory_space<vmem>>, %arg5: memref<1x128xf32, #tpu.memory_space<vmem>>, %arg6: memref<1x16x128xbf16, #tpu.memory_space<vmem>>) attributes {dimension_semantics = [#tpu.dimension_semantics<parallel>, #tpu.dimension_semantics<parallel>], iteration_bounds = array<i64: 2, 1>, scalar_prefetch = 0 : i64, scratch_operands = 0 : i64, tpu.core_type = #tpu.core_type<tc>, window_params = [{transform_indices = @transform_0, window_bounds = array<i64: 1, 16, 128>}, {pipeline_mode = #tpu.pipeline_mode<synchronous>, transform_indices = @transform_1, window_bounds = array<i64: 128, 128>}, {pipeline_mode = #tpu.pipeline_mode<synchronous>, transform_indices = @transform_2, window_bounds = array<i64: 1, 128>}, {pipeline_mode = #tpu.pipeline_mode<synchronous>, transform_indices = @transform_3, window_bounds = array<i64: 1, 128>}, {transform_indices = @transform_4, window_bounds = array<i64: 1, 16, 128>}]} {
    %c0 = arith.constant 0 : index
    %c0_0 = arith.constant 0 : index
    %c0_1 = arith.constant 0 : index
    %0 = vector.load %arg2[%c0, %c0_0, %c0_1] : memref<1x16x128xbf16, #tpu.memory_space<vmem>>, vector<1x16x128xbf16>
    %1 = vector.shape_cast %0 : vector<1x16x128xbf16> to vector<16x128xbf16>
    %c0_2 = arith.constant 0 : index
    %c0_3 = arith.constant 0 : index
    %2 = vector.load %arg3[%c0_2, %c0_3] : memref<128x128xbf16, #tpu.memory_space<vmem>>, vector<128x128xbf16>
    %cst = arith.constant dense<0.000000e+00> : vector<16x128xf32>
    %3 = tpu.matmul %1, %2, %cst {dimension_numbers = #tpu.dot_dimension_numbers<[1], [0], [0], [1], [0, 0, 1, 1], [], []>} : vector<16x128xbf16>, vector<128x128xbf16>, vector<16x128xf32> -> vector<16x128xf32>
    %c0_4 = arith.constant 0 : index
    %c0_5 = arith.constant 0 : index
    %4 = vector.load %arg4[%c0_4, %c0_5] : memref<1x128xf32, #tpu.memory_space<vmem>>, vector<1x128xf32>
    %5 = vector.broadcast %4 : vector<1x128xf32> to vector<16x128xf32>
    %6 = arith.mulf %3, %5 : vector<16x128xf32>
    %c0_6 = arith.constant 0 : index
    %c0_7 = arith.constant 0 : index
    %7 = vector.load %arg5[%c0_6, %c0_7] : memref<1x128xf32, #tpu.memory_space<vmem>>, vector<1x128xf32>
    %8 = vector.broadcast %7 : vector<1x128xf32> to vector<16x128xf32>
    %9 = arith.addf %6, %8 : vector<16x128xf32>
    %cst_8 = arith.constant 0.000000e+00 : f32
    %10 = vector.broadcast %cst_8 : f32 to vector<16x128xf32>
    %11 = arith.maximumf %9, %10 : vector<16x128xf32>
    %12 = arith.truncf %11 : vector<16x128xf32> to vector<16x128xbf16>
    %c0_9 = arith.constant 0 : index
    %c0_10 = arith.constant 0 : index
    %c0_11 = arith.constant 0 : index
    %13 = vector.load %arg6[%c0_9, %c0_10, %c0_11] : memref<1x16x128xbf16, #tpu.memory_space<vmem>>, vector<1x16x128xbf16>
    %14 = vector.shape_cast %13 : vector<1x16x128xbf16> to vector<16x128xbf16>
    %15 = vector.shape_cast %12 : vector<16x128xbf16> to vector<1x16x128xbf16>
    tpu.vector_store %arg6[%c0_9, %c0_10, %c0_11], %15 {strides = array<i32>} : memref<1x16x128xbf16, #tpu.memory_space<vmem>>, vector<1x16x128xbf16>,
    return
  }
  func.func @transform_0(%arg0: i32, %arg1: i32) -> (i32, i32, i32) {
    %c0_i32 = arith.constant 0 : i32
    %c0_i32_0 = arith.constant 0 : i32
    return %arg0, %arg1, %c0_i32 : i32, i32, i32
  }
  func.func @transform_1(%arg0: i32, %arg1: i32) -> (i32, i32) {
    %c0_i32 = arith.constant 0 : i32
    %c0_i32_0 = arith.constant 0 : i32
    %c0_i32_1 = arith.constant 0 : i32
    return %c0_i32, %c0_i32_0 : i32, i32
  }
  func.func @transform_2(%arg0: i32, %arg1: i32) -> (i32, i32) {
    %c0_i32 = arith.constant 0 : i32
    %c0_i32_0 = arith.constant 0 : i32
    %c0_i32_1 = arith.constant 0 : i32
    return %c0_i32, %c0_i32_0 : i32, i32
  }
  func.func @transform_3(%arg0: i32, %arg1: i32) -> (i32, i32) {
    %c0_i32 = arith.constant 0 : i32
    %c0_i32_0 = arith.constant 0 : i32
    %c0_i32_1 = arith.constant 0 : i32
    return %c0_i32, %c0_i32_0 : i32, i32
  }
  func.func @transform_4(%arg0: i32, %arg1: i32) -> (i32, i32, i32) {
    %c0_i32 = arith.constant 0 : i32
    %c0_i32_0 = arith.constant 0 : i32
    return %arg0, %arg1, %c0_i32 : i32, i32, i32
  }
}

module attributes {stable_mosaic.version = 11 : i64} {
  func.func @_dw_kernel(%arg0: i32, %arg1: i32, %arg2: memref<1x3x3x128xbf16, #tpu.memory_space<vmem>>, %arg3: memref<1x3x3x128xbf16, #tpu.memory_space<vmem>>, %arg4: memref<1x3x3x128xbf16, #tpu.memory_space<vmem>>, %arg5: memref<1x3x3x128xbf16, #tpu.memory_space<vmem>>, %arg6: memref<9x128xf32, #tpu.memory_space<vmem>>, %arg7: memref<1x128xf32, #tpu.memory_space<vmem>>, %arg8: memref<1x128xf32, #tpu.memory_space<vmem>>, %arg9: memref<1x2x2x128xbf16, #tpu.memory_space<vmem>>) attributes {dimension_semantics = [#tpu.dimension_semantics<parallel>, #tpu.dimension_semantics<parallel>], iteration_bounds = array<i64: 2, 1>, scalar_prefetch = 0 : i64, scratch_operands = 0 : i64, tpu.core_type = #tpu.core_type<tc>, window_params = [{transform_indices = @transform_0, window_bounds = array<i64: 1, 3, 3, 128>}, {transform_indices = @transform_1, window_bounds = array<i64: 1, 3, 3, 128>}, {transform_indices = @transform_2, window_bounds = array<i64: 1, 3, 3, 128>}, {transform_indices = @transform_3, window_bounds = array<i64: 1, 3, 3, 128>}, {transform_indices = @transform_4, window_bounds = array<i64: 9, 128>}, {transform_indices = @transform_5, window_bounds = array<i64: 1, 128>}, {transform_indices = @transform_6, window_bounds = array<i64: 1, 128>}, {transform_indices = @transform_7, window_bounds = array<i64: 1, 2, 2, 128>}]} {
    %cst = arith.constant 0.000000e+00 : f32
    %0 = vector.broadcast %cst : f32 to vector<2x2x128xf32>
    %c0 = arith.constant 0 : index
    %c0_0 = arith.constant 0 : index
    %c0_1 = arith.constant 0 : index
    %c0_2 = arith.constant 0 : index
    %1 = vector.load %arg2[%c0, %c0_0, %c0_1, %c0_2] : memref<1x3x3x128xbf16, #tpu.memory_space<vmem>>, vector<1x2x2x128xbf16>
    %2 = vector.shape_cast %1 : vector<1x2x2x128xbf16> to vector<2x2x128xbf16>
    %3 = arith.extf %2 : vector<2x2x128xbf16> to vector<2x2x128xf32>
    %c0_3 = arith.constant 0 : index
    %c0_4 = arith.constant 0 : index
    %4 = vector.load %arg6[%c0_3, %c0_4] : memref<9x128xf32, #tpu.memory_space<vmem>>, vector<1x128xf32>
    %5 = vector.shape_cast %4 : vector<1x128xf32> to vector<128xf32>
    %6 = vector.shape_cast %5 : vector<128xf32> to vector<1x1x128xf32>
    %7 = vector.broadcast %6 : vector<1x1x128xf32> to vector<2x2x128xf32>
    %8 = arith.mulf %3, %7 : vector<2x2x128xf32>
    %9 = arith.addf %0, %8 : vector<2x2x128xf32>
    %c0_5 = arith.constant 0 : index
    %c0_6 = arith.constant 0 : index
    %c0_7 = arith.constant 0 : index
    %c0_8 = arith.constant 0 : index
    %10 = vector.load %arg3[%c0_5, %c0_6, %c0_7, %c0_8] : memref<1x3x3x128xbf16, #tpu.memory_space<vmem>>, vector<1x2x2x128xbf16>
    %11 = vector.shape_cast %10 : vector<1x2x2x128xbf16> to vector<2x2x128xbf16>
    %12 = arith.extf %11 : vector<2x2x128xbf16> to vector<2x2x128xf32>
    %c1 = arith.constant 1 : index
    %c0_9 = arith.constant 0 : index
    %13 = vector.load %arg6[%c1, %c0_9] : memref<9x128xf32, #tpu.memory_space<vmem>>, vector<1x128xf32>
    %14 = vector.shape_cast %13 : vector<1x128xf32> to vector<128xf32>
    %15 = vector.shape_cast %14 : vector<128xf32> to vector<1x1x128xf32>
    %16 = vector.broadcast %15 : vector<1x1x128xf32> to vector<2x2x128xf32>
    %17 = arith.mulf %12, %16 : vector<2x2x128xf32>
    %18 = arith.addf %9, %17 : vector<2x2x128xf32>
    %c0_10 = arith.constant 0 : index
    %c0_11 = arith.constant 0 : index
    %c1_12 = arith.constant 1 : index
    %c0_13 = arith.constant 0 : index
    %19 = vector.load %arg2[%c0_10, %c0_11, %c1_12, %c0_13] : memref<1x3x3x128xbf16, #tpu.memory_space<vmem>>, vector<1x2x2x128xbf16>
    %20 = vector.shape_cast %19 : vector<1x2x2x128xbf16> to vector<2x2x128xbf16>
    %21 = arith.extf %20 : vector<2x2x128xbf16> to vector<2x2x128xf32>
    %c2 = arith.constant 2 : index
    %c0_14 = arith.constant 0 : index
    %22 = vector.load %arg6[%c2, %c0_14] : memref<9x128xf32, #tpu.memory_space<vmem>>, vector<1x128xf32>
    %23 = vector.shape_cast %22 : vector<1x128xf32> to vector<128xf32>
    %24 = vector.shape_cast %23 : vector<128xf32> to vector<1x1x128xf32>
    %25 = vector.broadcast %24 : vector<1x1x128xf32> to vector<2x2x128xf32>
    %26 = arith.mulf %21, %25 : vector<2x2x128xf32>
    %27 = arith.addf %18, %26 : vector<2x2x128xf32>
    %c0_15 = arith.constant 0 : index
    %c0_16 = arith.constant 0 : index
    %c0_17 = arith.constant 0 : index
    %c0_18 = arith.constant 0 : index
    %28 = vector.load %arg4[%c0_15, %c0_16, %c0_17, %c0_18] : memref<1x3x3x128xbf16, #tpu.memory_space<vmem>>, vector<1x2x2x128xbf16>
    %29 = vector.shape_cast %28 : vector<1x2x2x128xbf16> to vector<2x2x128xbf16>
    %30 = arith.extf %29 : vector<2x2x128xbf16> to vector<2x2x128xf32>
    %c3 = arith.constant 3 : index
    %c0_19 = arith.constant 0 : index
    %31 = vector.load %arg6[%c3, %c0_19] : memref<9x128xf32, #tpu.memory_space<vmem>>, vector<1x128xf32>
    %32 = vector.shape_cast %31 : vector<1x128xf32> to vector<128xf32>
    %33 = vector.shape_cast %32 : vector<128xf32> to vector<1x1x128xf32>
    %34 = vector.broadcast %33 : vector<1x1x128xf32> to vector<2x2x128xf32>
    %35 = arith.mulf %30, %34 : vector<2x2x128xf32>
    %36 = arith.addf %27, %35 : vector<2x2x128xf32>
    %c0_20 = arith.constant 0 : index
    %c0_21 = arith.constant 0 : index
    %c0_22 = arith.constant 0 : index
    %c0_23 = arith.constant 0 : index
    %37 = vector.load %arg5[%c0_20, %c0_21, %c0_22, %c0_23] : memref<1x3x3x128xbf16, #tpu.memory_space<vmem>>, vector<1x2x2x128xbf16>
    %38 = vector.shape_cast %37 : vector<1x2x2x128xbf16> to vector<2x2x128xbf16>
    %39 = arith.extf %38 : vector<2x2x128xbf16> to vector<2x2x128xf32>
    %c4 = arith.constant 4 : index
    %c0_24 = arith.constant 0 : index
    %40 = vector.load %arg6[%c4, %c0_24] : memref<9x128xf32, #tpu.memory_space<vmem>>, vector<1x128xf32>
    %41 = vector.shape_cast %40 : vector<1x128xf32> to vector<128xf32>
    %42 = vector.shape_cast %41 : vector<128xf32> to vector<1x1x128xf32>
    %43 = vector.broadcast %42 : vector<1x1x128xf32> to vector<2x2x128xf32>
    %44 = arith.mulf %39, %43 : vector<2x2x128xf32>
    %45 = arith.addf %36, %44 : vector<2x2x128xf32>
    %c0_25 = arith.constant 0 : index
    %c0_26 = arith.constant 0 : index
    %c1_27 = arith.constant 1 : index
    %c0_28 = arith.constant 0 : index
    %46 = vector.load %arg4[%c0_25, %c0_26, %c1_27, %c0_28] : memref<1x3x3x128xbf16, #tpu.memory_space<vmem>>, vector<1x2x2x128xbf16>
    %47 = vector.shape_cast %46 : vector<1x2x2x128xbf16> to vector<2x2x128xbf16>
    %48 = arith.extf %47 : vector<2x2x128xbf16> to vector<2x2x128xf32>
    %c5 = arith.constant 5 : index
    %c0_29 = arith.constant 0 : index
    %49 = vector.load %arg6[%c5, %c0_29] : memref<9x128xf32, #tpu.memory_space<vmem>>, vector<1x128xf32>
    %50 = vector.shape_cast %49 : vector<1x128xf32> to vector<128xf32>
    %51 = vector.shape_cast %50 : vector<128xf32> to vector<1x1x128xf32>
    %52 = vector.broadcast %51 : vector<1x1x128xf32> to vector<2x2x128xf32>
    %53 = arith.mulf %48, %52 : vector<2x2x128xf32>
    %54 = arith.addf %45, %53 : vector<2x2x128xf32>
    %c0_30 = arith.constant 0 : index
    %c1_31 = arith.constant 1 : index
    %c0_32 = arith.constant 0 : index
    %c0_33 = arith.constant 0 : index
    %55 = vector.load %arg2[%c0_30, %c1_31, %c0_32, %c0_33] : memref<1x3x3x128xbf16, #tpu.memory_space<vmem>>, vector<1x2x2x128xbf16>
    %56 = vector.shape_cast %55 : vector<1x2x2x128xbf16> to vector<2x2x128xbf16>
    %57 = arith.extf %56 : vector<2x2x128xbf16> to vector<2x2x128xf32>
    %c6 = arith.constant 6 : index
    %c0_34 = arith.constant 0 : index
    %58 = vector.load %arg6[%c6, %c0_34] : memref<9x128xf32, #tpu.memory_space<vmem>>, vector<1x128xf32>
    %59 = vector.shape_cast %58 : vector<1x128xf32> to vector<128xf32>
    %60 = vector.shape_cast %59 : vector<128xf32> to vector<1x1x128xf32>
    %61 = vector.broadcast %60 : vector<1x1x128xf32> to vector<2x2x128xf32>
    %62 = arith.mulf %57, %61 : vector<2x2x128xf32>
    %63 = arith.addf %54, %62 : vector<2x2x128xf32>
    %c0_35 = arith.constant 0 : index
    %c1_36 = arith.constant 1 : index
    %c0_37 = arith.constant 0 : index
    %c0_38 = arith.constant 0 : index
    %64 = vector.load %arg3[%c0_35, %c1_36, %c0_37, %c0_38] : memref<1x3x3x128xbf16, #tpu.memory_space<vmem>>, vector<1x2x2x128xbf16>
    %65 = vector.shape_cast %64 : vector<1x2x2x128xbf16> to vector<2x2x128xbf16>
    %66 = arith.extf %65 : vector<2x2x128xbf16> to vector<2x2x128xf32>
    %c7 = arith.constant 7 : index
    %c0_39 = arith.constant 0 : index
    %67 = vector.load %arg6[%c7, %c0_39] : memref<9x128xf32, #tpu.memory_space<vmem>>, vector<1x128xf32>
    %68 = vector.shape_cast %67 : vector<1x128xf32> to vector<128xf32>
    %69 = vector.shape_cast %68 : vector<128xf32> to vector<1x1x128xf32>
    %70 = vector.broadcast %69 : vector<1x1x128xf32> to vector<2x2x128xf32>
    %71 = arith.mulf %66, %70 : vector<2x2x128xf32>
    %72 = arith.addf %63, %71 : vector<2x2x128xf32>
    %c0_40 = arith.constant 0 : index
    %c1_41 = arith.constant 1 : index
    %c1_42 = arith.constant 1 : index
    %c0_43 = arith.constant 0 : index
    %73 = vector.load %arg2[%c0_40, %c1_41, %c1_42, %c0_43] : memref<1x3x3x128xbf16, #tpu.memory_space<vmem>>, vector<1x2x2x128xbf16>
    %74 = vector.shape_cast %73 : vector<1x2x2x128xbf16> to vector<2x2x128xbf16>
    %75 = arith.extf %74 : vector<2x2x128xbf16> to vector<2x2x128xf32>
    %c8 = arith.constant 8 : index
    %c0_44 = arith.constant 0 : index
    %76 = vector.load %arg6[%c8, %c0_44] : memref<9x128xf32, #tpu.memory_space<vmem>>, vector<1x128xf32>
    %77 = vector.shape_cast %76 : vector<1x128xf32> to vector<128xf32>
    %78 = vector.shape_cast %77 : vector<128xf32> to vector<1x1x128xf32>
    %79 = vector.broadcast %78 : vector<1x1x128xf32> to vector<2x2x128xf32>
    %80 = arith.mulf %75, %79 : vector<2x2x128xf32>
    %81 = arith.addf %72, %80 : vector<2x2x128xf32>
    %c0_45 = arith.constant 0 : index
    %c0_46 = arith.constant 0 : index
    %82 = vector.load %arg7[%c0_45, %c0_46] : memref<1x128xf32, #tpu.memory_space<vmem>>, vector<1x128xf32>
    %83 = vector.shape_cast %82 : vector<1x128xf32> to vector<1x1x128xf32>
    %84 = vector.broadcast %83 : vector<1x1x128xf32> to vector<2x2x128xf32>
    %85 = arith.mulf %81, %84 : vector<2x2x128xf32>
    %c0_47 = arith.constant 0 : index
    %c0_48 = arith.constant 0 : index
    %86 = vector.load %arg8[%c0_47, %c0_48] : memref<1x128xf32, #tpu.memory_space<vmem>>, vector<1x128xf32>
    %87 = vector.shape_cast %86 : vector<1x128xf32> to vector<1x1x128xf32>
    %88 = vector.broadcast %87 : vector<1x1x128xf32> to vector<2x2x128xf32>
    %89 = arith.addf %85, %88 : vector<2x2x128xf32>
    %cst_49 = arith.constant 0.000000e+00 : f32
    %90 = vector.broadcast %cst_49 : f32 to vector<2x2x128xf32>
    %91 = arith.maximumf %89, %90 : vector<2x2x128xf32>
    %92 = arith.truncf %91 : vector<2x2x128xf32> to vector<2x2x128xbf16>
    %c0_50 = arith.constant 0 : index
    %c0_51 = arith.constant 0 : index
    %c0_52 = arith.constant 0 : index
    %c0_53 = arith.constant 0 : index
    %93 = vector.load %arg9[%c0_50, %c0_51, %c0_52, %c0_53] : memref<1x2x2x128xbf16, #tpu.memory_space<vmem>>, vector<1x2x2x128xbf16>
    %94 = vector.shape_cast %93 : vector<1x2x2x128xbf16> to vector<2x2x128xbf16>
    %95 = vector.shape_cast %92 : vector<2x2x128xbf16> to vector<1x2x2x128xbf16>
    tpu.vector_store %arg9[%c0_50, %c0_51, %c0_52, %c0_53], %95 {strides = array<i32>} : memref<1x2x2x128xbf16, #tpu.memory_space<vmem>>, vector<1x2x2x128xbf16>,
    return
  }
  func.func @transform_0(%arg0: i32, %arg1: i32) -> (i32, i32, i32, i32) {
    %c0_i32 = arith.constant 0 : i32
    %c0_i32_0 = arith.constant 0 : i32
    %c0_i32_1 = arith.constant 0 : i32
    return %arg0, %c0_i32, %c0_i32_0, %arg1 : i32, i32, i32, i32
  }
  func.func @transform_1(%arg0: i32, %arg1: i32) -> (i32, i32, i32, i32) {
    %c0_i32 = arith.constant 0 : i32
    %c0_i32_0 = arith.constant 0 : i32
    %c0_i32_1 = arith.constant 0 : i32
    return %arg0, %c0_i32, %c0_i32_0, %arg1 : i32, i32, i32, i32
  }
  func.func @transform_2(%arg0: i32, %arg1: i32) -> (i32, i32, i32, i32) {
    %c0_i32 = arith.constant 0 : i32
    %c0_i32_0 = arith.constant 0 : i32
    %c0_i32_1 = arith.constant 0 : i32
    return %arg0, %c0_i32, %c0_i32_0, %arg1 : i32, i32, i32, i32
  }
  func.func @transform_3(%arg0: i32, %arg1: i32) -> (i32, i32, i32, i32) {
    %c0_i32 = arith.constant 0 : i32
    %c0_i32_0 = arith.constant 0 : i32
    %c0_i32_1 = arith.constant 0 : i32
    return %arg0, %c0_i32, %c0_i32_0, %arg1 : i32, i32, i32, i32
  }
  func.func @transform_4(%arg0: i32, %arg1: i32) -> (i32, i32) {
    %c0_i32 = arith.constant 0 : i32
    %c0_i32_0 = arith.constant 0 : i32
    return %c0_i32, %arg1 : i32, i32
  }
  func.func @transform_5(%arg0: i32, %arg1: i32) -> (i32, i32) {
    %c0_i32 = arith.constant 0 : i32
    %c0_i32_0 = arith.constant 0 : i32
    return %c0_i32, %arg1 : i32, i32
  }
  func.func @transform_6(%arg0: i32, %arg1: i32) -> (i32, i32) {
    %c0_i32 = arith.constant 0 : i32
    %c0_i32_0 = arith.constant 0 : i32
    return %c0_i32, %arg1 : i32, i32
  }
  func.func @transform_7(%arg0: i32, %arg1: i32) -> (i32, i32, i32, i32) {
    %c0_i32 = arith.constant 0 : i32
    %c0_i32_0 = arith.constant 0 : i32
    %c0_i32_1 = arith.constant 0 : i32
    return %arg0, %c0_i32, %c0_i32_0, %arg1 : i32, i32, i32, i32
  }
}

module attributes {stable_mosaic.version = 11 : i64} {
  func.func @_pw_kernel(%arg0: i32, %arg1: i32, %arg2: memref<1x8x128xbf16, #tpu.memory_space<vmem>>, %arg3: memref<128x128xbf16, #tpu.memory_space<vmem>>, %arg4: memref<1x128xf32, #tpu.memory_space<vmem>>, %arg5: memref<1x128xf32, #tpu.memory_space<vmem>>, %arg6: memref<1x8x128xbf16, #tpu.memory_space<vmem>>) attributes {dimension_semantics = [#tpu.dimension_semantics<parallel>, #tpu.dimension_semantics<parallel>], iteration_bounds = array<i64: 2, 1>, scalar_prefetch = 0 : i64, scratch_operands = 0 : i64, tpu.core_type = #tpu.core_type<tc>, window_params = [{transform_indices = @transform_0, window_bounds = array<i64: 1, 8, 128>}, {pipeline_mode = #tpu.pipeline_mode<synchronous>, transform_indices = @transform_1, window_bounds = array<i64: 128, 128>}, {pipeline_mode = #tpu.pipeline_mode<synchronous>, transform_indices = @transform_2, window_bounds = array<i64: 1, 128>}, {pipeline_mode = #tpu.pipeline_mode<synchronous>, transform_indices = @transform_3, window_bounds = array<i64: 1, 128>}, {transform_indices = @transform_4, window_bounds = array<i64: 1, 8, 128>}]} {
    %c0 = arith.constant 0 : index
    %c0_0 = arith.constant 0 : index
    %c0_1 = arith.constant 0 : index
    %0 = vector.load %arg2[%c0, %c0_0, %c0_1] : memref<1x8x128xbf16, #tpu.memory_space<vmem>>, vector<1x8x128xbf16>
    %1 = vector.shape_cast %0 : vector<1x8x128xbf16> to vector<8x128xbf16>
    %c0_2 = arith.constant 0 : index
    %c0_3 = arith.constant 0 : index
    %2 = vector.load %arg3[%c0_2, %c0_3] : memref<128x128xbf16, #tpu.memory_space<vmem>>, vector<128x128xbf16>
    %cst = arith.constant dense<0.000000e+00> : vector<8x128xf32>
    %3 = tpu.matmul %1, %2, %cst {dimension_numbers = #tpu.dot_dimension_numbers<[1], [0], [0], [1], [0, 0, 1, 1], [], []>} : vector<8x128xbf16>, vector<128x128xbf16>, vector<8x128xf32> -> vector<8x128xf32>
    %c0_4 = arith.constant 0 : index
    %c0_5 = arith.constant 0 : index
    %4 = vector.load %arg4[%c0_4, %c0_5] : memref<1x128xf32, #tpu.memory_space<vmem>>, vector<1x128xf32>
    %5 = vector.broadcast %4 : vector<1x128xf32> to vector<8x128xf32>
    %6 = arith.mulf %3, %5 : vector<8x128xf32>
    %c0_6 = arith.constant 0 : index
    %c0_7 = arith.constant 0 : index
    %7 = vector.load %arg5[%c0_6, %c0_7] : memref<1x128xf32, #tpu.memory_space<vmem>>, vector<1x128xf32>
    %8 = vector.broadcast %7 : vector<1x128xf32> to vector<8x128xf32>
    %9 = arith.addf %6, %8 : vector<8x128xf32>
    %cst_8 = arith.constant 3.000000e+00 : f32
    %10 = vector.broadcast %cst_8 : f32 to vector<8x128xf32>
    %11 = arith.addf %9, %10 : vector<8x128xf32>
    %cst_9 = arith.constant 0.000000e+00 : f32
    %cst_10 = arith.constant 6.000000e+00 : f32
    %12 = vector.broadcast %cst_9 : f32 to vector<8x128xf32>
    %13 = arith.maximumf %12, %11 : vector<8x128xf32>
    %14 = vector.broadcast %cst_10 : f32 to vector<8x128xf32>
    %15 = arith.minimumf %14, %13 : vector<8x128xf32>
    %16 = arith.mulf %9, %15 : vector<8x128xf32>
    %cst_11 = arith.constant 0.166666672 : f32
    %17 = vector.broadcast %cst_11 : f32 to vector<8x128xf32>
    %18 = arith.mulf %16, %17 : vector<8x128xf32>
    %19 = arith.truncf %18 : vector<8x128xf32> to vector<8x128xbf16>
    %c0_12 = arith.constant 0 : index
    %c0_13 = arith.constant 0 : index
    %c0_14 = arith.constant 0 : index
    %20 = vector.load %arg6[%c0_12, %c0_13, %c0_14] : memref<1x8x128xbf16, #tpu.memory_space<vmem>>, vector<1x8x128xbf16>
    %21 = vector.shape_cast %20 : vector<1x8x128xbf16> to vector<8x128xbf16>
    %22 = vector.shape_cast %19 : vector<8x128xbf16> to vector<1x8x128xbf16>
    tpu.vector_store %arg6[%c0_12, %c0_13, %c0_14], %22 {strides = array<i32>} : memref<1x8x128xbf16, #tpu.memory_space<vmem>>, vector<1x8x128xbf16>,
    return
  }
  func.func @transform_0(%arg0: i32, %arg1: i32) -> (i32, i32, i32) {
    %c0_i32 = arith.constant 0 : i32
    %c0_i32_0 = arith.constant 0 : i32
    return %arg0, %arg1, %c0_i32 : i32, i32, i32
  }
  func.func @transform_1(%arg0: i32, %arg1: i32) -> (i32, i32) {
    %c0_i32 = arith.constant 0 : i32
    %c0_i32_0 = arith.constant 0 : i32
    %c0_i32_1 = arith.constant 0 : i32
    return %c0_i32, %c0_i32_0 : i32, i32
  }
  func.func @transform_2(%arg0: i32, %arg1: i32) -> (i32, i32) {
    %c0_i32 = arith.constant 0 : i32
    %c0_i32_0 = arith.constant 0 : i32
    %c0_i32_1 = arith.constant 0 : i32
    return %c0_i32, %c0_i32_0 : i32, i32
  }
  func.func @transform_3(%arg0: i32, %arg1: i32) -> (i32, i32) {
    %c0_i32 = arith.constant 0 : i32
    %c0_i32_0 = arith.constant 0 : i32
    %c0_i32_1 = arith.constant 0 : i32
    return %c0_i32, %c0_i32_0 : i32, i32
  }
  func.func @transform_4(%arg0: i32, %arg1: i32) -> (i32, i32, i32) {
    %c0_i32 = arith.constant 0 : i32
    %c0_i32_0 = arith.constant 0 : i32
    return %arg0, %arg1, %c0_i32 : i32, i32, i32
  }
}

module attributes {stable_mosaic.version = 11 : i64} {
  func.func @_pw_kernel(%arg0: i32, %arg1: i32, %arg2: memref<1x8x128xbf16, #tpu.memory_space<vmem>>, %arg3: memref<128x128xbf16, #tpu.memory_space<vmem>>, %arg4: memref<1x128xf32, #tpu.memory_space<vmem>>, %arg5: memref<1x128xf32, #tpu.memory_space<vmem>>, %arg6: memref<1x8x128xbf16, #tpu.memory_space<vmem>>) attributes {dimension_semantics = [#tpu.dimension_semantics<parallel>, #tpu.dimension_semantics<parallel>], iteration_bounds = array<i64: 2, 1>, scalar_prefetch = 0 : i64, scratch_operands = 0 : i64, tpu.core_type = #tpu.core_type<tc>, window_params = [{transform_indices = @transform_0, window_bounds = array<i64: 1, 8, 128>}, {pipeline_mode = #tpu.pipeline_mode<synchronous>, transform_indices = @transform_1, window_bounds = array<i64: 128, 128>}, {pipeline_mode = #tpu.pipeline_mode<synchronous>, transform_indices = @transform_2, window_bounds = array<i64: 1, 128>}, {pipeline_mode = #tpu.pipeline_mode<synchronous>, transform_indices = @transform_3, window_bounds = array<i64: 1, 128>}, {transform_indices = @transform_4, window_bounds = array<i64: 1, 8, 128>}]} {
    %c0 = arith.constant 0 : index
    %c0_0 = arith.constant 0 : index
    %c0_1 = arith.constant 0 : index
    %0 = vector.load %arg2[%c0, %c0_0, %c0_1] : memref<1x8x128xbf16, #tpu.memory_space<vmem>>, vector<1x8x128xbf16>
    %1 = vector.shape_cast %0 : vector<1x8x128xbf16> to vector<8x128xbf16>
    %c0_2 = arith.constant 0 : index
    %c0_3 = arith.constant 0 : index
    %2 = vector.load %arg3[%c0_2, %c0_3] : memref<128x128xbf16, #tpu.memory_space<vmem>>, vector<128x128xbf16>
    %cst = arith.constant dense<0.000000e+00> : vector<8x128xf32>
    %3 = tpu.matmul %1, %2, %cst {dimension_numbers = #tpu.dot_dimension_numbers<[1], [0], [0], [1], [0, 0, 1, 1], [], []>} : vector<8x128xbf16>, vector<128x128xbf16>, vector<8x128xf32> -> vector<8x128xf32>
    %c0_4 = arith.constant 0 : index
    %c0_5 = arith.constant 0 : index
    %4 = vector.load %arg4[%c0_4, %c0_5] : memref<1x128xf32, #tpu.memory_space<vmem>>, vector<1x128xf32>
    %5 = vector.broadcast %4 : vector<1x128xf32> to vector<8x128xf32>
    %6 = arith.mulf %3, %5 : vector<8x128xf32>
    %c0_6 = arith.constant 0 : index
    %c0_7 = arith.constant 0 : index
    %7 = vector.load %arg5[%c0_6, %c0_7] : memref<1x128xf32, #tpu.memory_space<vmem>>, vector<1x128xf32>
    %8 = vector.broadcast %7 : vector<1x128xf32> to vector<8x128xf32>
    %9 = arith.addf %6, %8 : vector<8x128xf32>
    %10 = arith.truncf %9 : vector<8x128xf32> to vector<8x128xbf16>
    %c0_8 = arith.constant 0 : index
    %c0_9 = arith.constant 0 : index
    %c0_10 = arith.constant 0 : index
    %11 = vector.load %arg6[%c0_8, %c0_9, %c0_10] : memref<1x8x128xbf16, #tpu.memory_space<vmem>>, vector<1x8x128xbf16>
    %12 = vector.shape_cast %11 : vector<1x8x128xbf16> to vector<8x128xbf16>
    %13 = vector.shape_cast %10 : vector<8x128xbf16> to vector<1x8x128xbf16>
    tpu.vector_store %arg6[%c0_8, %c0_9, %c0_10], %13 {strides = array<i32>} : memref<1x8x128xbf16, #tpu.memory_space<vmem>>, vector<1x8x128xbf16>,
    return
  }
  func.func @transform_0(%arg0: i32, %arg1: i32) -> (i32, i32, i32) {
    %c0_i32 = arith.constant 0 : i32
    %c0_i32_0 = arith.constant 0 : i32
    return %arg0, %arg1, %c0_i32 : i32, i32, i32
  }
  func.func @transform_1(%arg0: i32, %arg1: i32) -> (i32, i32) {
    %c0_i32 = arith.constant 0 : i32
    %c0_i32_0 = arith.constant 0 : i32
    %c0_i32_1 = arith.constant 0 : i32
    return %c0_i32, %c0_i32_0 : i32, i32
  }
  func.func @transform_2(%arg0: i32, %arg1: i32) -> (i32, i32) {
    %c0_i32 = arith.constant 0 : i32
    %c0_i32_0 = arith.constant 0 : i32
    %c0_i32_1 = arith.constant 0 : i32
    return %c0_i32, %c0_i32_0 : i32, i32
  }
  func.func @transform_3(%arg0: i32, %arg1: i32) -> (i32, i32) {
    %c0_i32 = arith.constant 0 : i32
    %c0_i32_0 = arith.constant 0 : i32
    %c0_i32_1 = arith.constant 0 : i32
    return %c0_i32, %c0_i32_0 : i32, i32
  }
  func.func @transform_4(%arg0: i32, %arg1: i32) -> (i32, i32, i32) {
    %c0_i32 = arith.constant 0 : i32
    %c0_i32_0 = arith.constant 0 : i32
    return %arg0, %arg1, %c0_i32 : i32, i32, i32
  }
}

module attributes {stable_mosaic.version = 11 : i64} {
  func.func @_dw_kernel(%arg0: i32, %arg1: i32, %arg2: memref<1x6x6x128xbf16, #tpu.memory_space<vmem>>, %arg3: memref<25x128xf32, #tpu.memory_space<vmem>>, %arg4: memref<1x128xf32, #tpu.memory_space<vmem>>, %arg5: memref<1x128xf32, #tpu.memory_space<vmem>>, %arg6: memref<1x2x2x128xbf16, #tpu.memory_space<vmem>>) attributes {dimension_semantics = [#tpu.dimension_semantics<parallel>, #tpu.dimension_semantics<parallel>], iteration_bounds = array<i64: 2, 1>, scalar_prefetch = 0 : i64, scratch_operands = 0 : i64, tpu.core_type = #tpu.core_type<tc>, window_params = [{transform_indices = @transform_0, window_bounds = array<i64: 1, 6, 6, 128>}, {transform_indices = @transform_1, window_bounds = array<i64: 25, 128>}, {transform_indices = @transform_2, window_bounds = array<i64: 1, 128>}, {transform_indices = @transform_3, window_bounds = array<i64: 1, 128>}, {transform_indices = @transform_4, window_bounds = array<i64: 1, 2, 2, 128>}]} {
    %cst = arith.constant 0.000000e+00 : f32
    %0 = vector.broadcast %cst : f32 to vector<2x2x128xf32>
    %c0 = arith.constant 0 : index
    %c0_0 = arith.constant 0 : index
    %c0_1 = arith.constant 0 : index
    %c0_2 = arith.constant 0 : index
    %1 = vector.load %arg2[%c0, %c0_0, %c0_1, %c0_2] : memref<1x6x6x128xbf16, #tpu.memory_space<vmem>>, vector<1x2x2x128xbf16>
    %2 = vector.shape_cast %1 : vector<1x2x2x128xbf16> to vector<2x2x128xbf16>
    %3 = arith.extf %2 : vector<2x2x128xbf16> to vector<2x2x128xf32>
    %c0_3 = arith.constant 0 : index
    %c0_4 = arith.constant 0 : index
    %4 = vector.load %arg3[%c0_3, %c0_4] : memref<25x128xf32, #tpu.memory_space<vmem>>, vector<1x128xf32>
    %5 = vector.shape_cast %4 : vector<1x128xf32> to vector<128xf32>
    %6 = vector.shape_cast %5 : vector<128xf32> to vector<1x1x128xf32>
    %7 = vector.broadcast %6 : vector<1x1x128xf32> to vector<2x2x128xf32>
    %8 = arith.mulf %3, %7 : vector<2x2x128xf32>
    %9 = arith.addf %0, %8 : vector<2x2x128xf32>
    %c0_5 = arith.constant 0 : index
    %c0_6 = arith.constant 0 : index
    %c1 = arith.constant 1 : index
    %c0_7 = arith.constant 0 : index
    %10 = vector.load %arg2[%c0_5, %c0_6, %c1, %c0_7] : memref<1x6x6x128xbf16, #tpu.memory_space<vmem>>, vector<1x2x2x128xbf16>
    %11 = vector.shape_cast %10 : vector<1x2x2x128xbf16> to vector<2x2x128xbf16>
    %12 = arith.extf %11 : vector<2x2x128xbf16> to vector<2x2x128xf32>
    %c1_8 = arith.constant 1 : index
    %c0_9 = arith.constant 0 : index
    %13 = vector.load %arg3[%c1_8, %c0_9] : memref<25x128xf32, #tpu.memory_space<vmem>>, vector<1x128xf32>
    %14 = vector.shape_cast %13 : vector<1x128xf32> to vector<128xf32>
    %15 = vector.shape_cast %14 : vector<128xf32> to vector<1x1x128xf32>
    %16 = vector.broadcast %15 : vector<1x1x128xf32> to vector<2x2x128xf32>
    %17 = arith.mulf %12, %16 : vector<2x2x128xf32>
    %18 = arith.addf %9, %17 : vector<2x2x128xf32>
    %c0_10 = arith.constant 0 : index
    %c0_11 = arith.constant 0 : index
    %c2 = arith.constant 2 : index
    %c0_12 = arith.constant 0 : index
    %19 = vector.load %arg2[%c0_10, %c0_11, %c2, %c0_12] : memref<1x6x6x128xbf16, #tpu.memory_space<vmem>>, vector<1x2x2x128xbf16>
    %20 = vector.shape_cast %19 : vector<1x2x2x128xbf16> to vector<2x2x128xbf16>
    %21 = arith.extf %20 : vector<2x2x128xbf16> to vector<2x2x128xf32>
    %c2_13 = arith.constant 2 : index
    %c0_14 = arith.constant 0 : index
    %22 = vector.load %arg3[%c2_13, %c0_14] : memref<25x128xf32, #tpu.memory_space<vmem>>, vector<1x128xf32>
    %23 = vector.shape_cast %22 : vector<1x128xf32> to vector<128xf32>
    %24 = vector.shape_cast %23 : vector<128xf32> to vector<1x1x128xf32>
    %25 = vector.broadcast %24 : vector<1x1x128xf32> to vector<2x2x128xf32>
    %26 = arith.mulf %21, %25 : vector<2x2x128xf32>
    %27 = arith.addf %18, %26 : vector<2x2x128xf32>
    %c0_15 = arith.constant 0 : index
    %c0_16 = arith.constant 0 : index
    %c3 = arith.constant 3 : index
    %c0_17 = arith.constant 0 : index
    %28 = vector.load %arg2[%c0_15, %c0_16, %c3, %c0_17] : memref<1x6x6x128xbf16, #tpu.memory_space<vmem>>, vector<1x2x2x128xbf16>
    %29 = vector.shape_cast %28 : vector<1x2x2x128xbf16> to vector<2x2x128xbf16>
    %30 = arith.extf %29 : vector<2x2x128xbf16> to vector<2x2x128xf32>
    %c3_18 = arith.constant 3 : index
    %c0_19 = arith.constant 0 : index
    %31 = vector.load %arg3[%c3_18, %c0_19] : memref<25x128xf32, #tpu.memory_space<vmem>>, vector<1x128xf32>
    %32 = vector.shape_cast %31 : vector<1x128xf32> to vector<128xf32>
    %33 = vector.shape_cast %32 : vector<128xf32> to vector<1x1x128xf32>
    %34 = vector.broadcast %33 : vector<1x1x128xf32> to vector<2x2x128xf32>
    %35 = arith.mulf %30, %34 : vector<2x2x128xf32>
    %36 = arith.addf %27, %35 : vector<2x2x128xf32>
    %c0_20 = arith.constant 0 : index
    %c0_21 = arith.constant 0 : index
    %c4 = arith.constant 4 : index
    %c0_22 = arith.constant 0 : index
    %37 = vector.load %arg2[%c0_20, %c0_21, %c4, %c0_22] : memref<1x6x6x128xbf16, #tpu.memory_space<vmem>>, vector<1x2x2x128xbf16>
    %38 = vector.shape_cast %37 : vector<1x2x2x128xbf16> to vector<2x2x128xbf16>
    %39 = arith.extf %38 : vector<2x2x128xbf16> to vector<2x2x128xf32>
    %c4_23 = arith.constant 4 : index
    %c0_24 = arith.constant 0 : index
    %40 = vector.load %arg3[%c4_23, %c0_24] : memref<25x128xf32, #tpu.memory_space<vmem>>, vector<1x128xf32>
    %41 = vector.shape_cast %40 : vector<1x128xf32> to vector<128xf32>
    %42 = vector.shape_cast %41 : vector<128xf32> to vector<1x1x128xf32>
    %43 = vector.broadcast %42 : vector<1x1x128xf32> to vector<2x2x128xf32>
    %44 = arith.mulf %39, %43 : vector<2x2x128xf32>
    %45 = arith.addf %36, %44 : vector<2x2x128xf32>
    %c0_25 = arith.constant 0 : index
    %c1_26 = arith.constant 1 : index
    %c0_27 = arith.constant 0 : index
    %c0_28 = arith.constant 0 : index
    %46 = vector.load %arg2[%c0_25, %c1_26, %c0_27, %c0_28] : memref<1x6x6x128xbf16, #tpu.memory_space<vmem>>, vector<1x2x2x128xbf16>
    %47 = vector.shape_cast %46 : vector<1x2x2x128xbf16> to vector<2x2x128xbf16>
    %48 = arith.extf %47 : vector<2x2x128xbf16> to vector<2x2x128xf32>
    %c5 = arith.constant 5 : index
    %c0_29 = arith.constant 0 : index
    %49 = vector.load %arg3[%c5, %c0_29] : memref<25x128xf32, #tpu.memory_space<vmem>>, vector<1x128xf32>
    %50 = vector.shape_cast %49 : vector<1x128xf32> to vector<128xf32>
    %51 = vector.shape_cast %50 : vector<128xf32> to vector<1x1x128xf32>
    %52 = vector.broadcast %51 : vector<1x1x128xf32> to vector<2x2x128xf32>
    %53 = arith.mulf %48, %52 : vector<2x2x128xf32>
    %54 = arith.addf %45, %53 : vector<2x2x128xf32>
    %c0_30 = arith.constant 0 : index
    %c1_31 = arith.constant 1 : index
    %c1_32 = arith.constant 1 : index
    %c0_33 = arith.constant 0 : index
    %55 = vector.load %arg2[%c0_30, %c1_31, %c1_32, %c0_33] : memref<1x6x6x128xbf16, #tpu.memory_space<vmem>>, vector<1x2x2x128xbf16>
    %56 = vector.shape_cast %55 : vector<1x2x2x128xbf16> to vector<2x2x128xbf16>
    %57 = arith.extf %56 : vector<2x2x128xbf16> to vector<2x2x128xf32>
    %c6 = arith.constant 6 : index
    %c0_34 = arith.constant 0 : index
    %58 = vector.load %arg3[%c6, %c0_34] : memref<25x128xf32, #tpu.memory_space<vmem>>, vector<1x128xf32>
    %59 = vector.shape_cast %58 : vector<1x128xf32> to vector<128xf32>
    %60 = vector.shape_cast %59 : vector<128xf32> to vector<1x1x128xf32>
    %61 = vector.broadcast %60 : vector<1x1x128xf32> to vector<2x2x128xf32>
    %62 = arith.mulf %57, %61 : vector<2x2x128xf32>
    %63 = arith.addf %54, %62 : vector<2x2x128xf32>
    %c0_35 = arith.constant 0 : index
    %c1_36 = arith.constant 1 : index
    %c2_37 = arith.constant 2 : index
    %c0_38 = arith.constant 0 : index
    %64 = vector.load %arg2[%c0_35, %c1_36, %c2_37, %c0_38] : memref<1x6x6x128xbf16, #tpu.memory_space<vmem>>, vector<1x2x2x128xbf16>
    %65 = vector.shape_cast %64 : vector<1x2x2x128xbf16> to vector<2x2x128xbf16>
    %66 = arith.extf %65 : vector<2x2x128xbf16> to vector<2x2x128xf32>
    %c7 = arith.constant 7 : index
    %c0_39 = arith.constant 0 : index
    %67 = vector.load %arg3[%c7, %c0_39] : memref<25x128xf32, #tpu.memory_space<vmem>>, vector<1x128xf32>
    %68 = vector.shape_cast %67 : vector<1x128xf32> to vector<128xf32>
    %69 = vector.shape_cast %68 : vector<128xf32> to vector<1x1x128xf32>
    %70 = vector.broadcast %69 : vector<1x1x128xf32> to vector<2x2x128xf32>
    %71 = arith.mulf %66, %70 : vector<2x2x128xf32>
    %72 = arith.addf %63, %71 : vector<2x2x128xf32>
    %c0_40 = arith.constant 0 : index
    %c1_41 = arith.constant 1 : index
    %c3_42 = arith.constant 3 : index
    %c0_43 = arith.constant 0 : index
    %73 = vector.load %arg2[%c0_40, %c1_41, %c3_42, %c0_43] : memref<1x6x6x128xbf16, #tpu.memory_space<vmem>>, vector<1x2x2x128xbf16>
    %74 = vector.shape_cast %73 : vector<1x2x2x128xbf16> to vector<2x2x128xbf16>
    %75 = arith.extf %74 : vector<2x2x128xbf16> to vector<2x2x128xf32>
    %c8 = arith.constant 8 : index
    %c0_44 = arith.constant 0 : index
    %76 = vector.load %arg3[%c8, %c0_44] : memref<25x128xf32, #tpu.memory_space<vmem>>, vector<1x128xf32>
    %77 = vector.shape_cast %76 : vector<1x128xf32> to vector<128xf32>
    %78 = vector.shape_cast %77 : vector<128xf32> to vector<1x1x128xf32>
    %79 = vector.broadcast %78 : vector<1x1x128xf32> to vector<2x2x128xf32>
    %80 = arith.mulf %75, %79 : vector<2x2x128xf32>
    %81 = arith.addf %72, %80 : vector<2x2x128xf32>
    %c0_45 = arith.constant 0 : index
    %c1_46 = arith.constant 1 : index
    %c4_47 = arith.constant 4 : index
    %c0_48 = arith.constant 0 : index
    %82 = vector.load %arg2[%c0_45, %c1_46, %c4_47, %c0_48] : memref<1x6x6x128xbf16, #tpu.memory_space<vmem>>, vector<1x2x2x128xbf16>
    %83 = vector.shape_cast %82 : vector<1x2x2x128xbf16> to vector<2x2x128xbf16>
    %84 = arith.extf %83 : vector<2x2x128xbf16> to vector<2x2x128xf32>
    %c9 = arith.constant 9 : index
    %c0_49 = arith.constant 0 : index
    %85 = vector.load %arg3[%c9, %c0_49] : memref<25x128xf32, #tpu.memory_space<vmem>>, vector<1x128xf32>
    %86 = vector.shape_cast %85 : vector<1x128xf32> to vector<128xf32>
    %87 = vector.shape_cast %86 : vector<128xf32> to vector<1x1x128xf32>
    %88 = vector.broadcast %87 : vector<1x1x128xf32> to vector<2x2x128xf32>
    %89 = arith.mulf %84, %88 : vector<2x2x128xf32>
    %90 = arith.addf %81, %89 : vector<2x2x128xf32>
    %c0_50 = arith.constant 0 : index
    %c2_51 = arith.constant 2 : index
    %c0_52 = arith.constant 0 : index
    %c0_53 = arith.constant 0 : index
    %91 = vector.load %arg2[%c0_50, %c2_51, %c0_52, %c0_53] : memref<1x6x6x128xbf16, #tpu.memory_space<vmem>>, vector<1x2x2x128xbf16>
    %92 = vector.shape_cast %91 : vector<1x2x2x128xbf16> to vector<2x2x128xbf16>
    %93 = arith.extf %92 : vector<2x2x128xbf16> to vector<2x2x128xf32>
    %c10 = arith.constant 10 : index
    %c0_54 = arith.constant 0 : index
    %94 = vector.load %arg3[%c10, %c0_54] : memref<25x128xf32, #tpu.memory_space<vmem>>, vector<1x128xf32>
    %95 = vector.shape_cast %94 : vector<1x128xf32> to vector<128xf32>
    %96 = vector.shape_cast %95 : vector<128xf32> to vector<1x1x128xf32>
    %97 = vector.broadcast %96 : vector<1x1x128xf32> to vector<2x2x128xf32>
    %98 = arith.mulf %93, %97 : vector<2x2x128xf32>
    %99 = arith.addf %90, %98 : vector<2x2x128xf32>
    %c0_55 = arith.constant 0 : index
    %c2_56 = arith.constant 2 : index
    %c1_57 = arith.constant 1 : index
    %c0_58 = arith.constant 0 : index
    %100 = vector.load %arg2[%c0_55, %c2_56, %c1_57, %c0_58] : memref<1x6x6x128xbf16, #tpu.memory_space<vmem>>, vector<1x2x2x128xbf16>
    %101 = vector.shape_cast %100 : vector<1x2x2x128xbf16> to vector<2x2x128xbf16>
    %102 = arith.extf %101 : vector<2x2x128xbf16> to vector<2x2x128xf32>
    %c11 = arith.constant 11 : index
    %c0_59 = arith.constant 0 : index
    %103 = vector.load %arg3[%c11, %c0_59] : memref<25x128xf32, #tpu.memory_space<vmem>>, vector<1x128xf32>
    %104 = vector.shape_cast %103 : vector<1x128xf32> to vector<128xf32>
    %105 = vector.shape_cast %104 : vector<128xf32> to vector<1x1x128xf32>
    %106 = vector.broadcast %105 : vector<1x1x128xf32> to vector<2x2x128xf32>
    %107 = arith.mulf %102, %106 : vector<2x2x128xf32>
    %108 = arith.addf %99, %107 : vector<2x2x128xf32>
    %c0_60 = arith.constant 0 : index
    %c2_61 = arith.constant 2 : index
    %c2_62 = arith.constant 2 : index
    %c0_63 = arith.constant 0 : index
    %109 = vector.load %arg2[%c0_60, %c2_61, %c2_62, %c0_63] : memref<1x6x6x128xbf16, #tpu.memory_space<vmem>>, vector<1x2x2x128xbf16>
    %110 = vector.shape_cast %109 : vector<1x2x2x128xbf16> to vector<2x2x128xbf16>
    %111 = arith.extf %110 : vector<2x2x128xbf16> to vector<2x2x128xf32>
    %c12 = arith.constant 12 : index
    %c0_64 = arith.constant 0 : index
    %112 = vector.load %arg3[%c12, %c0_64] : memref<25x128xf32, #tpu.memory_space<vmem>>, vector<1x128xf32>
    %113 = vector.shape_cast %112 : vector<1x128xf32> to vector<128xf32>
    %114 = vector.shape_cast %113 : vector<128xf32> to vector<1x1x128xf32>
    %115 = vector.broadcast %114 : vector<1x1x128xf32> to vector<2x2x128xf32>
    %116 = arith.mulf %111, %115 : vector<2x2x128xf32>
    %117 = arith.addf %108, %116 : vector<2x2x128xf32>
    %c0_65 = arith.constant 0 : index
    %c2_66 = arith.constant 2 : index
    %c3_67 = arith.constant 3 : index
    %c0_68 = arith.constant 0 : index
    %118 = vector.load %arg2[%c0_65, %c2_66, %c3_67, %c0_68] : memref<1x6x6x128xbf16, #tpu.memory_space<vmem>>, vector<1x2x2x128xbf16>
    %119 = vector.shape_cast %118 : vector<1x2x2x128xbf16> to vector<2x2x128xbf16>
    %120 = arith.extf %119 : vector<2x2x128xbf16> to vector<2x2x128xf32>
    %c13 = arith.constant 13 : index
    %c0_69 = arith.constant 0 : index
    %121 = vector.load %arg3[%c13, %c0_69] : memref<25x128xf32, #tpu.memory_space<vmem>>, vector<1x128xf32>
    %122 = vector.shape_cast %121 : vector<1x128xf32> to vector<128xf32>
    %123 = vector.shape_cast %122 : vector<128xf32> to vector<1x1x128xf32>
    %124 = vector.broadcast %123 : vector<1x1x128xf32> to vector<2x2x128xf32>
    %125 = arith.mulf %120, %124 : vector<2x2x128xf32>
    %126 = arith.addf %117, %125 : vector<2x2x128xf32>
    %c0_70 = arith.constant 0 : index
    %c2_71 = arith.constant 2 : index
    %c4_72 = arith.constant 4 : index
    %c0_73 = arith.constant 0 : index
    %127 = vector.load %arg2[%c0_70, %c2_71, %c4_72, %c0_73] : memref<1x6x6x128xbf16, #tpu.memory_space<vmem>>, vector<1x2x2x128xbf16>
    %128 = vector.shape_cast %127 : vector<1x2x2x128xbf16> to vector<2x2x128xbf16>
    %129 = arith.extf %128 : vector<2x2x128xbf16> to vector<2x2x128xf32>
    %c14 = arith.constant 14 : index
    %c0_74 = arith.constant 0 : index
    %130 = vector.load %arg3[%c14, %c0_74] : memref<25x128xf32, #tpu.memory_space<vmem>>, vector<1x128xf32>
    %131 = vector.shape_cast %130 : vector<1x128xf32> to vector<128xf32>
    %132 = vector.shape_cast %131 : vector<128xf32> to vector<1x1x128xf32>
    %133 = vector.broadcast %132 : vector<1x1x128xf32> to vector<2x2x128xf32>
    %134 = arith.mulf %129, %133 : vector<2x2x128xf32>
    %135 = arith.addf %126, %134 : vector<2x2x128xf32>
    %c0_75 = arith.constant 0 : index
    %c3_76 = arith.constant 3 : index
    %c0_77 = arith.constant 0 : index
    %c0_78 = arith.constant 0 : index
    %136 = vector.load %arg2[%c0_75, %c3_76, %c0_77, %c0_78] : memref<1x6x6x128xbf16, #tpu.memory_space<vmem>>, vector<1x2x2x128xbf16>
    %137 = vector.shape_cast %136 : vector<1x2x2x128xbf16> to vector<2x2x128xbf16>
    %138 = arith.extf %137 : vector<2x2x128xbf16> to vector<2x2x128xf32>
    %c15 = arith.constant 15 : index
    %c0_79 = arith.constant 0 : index
    %139 = vector.load %arg3[%c15, %c0_79] : memref<25x128xf32, #tpu.memory_space<vmem>>, vector<1x128xf32>
    %140 = vector.shape_cast %139 : vector<1x128xf32> to vector<128xf32>
    %141 = vector.shape_cast %140 : vector<128xf32> to vector<1x1x128xf32>
    %142 = vector.broadcast %141 : vector<1x1x128xf32> to vector<2x2x128xf32>
    %143 = arith.mulf %138, %142 : vector<2x2x128xf32>
    %144 = arith.addf %135, %143 : vector<2x2x128xf32>
    %c0_80 = arith.constant 0 : index
    %c3_81 = arith.constant 3 : index
    %c1_82 = arith.constant 1 : index
    %c0_83 = arith.constant 0 : index
    %145 = vector.load %arg2[%c0_80, %c3_81, %c1_82, %c0_83] : memref<1x6x6x128xbf16, #tpu.memory_space<vmem>>, vector<1x2x2x128xbf16>
    %146 = vector.shape_cast %145 : vector<1x2x2x128xbf16> to vector<2x2x128xbf16>
    %147 = arith.extf %146 : vector<2x2x128xbf16> to vector<2x2x128xf32>
    %c16 = arith.constant 16 : index
    %c0_84 = arith.constant 0 : index
    %148 = vector.load %arg3[%c16, %c0_84] : memref<25x128xf32, #tpu.memory_space<vmem>>, vector<1x128xf32>
    %149 = vector.shape_cast %148 : vector<1x128xf32> to vector<128xf32>
    %150 = vector.shape_cast %149 : vector<128xf32> to vector<1x1x128xf32>
    %151 = vector.broadcast %150 : vector<1x1x128xf32> to vector<2x2x128xf32>
    %152 = arith.mulf %147, %151 : vector<2x2x128xf32>
    %153 = arith.addf %144, %152 : vector<2x2x128xf32>
    %c0_85 = arith.constant 0 : index
    %c3_86 = arith.constant 3 : index
    %c2_87 = arith.constant 2 : index
    %c0_88 = arith.constant 0 : index
    %154 = vector.load %arg2[%c0_85, %c3_86, %c2_87, %c0_88] : memref<1x6x6x128xbf16, #tpu.memory_space<vmem>>, vector<1x2x2x128xbf16>
    %155 = vector.shape_cast %154 : vector<1x2x2x128xbf16> to vector<2x2x128xbf16>
    %156 = arith.extf %155 : vector<2x2x128xbf16> to vector<2x2x128xf32>
    %c17 = arith.constant 17 : index
    %c0_89 = arith.constant 0 : index
    %157 = vector.load %arg3[%c17, %c0_89] : memref<25x128xf32, #tpu.memory_space<vmem>>, vector<1x128xf32>
    %158 = vector.shape_cast %157 : vector<1x128xf32> to vector<128xf32>
    %159 = vector.shape_cast %158 : vector<128xf32> to vector<1x1x128xf32>
    %160 = vector.broadcast %159 : vector<1x1x128xf32> to vector<2x2x128xf32>
    %161 = arith.mulf %156, %160 : vector<2x2x128xf32>
    %162 = arith.addf %153, %161 : vector<2x2x128xf32>
    %c0_90 = arith.constant 0 : index
    %c3_91 = arith.constant 3 : index
    %c3_92 = arith.constant 3 : index
    %c0_93 = arith.constant 0 : index
    %163 = vector.load %arg2[%c0_90, %c3_91, %c3_92, %c0_93] : memref<1x6x6x128xbf16, #tpu.memory_space<vmem>>, vector<1x2x2x128xbf16>
    %164 = vector.shape_cast %163 : vector<1x2x2x128xbf16> to vector<2x2x128xbf16>
    %165 = arith.extf %164 : vector<2x2x128xbf16> to vector<2x2x128xf32>
    %c18 = arith.constant 18 : index
    %c0_94 = arith.constant 0 : index
    %166 = vector.load %arg3[%c18, %c0_94] : memref<25x128xf32, #tpu.memory_space<vmem>>, vector<1x128xf32>
    %167 = vector.shape_cast %166 : vector<1x128xf32> to vector<128xf32>
    %168 = vector.shape_cast %167 : vector<128xf32> to vector<1x1x128xf32>
    %169 = vector.broadcast %168 : vector<1x1x128xf32> to vector<2x2x128xf32>
    %170 = arith.mulf %165, %169 : vector<2x2x128xf32>
    %171 = arith.addf %162, %170 : vector<2x2x128xf32>
    %c0_95 = arith.constant 0 : index
    %c3_96 = arith.constant 3 : index
    %c4_97 = arith.constant 4 : index
    %c0_98 = arith.constant 0 : index
    %172 = vector.load %arg2[%c0_95, %c3_96, %c4_97, %c0_98] : memref<1x6x6x128xbf16, #tpu.memory_space<vmem>>, vector<1x2x2x128xbf16>
    %173 = vector.shape_cast %172 : vector<1x2x2x128xbf16> to vector<2x2x128xbf16>
    %174 = arith.extf %173 : vector<2x2x128xbf16> to vector<2x2x128xf32>
    %c19 = arith.constant 19 : index
    %c0_99 = arith.constant 0 : index
    %175 = vector.load %arg3[%c19, %c0_99] : memref<25x128xf32, #tpu.memory_space<vmem>>, vector<1x128xf32>
    %176 = vector.shape_cast %175 : vector<1x128xf32> to vector<128xf32>
    %177 = vector.shape_cast %176 : vector<128xf32> to vector<1x1x128xf32>
    %178 = vector.broadcast %177 : vector<1x1x128xf32> to vector<2x2x128xf32>
    %179 = arith.mulf %174, %178 : vector<2x2x128xf32>
    %180 = arith.addf %171, %179 : vector<2x2x128xf32>
    %c0_100 = arith.constant 0 : index
    %c4_101 = arith.constant 4 : index
    %c0_102 = arith.constant 0 : index
    %c0_103 = arith.constant 0 : index
    %181 = vector.load %arg2[%c0_100, %c4_101, %c0_102, %c0_103] : memref<1x6x6x128xbf16, #tpu.memory_space<vmem>>, vector<1x2x2x128xbf16>
    %182 = vector.shape_cast %181 : vector<1x2x2x128xbf16> to vector<2x2x128xbf16>
    %183 = arith.extf %182 : vector<2x2x128xbf16> to vector<2x2x128xf32>
    %c20 = arith.constant 20 : index
    %c0_104 = arith.constant 0 : index
    %184 = vector.load %arg3[%c20, %c0_104] : memref<25x128xf32, #tpu.memory_space<vmem>>, vector<1x128xf32>
    %185 = vector.shape_cast %184 : vector<1x128xf32> to vector<128xf32>
    %186 = vector.shape_cast %185 : vector<128xf32> to vector<1x1x128xf32>
    %187 = vector.broadcast %186 : vector<1x1x128xf32> to vector<2x2x128xf32>
    %188 = arith.mulf %183, %187 : vector<2x2x128xf32>
    %189 = arith.addf %180, %188 : vector<2x2x128xf32>
    %c0_105 = arith.constant 0 : index
    %c4_106 = arith.constant 4 : index
    %c1_107 = arith.constant 1 : index
    %c0_108 = arith.constant 0 : index
    %190 = vector.load %arg2[%c0_105, %c4_106, %c1_107, %c0_108] : memref<1x6x6x128xbf16, #tpu.memory_space<vmem>>, vector<1x2x2x128xbf16>
    %191 = vector.shape_cast %190 : vector<1x2x2x128xbf16> to vector<2x2x128xbf16>
    %192 = arith.extf %191 : vector<2x2x128xbf16> to vector<2x2x128xf32>
    %c21 = arith.constant 21 : index
    %c0_109 = arith.constant 0 : index
    %193 = vector.load %arg3[%c21, %c0_109] : memref<25x128xf32, #tpu.memory_space<vmem>>, vector<1x128xf32>
    %194 = vector.shape_cast %193 : vector<1x128xf32> to vector<128xf32>
    %195 = vector.shape_cast %194 : vector<128xf32> to vector<1x1x128xf32>
    %196 = vector.broadcast %195 : vector<1x1x128xf32> to vector<2x2x128xf32>
    %197 = arith.mulf %192, %196 : vector<2x2x128xf32>
    %198 = arith.addf %189, %197 : vector<2x2x128xf32>
    %c0_110 = arith.constant 0 : index
    %c4_111 = arith.constant 4 : index
    %c2_112 = arith.constant 2 : index
    %c0_113 = arith.constant 0 : index
    %199 = vector.load %arg2[%c0_110, %c4_111, %c2_112, %c0_113] : memref<1x6x6x128xbf16, #tpu.memory_space<vmem>>, vector<1x2x2x128xbf16>
    %200 = vector.shape_cast %199 : vector<1x2x2x128xbf16> to vector<2x2x128xbf16>
    %201 = arith.extf %200 : vector<2x2x128xbf16> to vector<2x2x128xf32>
    %c22 = arith.constant 22 : index
    %c0_114 = arith.constant 0 : index
    %202 = vector.load %arg3[%c22, %c0_114] : memref<25x128xf32, #tpu.memory_space<vmem>>, vector<1x128xf32>
    %203 = vector.shape_cast %202 : vector<1x128xf32> to vector<128xf32>
    %204 = vector.shape_cast %203 : vector<128xf32> to vector<1x1x128xf32>
    %205 = vector.broadcast %204 : vector<1x1x128xf32> to vector<2x2x128xf32>
    %206 = arith.mulf %201, %205 : vector<2x2x128xf32>
    %207 = arith.addf %198, %206 : vector<2x2x128xf32>
    %c0_115 = arith.constant 0 : index
    %c4_116 = arith.constant 4 : index
    %c3_117 = arith.constant 3 : index
    %c0_118 = arith.constant 0 : index
    %208 = vector.load %arg2[%c0_115, %c4_116, %c3_117, %c0_118] : memref<1x6x6x128xbf16, #tpu.memory_space<vmem>>, vector<1x2x2x128xbf16>
    %209 = vector.shape_cast %208 : vector<1x2x2x128xbf16> to vector<2x2x128xbf16>
    %210 = arith.extf %209 : vector<2x2x128xbf16> to vector<2x2x128xf32>
    %c23 = arith.constant 23 : index
    %c0_119 = arith.constant 0 : index
    %211 = vector.load %arg3[%c23, %c0_119] : memref<25x128xf32, #tpu.memory_space<vmem>>, vector<1x128xf32>
    %212 = vector.shape_cast %211 : vector<1x128xf32> to vector<128xf32>
    %213 = vector.shape_cast %212 : vector<128xf32> to vector<1x1x128xf32>
    %214 = vector.broadcast %213 : vector<1x1x128xf32> to vector<2x2x128xf32>
    %215 = arith.mulf %210, %214 : vector<2x2x128xf32>
    %216 = arith.addf %207, %215 : vector<2x2x128xf32>
    %c0_120 = arith.constant 0 : index
    %c4_121 = arith.constant 4 : index
    %c4_122 = arith.constant 4 : index
    %c0_123 = arith.constant 0 : index
    %217 = vector.load %arg2[%c0_120, %c4_121, %c4_122, %c0_123] : memref<1x6x6x128xbf16, #tpu.memory_space<vmem>>, vector<1x2x2x128xbf16>
    %218 = vector.shape_cast %217 : vector<1x2x2x128xbf16> to vector<2x2x128xbf16>
    %219 = arith.extf %218 : vector<2x2x128xbf16> to vector<2x2x128xf32>
    %c24 = arith.constant 24 : index
    %c0_124 = arith.constant 0 : index
    %220 = vector.load %arg3[%c24, %c0_124] : memref<25x128xf32, #tpu.memory_space<vmem>>, vector<1x128xf32>
    %221 = vector.shape_cast %220 : vector<1x128xf32> to vector<128xf32>
    %222 = vector.shape_cast %221 : vector<128xf32> to vector<1x1x128xf32>
    %223 = vector.broadcast %222 : vector<1x1x128xf32> to vector<2x2x128xf32>
    %224 = arith.mulf %219, %223 : vector<2x2x128xf32>
    %225 = arith.addf %216, %224 : vector<2x2x128xf32>
    %c0_125 = arith.constant 0 : index
    %c0_126 = arith.constant 0 : index
    %226 = vector.load %arg4[%c0_125, %c0_126] : memref<1x128xf32, #tpu.memory_space<vmem>>, vector<1x128xf32>
    %227 = vector.shape_cast %226 : vector<1x128xf32> to vector<1x1x128xf32>
    %228 = vector.broadcast %227 : vector<1x1x128xf32> to vector<2x2x128xf32>
    %229 = arith.mulf %225, %228 : vector<2x2x128xf32>
    %c0_127 = arith.constant 0 : index
    %c0_128 = arith.constant 0 : index
    %230 = vector.load %arg5[%c0_127, %c0_128] : memref<1x128xf32, #tpu.memory_space<vmem>>, vector<1x128xf32>
    %231 = vector.shape_cast %230 : vector<1x128xf32> to vector<1x1x128xf32>
    %232 = vector.broadcast %231 : vector<1x1x128xf32> to vector<2x2x128xf32>
    %233 = arith.addf %229, %232 : vector<2x2x128xf32>
    %cst_129 = arith.constant 3.000000e+00 : f32
    %234 = vector.broadcast %cst_129 : f32 to vector<2x2x128xf32>
    %235 = arith.addf %233, %234 : vector<2x2x128xf32>
    %cst_130 = arith.constant 0.000000e+00 : f32
    %cst_131 = arith.constant 6.000000e+00 : f32
    %236 = vector.broadcast %cst_130 : f32 to vector<2x2x128xf32>
    %237 = arith.maximumf %236, %235 : vector<2x2x128xf32>
    %238 = vector.broadcast %cst_131 : f32 to vector<2x2x128xf32>
    %239 = arith.minimumf %238, %237 : vector<2x2x128xf32>
    %240 = arith.mulf %233, %239 : vector<2x2x128xf32>
    %cst_132 = arith.constant 0.166666672 : f32
    %241 = vector.broadcast %cst_132 : f32 to vector<2x2x128xf32>
    %242 = arith.mulf %240, %241 : vector<2x2x128xf32>
    %243 = arith.truncf %242 : vector<2x2x128xf32> to vector<2x2x128xbf16>
    %c0_133 = arith.constant 0 : index
    %c0_134 = arith.constant 0 : index
    %c0_135 = arith.constant 0 : index
    %c0_136 = arith.constant 0 : index
    %244 = vector.load %arg6[%c0_133, %c0_134, %c0_135, %c0_136] : memref<1x2x2x128xbf16, #tpu.memory_space<vmem>>, vector<1x2x2x128xbf16>
    %245 = vector.shape_cast %244 : vector<1x2x2x128xbf16> to vector<2x2x128xbf16>
    %246 = vector.shape_cast %243 : vector<2x2x128xbf16> to vector<1x2x2x128xbf16>
    tpu.vector_store %arg6[%c0_133, %c0_134, %c0_135, %c0_136], %246 {strides = array<i32>} : memref<1x2x2x128xbf16, #tpu.memory_space<vmem>>, vector<1x2x2x128xbf16>,
    return
  }
  func.func @transform_0(%arg0: i32, %arg1: i32) -> (i32, i32, i32, i32) {
    %c0_i32 = arith.constant 0 : i32
    %c0_i32_0 = arith.constant 0 : i32
    %c0_i32_1 = arith.constant 0 : i32
    return %arg0, %c0_i32, %c0_i32_0, %arg1 : i32, i32, i32, i32
  }
  func.func @transform_1(%arg0: i32, %arg1: i32) -> (i32, i32) {
    %c0_i32 = arith.constant 0 : i32
    %c0_i32_0 = arith.constant 0 : i32
    return %c0_i32, %arg1 : i32, i32
  }
  func.func @transform_2(%arg0: i32, %arg1: i32) -> (i32, i32) {
    %c0_i32 = arith.constant 0 : i32
    %c0_i32_0 = arith.constant 0 : i32
    return %c0_i32, %arg1 : i32, i32
  }
  func.func @transform_3(%arg0: i32, %arg1: i32) -> (i32, i32) {
    %c0_i32 = arith.constant 0 : i32
    %c0_i32_0 = arith.constant 0 : i32
    return %c0_i32, %arg1 : i32, i32
  }
  func.func @transform_4(%arg0: i32, %arg1: i32) -> (i32, i32, i32, i32) {
    %c0_i32 = arith.constant 0 : i32
    %c0_i32_0 = arith.constant 0 : i32
    %c0_i32_1 = arith.constant 0 : i32
    return %arg0, %c0_i32, %c0_i32_0, %arg1 : i32, i32, i32, i32
  }
}

module attributes {stable_mosaic.version = 11 : i64} {
  func.func @_pool_mlp_kernel(%arg0: i32, %arg1: i32, %arg2: memref<1x8x128xbf16, #tpu.memory_space<vmem>>, %arg3: memref<128x128xbf16, #tpu.memory_space<vmem>>, %arg4: memref<1x128xf32, #tpu.memory_space<vmem>>, %arg5: memref<128x128xbf16, #tpu.memory_space<vmem>>, %arg6: memref<1x128xf32, #tpu.memory_space<vmem>>, %arg7: memref<1x1x128xf32, #tpu.memory_space<vmem>>, %arg8: memref<1x128xf32, #tpu.memory_space<vmem>>) attributes {dimension_semantics = [#tpu.dimension_semantics<parallel>, #tpu.dimension_semantics<arbitrary>], iteration_bounds = array<i64: 2, 1>, scalar_prefetch = 0 : i64, scratch_operands = 1 : i64, tpu.core_type = #tpu.core_type<tc>, window_params = [{transform_indices = @transform_0, window_bounds = array<i64: 1, 8, 128>}, {pipeline_mode = #tpu.pipeline_mode<synchronous>, transform_indices = @transform_1, window_bounds = array<i64: 128, 128>}, {pipeline_mode = #tpu.pipeline_mode<synchronous>, transform_indices = @transform_2, window_bounds = array<i64: 1, 128>}, {pipeline_mode = #tpu.pipeline_mode<synchronous>, transform_indices = @transform_3, window_bounds = array<i64: 128, 128>}, {pipeline_mode = #tpu.pipeline_mode<synchronous>, transform_indices = @transform_4, window_bounds = array<i64: 1, 128>}, {transform_indices = @transform_5, window_bounds = array<i64: 1, 1, 128>}]} {
    %c0_i32 = arith.constant 0 : i32
    %0 = arith.cmpi eq, %arg1, %c0_i32 : i32
    %1 = arith.extui %0 : i1 to i32
    %c0_i32_0 = arith.constant 0 : i32
    %2 = arith.cmpi ne, %1, %c0_i32_0 : i32
    scf.if %2 {
      %cst_9 = arith.constant 0.000000e+00 : f32
      %14 = vector.broadcast %cst_9 : f32 to vector<1x128xf32>
      %c0_10 = arith.constant 0 : index
      %c0_11 = arith.constant 0 : index
      %15 = vector.load %arg8[%c0_10, %c0_11] : memref<1x128xf32, #tpu.memory_space<vmem>>, vector<1x128xf32>
      tpu.vector_store %arg8[%c0_10, %c0_11], %14 {strides = array<i32>} : memref<1x128xf32, #tpu.memory_space<vmem>>, vector<1x128xf32>,
    } else {
    }
    %c0 = arith.constant 0 : index
    %c0_1 = arith.constant 0 : index
    %3 = vector.load %arg8[%c0, %c0_1] : memref<1x128xf32, #tpu.memory_space<vmem>>, vector<1x128xf32>
    %c0_2 = arith.constant 0 : index
    %c0_3 = arith.constant 0 : index
    %c0_4 = arith.constant 0 : index
    %4 = vector.load %arg2[%c0_2, %c0_3, %c0_4] : memref<1x8x128xbf16, #tpu.memory_space<vmem>>, vector<1x8x128xbf16>
    %5 = vector.shape_cast %4 : vector<1x8x128xbf16> to vector<8x128xbf16>
    %6 = arith.extf %5 : vector<8x128xbf16> to vector<8x128xf32>
    %cst = arith.constant dense<0.000000e+00> : vector<128xf32>
    %7 = vector.multi_reduction <add>, %6, %cst [0] : vector<8x128xf32> to vector<128xf32>
    %8 = vector.shape_cast %7 : vector<128xf32> to vector<1x128xf32>
    %9 = arith.addf %3, %8 : vector<1x128xf32>
    %c0_5 = arith.constant 0 : index
    %c0_6 = arith.constant 0 : index
    %10 = vector.load %arg8[%c0_5, %c0_6] : memref<1x128xf32, #tpu.memory_space<vmem>>, vector<1x128xf32>
    tpu.vector_store %arg8[%c0_5, %c0_6], %9 {strides = array<i32>} : memref<1x128xf32, #tpu.memory_space<vmem>>, vector<1x128xf32>,
    %c0_i32_7 = arith.constant 0 : i32
    %11 = arith.cmpi eq, %arg1, %c0_i32_7 : i32
    %12 = arith.extui %11 : i1 to i32
    %c0_i32_8 = arith.constant 0 : i32
    %13 = arith.cmpi ne, %12, %c0_i32_8 : i32
    scf.if %13 {
      %c0_9 = arith.constant 0 : index
      %c0_10 = arith.constant 0 : index
      %14 = vector.load %arg8[%c0_9, %c0_10] : memref<1x128xf32, #tpu.memory_space<vmem>>, vector<1x128xf32>
      %cst_11 = arith.constant 2.500000e-01 : f32
      %15 = vector.broadcast %cst_11 : f32 to vector<1x128xf32>
      %16 = arith.mulf %14, %15 : vector<1x128xf32>
      %17 = arith.truncf %16 : vector<1x128xf32> to vector<1x128xbf16>
      %c0_12 = arith.constant 0 : index
      %c0_13 = arith.constant 0 : index
      %18 = vector.load %arg3[%c0_12, %c0_13] : memref<128x128xbf16, #tpu.memory_space<vmem>>, vector<128x128xbf16>
      %cst_14 = arith.constant dense<0.000000e+00> : vector<1x128xf32>
      %19 = tpu.matmul %17, %18, %cst_14 {dimension_numbers = #tpu.dot_dimension_numbers<[1], [0], [0], [1], [0, 0, 1, 1], [], []>} : vector<1x128xbf16>, vector<128x128xbf16>, vector<1x128xf32> -> vector<1x128xf32>
      %c0_15 = arith.constant 0 : index
      %c0_16 = arith.constant 0 : index
      %20 = vector.load %arg4[%c0_15, %c0_16] : memref<1x128xf32, #tpu.memory_space<vmem>>, vector<1x128xf32>
      %21 = arith.addf %19, %20 : vector<1x128xf32>
      %cst_17 = arith.constant 0.000000e+00 : f32
      %22 = vector.broadcast %cst_17 : f32 to vector<1x128xf32>
      %23 = arith.maximumf %21, %22 : vector<1x128xf32>
      %24 = arith.truncf %23 : vector<1x128xf32> to vector<1x128xbf16>
      %c0_18 = arith.constant 0 : index
      %c0_19 = arith.constant 0 : index
      %25 = vector.load %arg5[%c0_18, %c0_19] : memref<128x128xbf16, #tpu.memory_space<vmem>>, vector<128x128xbf16>
      %cst_20 = arith.constant dense<0.000000e+00> : vector<1x128xf32>
      %26 = tpu.matmul %24, %25, %cst_20 {dimension_numbers = #tpu.dot_dimension_numbers<[1], [0], [0], [1], [0, 0, 1, 1], [], []>} : vector<1x128xbf16>, vector<128x128xbf16>, vector<1x128xf32> -> vector<1x128xf32>
      %c0_21 = arith.constant 0 : index
      %c0_22 = arith.constant 0 : index
      %27 = vector.load %arg6[%c0_21, %c0_22] : memref<1x128xf32, #tpu.memory_space<vmem>>, vector<1x128xf32>
      %28 = arith.addf %26, %27 : vector<1x128xf32>
      %cst_23 = arith.constant 3.000000e+00 : f32
      %29 = vector.broadcast %cst_23 : f32 to vector<1x128xf32>
      %30 = arith.addf %28, %29 : vector<1x128xf32>
      %cst_24 = arith.constant 0.000000e+00 : f32
      %cst_25 = arith.constant 6.000000e+00 : f32
      %31 = vector.broadcast %cst_24 : f32 to vector<1x128xf32>
      %32 = arith.maximumf %31, %30 : vector<1x128xf32>
      %33 = vector.broadcast %cst_25 : f32 to vector<1x128xf32>
      %34 = arith.minimumf %33, %32 : vector<1x128xf32>
      %cst_26 = arith.constant 0.166666672 : f32
      %35 = vector.broadcast %cst_26 : f32 to vector<1x128xf32>
      %36 = arith.mulf %34, %35 : vector<1x128xf32>
      %c0_27 = arith.constant 0 : index
      %c0_28 = arith.constant 0 : index
      %c0_29 = arith.constant 0 : index
      %37 = vector.load %arg7[%c0_27, %c0_28, %c0_29] : memref<1x1x128xf32, #tpu.memory_space<vmem>>, vector<1x1x128xf32>
      %38 = vector.shape_cast %37 : vector<1x1x128xf32> to vector<1x128xf32>
      %39 = vector.shape_cast %36 : vector<1x128xf32> to vector<1x1x128xf32>
      tpu.vector_store %arg7[%c0_27, %c0_28, %c0_29], %39 {strides = array<i32>} : memref<1x1x128xf32, #tpu.memory_space<vmem>>, vector<1x1x128xf32>,
    } else {
    }
    return
  }
  func.func @transform_0(%arg0: i32, %arg1: i32) -> (i32, i32, i32) {
    %c0_i32 = arith.constant 0 : i32
    %c0_i32_0 = arith.constant 0 : i32
    return %arg0, %arg1, %c0_i32 : i32, i32, i32
  }
  func.func @transform_1(%arg0: i32, %arg1: i32) -> (i32, i32) {
    %c0_i32 = arith.constant 0 : i32
    %c0_i32_0 = arith.constant 0 : i32
    %c0_i32_1 = arith.constant 0 : i32
    return %c0_i32, %c0_i32_0 : i32, i32
  }
  func.func @transform_2(%arg0: i32, %arg1: i32) -> (i32, i32) {
    %c0_i32 = arith.constant 0 : i32
    %c0_i32_0 = arith.constant 0 : i32
    %c0_i32_1 = arith.constant 0 : i32
    return %c0_i32, %c0_i32_0 : i32, i32
  }
  func.func @transform_3(%arg0: i32, %arg1: i32) -> (i32, i32) {
    %c0_i32 = arith.constant 0 : i32
    %c0_i32_0 = arith.constant 0 : i32
    %c0_i32_1 = arith.constant 0 : i32
    return %c0_i32, %c0_i32_0 : i32, i32
  }
  func.func @transform_4(%arg0: i32, %arg1: i32) -> (i32, i32) {
    %c0_i32 = arith.constant 0 : i32
    %c0_i32_0 = arith.constant 0 : i32
    %c0_i32_1 = arith.constant 0 : i32
    return %c0_i32, %c0_i32_0 : i32, i32
  }
  func.func @transform_5(%arg0: i32, %arg1: i32) -> (i32, i32, i32) {
    %c0_i32 = arith.constant 0 : i32
    %c0_i32_0 = arith.constant 0 : i32
    %c0_i32_1 = arith.constant 0 : i32
    return %arg0, %c0_i32, %c0_i32_0 : i32, i32, i32
  }
}

module attributes {stable_mosaic.version = 11 : i64} {
  func.func @_pw_kernel(%arg0: i32, %arg1: i32, %arg2: memref<1x8x128xbf16, #tpu.memory_space<vmem>>, %arg3: memref<1x1x128xf32, #tpu.memory_space<vmem>>, %arg4: memref<128x128xbf16, #tpu.memory_space<vmem>>, %arg5: memref<1x128xf32, #tpu.memory_space<vmem>>, %arg6: memref<1x128xf32, #tpu.memory_space<vmem>>, %arg7: memref<1x8x128xbf16, #tpu.memory_space<vmem>>) attributes {dimension_semantics = [#tpu.dimension_semantics<parallel>, #tpu.dimension_semantics<parallel>], iteration_bounds = array<i64: 2, 1>, scalar_prefetch = 0 : i64, scratch_operands = 0 : i64, tpu.core_type = #tpu.core_type<tc>, window_params = [{transform_indices = @transform_0, window_bounds = array<i64: 1, 8, 128>}, {transform_indices = @transform_1, window_bounds = array<i64: 1, 1, 128>}, {pipeline_mode = #tpu.pipeline_mode<synchronous>, transform_indices = @transform_2, window_bounds = array<i64: 128, 128>}, {pipeline_mode = #tpu.pipeline_mode<synchronous>, transform_indices = @transform_3, window_bounds = array<i64: 1, 128>}, {pipeline_mode = #tpu.pipeline_mode<synchronous>, transform_indices = @transform_4, window_bounds = array<i64: 1, 128>}, {transform_indices = @transform_5, window_bounds = array<i64: 1, 8, 128>}]} {
    %c0 = arith.constant 0 : index
    %c0_0 = arith.constant 0 : index
    %c0_1 = arith.constant 0 : index
    %0 = vector.load %arg2[%c0, %c0_0, %c0_1] : memref<1x8x128xbf16, #tpu.memory_space<vmem>>, vector<1x8x128xbf16>
    %1 = vector.shape_cast %0 : vector<1x8x128xbf16> to vector<8x128xbf16>
    %2 = arith.extf %1 : vector<8x128xbf16> to vector<8x128xf32>
    %c0_2 = arith.constant 0 : index
    %c0_3 = arith.constant 0 : index
    %c0_4 = arith.constant 0 : index
    %3 = vector.load %arg3[%c0_2, %c0_3, %c0_4] : memref<1x1x128xf32, #tpu.memory_space<vmem>>, vector<1x1x128xf32>
    %4 = vector.shape_cast %3 : vector<1x1x128xf32> to vector<1x128xf32>
    %5 = vector.broadcast %4 : vector<1x128xf32> to vector<8x128xf32>
    %6 = arith.mulf %2, %5 : vector<8x128xf32>
    %7 = arith.truncf %6 : vector<8x128xf32> to vector<8x128xbf16>
    %c0_5 = arith.constant 0 : index
    %c0_6 = arith.constant 0 : index
    %8 = vector.load %arg4[%c0_5, %c0_6] : memref<128x128xbf16, #tpu.memory_space<vmem>>, vector<128x128xbf16>
    %cst = arith.constant dense<0.000000e+00> : vector<8x128xf32>
    %9 = tpu.matmul %7, %8, %cst {dimension_numbers = #tpu.dot_dimension_numbers<[1], [0], [0], [1], [0, 0, 1, 1], [], []>} : vector<8x128xbf16>, vector<128x128xbf16>, vector<8x128xf32> -> vector<8x128xf32>
    %c0_7 = arith.constant 0 : index
    %c0_8 = arith.constant 0 : index
    %10 = vector.load %arg5[%c0_7, %c0_8] : memref<1x128xf32, #tpu.memory_space<vmem>>, vector<1x128xf32>
    %11 = vector.broadcast %10 : vector<1x128xf32> to vector<8x128xf32>
    %12 = arith.mulf %9, %11 : vector<8x128xf32>
    %c0_9 = arith.constant 0 : index
    %c0_10 = arith.constant 0 : index
    %13 = vector.load %arg6[%c0_9, %c0_10] : memref<1x128xf32, #tpu.memory_space<vmem>>, vector<1x128xf32>
    %14 = vector.broadcast %13 : vector<1x128xf32> to vector<8x128xf32>
    %15 = arith.addf %12, %14 : vector<8x128xf32>
    %16 = arith.truncf %15 : vector<8x128xf32> to vector<8x128xbf16>
    %c0_11 = arith.constant 0 : index
    %c0_12 = arith.constant 0 : index
    %c0_13 = arith.constant 0 : index
    %17 = vector.load %arg7[%c0_11, %c0_12, %c0_13] : memref<1x8x128xbf16, #tpu.memory_space<vmem>>, vector<1x8x128xbf16>
    %18 = vector.shape_cast %17 : vector<1x8x128xbf16> to vector<8x128xbf16>
    %19 = vector.shape_cast %16 : vector<8x128xbf16> to vector<1x8x128xbf16>
    tpu.vector_store %arg7[%c0_11, %c0_12, %c0_13], %19 {strides = array<i32>} : memref<1x8x128xbf16, #tpu.memory_space<vmem>>, vector<1x8x128xbf16>,
    return
  }
  func.func @transform_0(%arg0: i32, %arg1: i32) -> (i32, i32, i32) {
    %c0_i32 = arith.constant 0 : i32
    %c0_i32_0 = arith.constant 0 : i32
    return %arg0, %arg1, %c0_i32 : i32, i32, i32
  }
  func.func @transform_1(%arg0: i32, %arg1: i32) -> (i32, i32, i32) {
    %c0_i32 = arith.constant 0 : i32
    %c0_i32_0 = arith.constant 0 : i32
    %c0_i32_1 = arith.constant 0 : i32
    return %arg0, %c0_i32, %c0_i32_0 : i32, i32, i32
  }
  func.func @transform_2(%arg0: i32, %arg1: i32) -> (i32, i32) {
    %c0_i32 = arith.constant 0 : i32
    %c0_i32_0 = arith.constant 0 : i32
    %c0_i32_1 = arith.constant 0 : i32
    return %c0_i32, %c0_i32_0 : i32, i32
  }
  func.func @transform_3(%arg0: i32, %arg1: i32) -> (i32, i32) {
    %c0_i32 = arith.constant 0 : i32
    %c0_i32_0 = arith.constant 0 : i32
    %c0_i32_1 = arith.constant 0 : i32
    return %c0_i32, %c0_i32_0 : i32, i32
  }
  func.func @transform_4(%arg0: i32, %arg1: i32) -> (i32, i32) {
    %c0_i32 = arith.constant 0 : i32
    %c0_i32_0 = arith.constant 0 : i32
    %c0_i32_1 = arith.constant 0 : i32
    return %c0_i32, %c0_i32_0 : i32, i32
  }
  func.func @transform_5(%arg0: i32, %arg1: i32) -> (i32, i32, i32) {
    %c0_i32 = arith.constant 0 : i32
    %c0_i32_0 = arith.constant 0 : i32
    return %arg0, %arg1, %c0_i32 : i32, i32, i32
  }
}

module attributes {stable_mosaic.version = 11 : i64} {
  func.func @_pw_kernel(%arg0: i32, %arg1: i32, %arg2: memref<1x8x128xbf16, #tpu.memory_space<vmem>>, %arg3: memref<128x128xbf16, #tpu.memory_space<vmem>>, %arg4: memref<1x128xf32, #tpu.memory_space<vmem>>, %arg5: memref<1x128xf32, #tpu.memory_space<vmem>>, %arg6: memref<1x8x128xbf16, #tpu.memory_space<vmem>>) attributes {dimension_semantics = [#tpu.dimension_semantics<parallel>, #tpu.dimension_semantics<parallel>], iteration_bounds = array<i64: 2, 1>, scalar_prefetch = 0 : i64, scratch_operands = 0 : i64, tpu.core_type = #tpu.core_type<tc>, window_params = [{transform_indices = @transform_0, window_bounds = array<i64: 1, 8, 128>}, {pipeline_mode = #tpu.pipeline_mode<synchronous>, transform_indices = @transform_1, window_bounds = array<i64: 128, 128>}, {pipeline_mode = #tpu.pipeline_mode<synchronous>, transform_indices = @transform_2, window_bounds = array<i64: 1, 128>}, {pipeline_mode = #tpu.pipeline_mode<synchronous>, transform_indices = @transform_3, window_bounds = array<i64: 1, 128>}, {transform_indices = @transform_4, window_bounds = array<i64: 1, 8, 128>}]} {
    %c0 = arith.constant 0 : index
    %c0_0 = arith.constant 0 : index
    %c0_1 = arith.constant 0 : index
    %0 = vector.load %arg2[%c0, %c0_0, %c0_1] : memref<1x8x128xbf16, #tpu.memory_space<vmem>>, vector<1x8x128xbf16>
    %1 = vector.shape_cast %0 : vector<1x8x128xbf16> to vector<8x128xbf16>
    %c0_2 = arith.constant 0 : index
    %c0_3 = arith.constant 0 : index
    %2 = vector.load %arg3[%c0_2, %c0_3] : memref<128x128xbf16, #tpu.memory_space<vmem>>, vector<128x128xbf16>
    %cst = arith.constant dense<0.000000e+00> : vector<8x128xf32>
    %3 = tpu.matmul %1, %2, %cst {dimension_numbers = #tpu.dot_dimension_numbers<[1], [0], [0], [1], [0, 0, 1, 1], [], []>} : vector<8x128xbf16>, vector<128x128xbf16>, vector<8x128xf32> -> vector<8x128xf32>
    %c0_4 = arith.constant 0 : index
    %c0_5 = arith.constant 0 : index
    %4 = vector.load %arg4[%c0_4, %c0_5] : memref<1x128xf32, #tpu.memory_space<vmem>>, vector<1x128xf32>
    %5 = vector.broadcast %4 : vector<1x128xf32> to vector<8x128xf32>
    %6 = arith.mulf %3, %5 : vector<8x128xf32>
    %c0_6 = arith.constant 0 : index
    %c0_7 = arith.constant 0 : index
    %7 = vector.load %arg5[%c0_6, %c0_7] : memref<1x128xf32, #tpu.memory_space<vmem>>, vector<1x128xf32>
    %8 = vector.broadcast %7 : vector<1x128xf32> to vector<8x128xf32>
    %9 = arith.addf %6, %8 : vector<8x128xf32>
    %cst_8 = arith.constant 3.000000e+00 : f32
    %10 = vector.broadcast %cst_8 : f32 to vector<8x128xf32>
    %11 = arith.addf %9, %10 : vector<8x128xf32>
    %cst_9 = arith.constant 0.000000e+00 : f32
    %cst_10 = arith.constant 6.000000e+00 : f32
    %12 = vector.broadcast %cst_9 : f32 to vector<8x128xf32>
    %13 = arith.maximumf %12, %11 : vector<8x128xf32>
    %14 = vector.broadcast %cst_10 : f32 to vector<8x128xf32>
    %15 = arith.minimumf %14, %13 : vector<8x128xf32>
    %16 = arith.mulf %9, %15 : vector<8x128xf32>
    %cst_11 = arith.constant 0.166666672 : f32
    %17 = vector.broadcast %cst_11 : f32 to vector<8x128xf32>
    %18 = arith.mulf %16, %17 : vector<8x128xf32>
    %19 = arith.truncf %18 : vector<8x128xf32> to vector<8x128xbf16>
    %c0_12 = arith.constant 0 : index
    %c0_13 = arith.constant 0 : index
    %c0_14 = arith.constant 0 : index
    %20 = vector.load %arg6[%c0_12, %c0_13, %c0_14] : memref<1x8x128xbf16, #tpu.memory_space<vmem>>, vector<1x8x128xbf16>
    %21 = vector.shape_cast %20 : vector<1x8x128xbf16> to vector<8x128xbf16>
    %22 = vector.shape_cast %19 : vector<8x128xbf16> to vector<1x8x128xbf16>
    tpu.vector_store %arg6[%c0_12, %c0_13, %c0_14], %22 {strides = array<i32>} : memref<1x8x128xbf16, #tpu.memory_space<vmem>>, vector<1x8x128xbf16>,
    return
  }
  func.func @transform_0(%arg0: i32, %arg1: i32) -> (i32, i32, i32) {
    %c0_i32 = arith.constant 0 : i32
    %c0_i32_0 = arith.constant 0 : i32
    return %arg0, %arg1, %c0_i32 : i32, i32, i32
  }
  func.func @transform_1(%arg0: i32, %arg1: i32) -> (i32, i32) {
    %c0_i32 = arith.constant 0 : i32
    %c0_i32_0 = arith.constant 0 : i32
    %c0_i32_1 = arith.constant 0 : i32
    return %c0_i32, %c0_i32_0 : i32, i32
  }
  func.func @transform_2(%arg0: i32, %arg1: i32) -> (i32, i32) {
    %c0_i32 = arith.constant 0 : i32
    %c0_i32_0 = arith.constant 0 : i32
    %c0_i32_1 = arith.constant 0 : i32
    return %c0_i32, %c0_i32_0 : i32, i32
  }
  func.func @transform_3(%arg0: i32, %arg1: i32) -> (i32, i32) {
    %c0_i32 = arith.constant 0 : i32
    %c0_i32_0 = arith.constant 0 : i32
    %c0_i32_1 = arith.constant 0 : i32
    return %c0_i32, %c0_i32_0 : i32, i32
  }
  func.func @transform_4(%arg0: i32, %arg1: i32) -> (i32, i32, i32) {
    %c0_i32 = arith.constant 0 : i32
    %c0_i32_0 = arith.constant 0 : i32
    return %arg0, %arg1, %c0_i32 : i32, i32, i32
  }
}

module attributes {stable_mosaic.version = 11 : i64} {
  func.func @_dw_kernel(%arg0: i32, %arg1: i32, %arg2: memref<1x4x4x128xbf16, #tpu.memory_space<vmem>>, %arg3: memref<9x128xf32, #tpu.memory_space<vmem>>, %arg4: memref<1x128xf32, #tpu.memory_space<vmem>>, %arg5: memref<1x128xf32, #tpu.memory_space<vmem>>, %arg6: memref<1x2x2x128xbf16, #tpu.memory_space<vmem>>) attributes {dimension_semantics = [#tpu.dimension_semantics<parallel>, #tpu.dimension_semantics<parallel>], iteration_bounds = array<i64: 2, 1>, scalar_prefetch = 0 : i64, scratch_operands = 0 : i64, tpu.core_type = #tpu.core_type<tc>, window_params = [{transform_indices = @transform_0, window_bounds = array<i64: 1, 4, 4, 128>}, {transform_indices = @transform_1, window_bounds = array<i64: 9, 128>}, {transform_indices = @transform_2, window_bounds = array<i64: 1, 128>}, {transform_indices = @transform_3, window_bounds = array<i64: 1, 128>}, {transform_indices = @transform_4, window_bounds = array<i64: 1, 2, 2, 128>}]} {
    %cst = arith.constant 0.000000e+00 : f32
    %0 = vector.broadcast %cst : f32 to vector<2x2x128xf32>
    %c0 = arith.constant 0 : index
    %c0_0 = arith.constant 0 : index
    %c0_1 = arith.constant 0 : index
    %c0_2 = arith.constant 0 : index
    %1 = vector.load %arg2[%c0, %c0_0, %c0_1, %c0_2] : memref<1x4x4x128xbf16, #tpu.memory_space<vmem>>, vector<1x2x2x128xbf16>
    %2 = vector.shape_cast %1 : vector<1x2x2x128xbf16> to vector<2x2x128xbf16>
    %3 = arith.extf %2 : vector<2x2x128xbf16> to vector<2x2x128xf32>
    %c0_3 = arith.constant 0 : index
    %c0_4 = arith.constant 0 : index
    %4 = vector.load %arg3[%c0_3, %c0_4] : memref<9x128xf32, #tpu.memory_space<vmem>>, vector<1x128xf32>
    %5 = vector.shape_cast %4 : vector<1x128xf32> to vector<128xf32>
    %6 = vector.shape_cast %5 : vector<128xf32> to vector<1x1x128xf32>
    %7 = vector.broadcast %6 : vector<1x1x128xf32> to vector<2x2x128xf32>
    %8 = arith.mulf %3, %7 : vector<2x2x128xf32>
    %9 = arith.addf %0, %8 : vector<2x2x128xf32>
    %c0_5 = arith.constant 0 : index
    %c0_6 = arith.constant 0 : index
    %c1 = arith.constant 1 : index
    %c0_7 = arith.constant 0 : index
    %10 = vector.load %arg2[%c0_5, %c0_6, %c1, %c0_7] : memref<1x4x4x128xbf16, #tpu.memory_space<vmem>>, vector<1x2x2x128xbf16>
    %11 = vector.shape_cast %10 : vector<1x2x2x128xbf16> to vector<2x2x128xbf16>
    %12 = arith.extf %11 : vector<2x2x128xbf16> to vector<2x2x128xf32>
    %c1_8 = arith.constant 1 : index
    %c0_9 = arith.constant 0 : index
    %13 = vector.load %arg3[%c1_8, %c0_9] : memref<9x128xf32, #tpu.memory_space<vmem>>, vector<1x128xf32>
    %14 = vector.shape_cast %13 : vector<1x128xf32> to vector<128xf32>
    %15 = vector.shape_cast %14 : vector<128xf32> to vector<1x1x128xf32>
    %16 = vector.broadcast %15 : vector<1x1x128xf32> to vector<2x2x128xf32>
    %17 = arith.mulf %12, %16 : vector<2x2x128xf32>
    %18 = arith.addf %9, %17 : vector<2x2x128xf32>
    %c0_10 = arith.constant 0 : index
    %c0_11 = arith.constant 0 : index
    %c2 = arith.constant 2 : index
    %c0_12 = arith.constant 0 : index
    %19 = vector.load %arg2[%c0_10, %c0_11, %c2, %c0_12] : memref<1x4x4x128xbf16, #tpu.memory_space<vmem>>, vector<1x2x2x128xbf16>
    %20 = vector.shape_cast %19 : vector<1x2x2x128xbf16> to vector<2x2x128xbf16>
    %21 = arith.extf %20 : vector<2x2x128xbf16> to vector<2x2x128xf32>
    %c2_13 = arith.constant 2 : index
    %c0_14 = arith.constant 0 : index
    %22 = vector.load %arg3[%c2_13, %c0_14] : memref<9x128xf32, #tpu.memory_space<vmem>>, vector<1x128xf32>
    %23 = vector.shape_cast %22 : vector<1x128xf32> to vector<128xf32>
    %24 = vector.shape_cast %23 : vector<128xf32> to vector<1x1x128xf32>
    %25 = vector.broadcast %24 : vector<1x1x128xf32> to vector<2x2x128xf32>
    %26 = arith.mulf %21, %25 : vector<2x2x128xf32>
    %27 = arith.addf %18, %26 : vector<2x2x128xf32>
    %c0_15 = arith.constant 0 : index
    %c1_16 = arith.constant 1 : index
    %c0_17 = arith.constant 0 : index
    %c0_18 = arith.constant 0 : index
    %28 = vector.load %arg2[%c0_15, %c1_16, %c0_17, %c0_18] : memref<1x4x4x128xbf16, #tpu.memory_space<vmem>>, vector<1x2x2x128xbf16>
    %29 = vector.shape_cast %28 : vector<1x2x2x128xbf16> to vector<2x2x128xbf16>
    %30 = arith.extf %29 : vector<2x2x128xbf16> to vector<2x2x128xf32>
    %c3 = arith.constant 3 : index
    %c0_19 = arith.constant 0 : index
    %31 = vector.load %arg3[%c3, %c0_19] : memref<9x128xf32, #tpu.memory_space<vmem>>, vector<1x128xf32>
    %32 = vector.shape_cast %31 : vector<1x128xf32> to vector<128xf32>
    %33 = vector.shape_cast %32 : vector<128xf32> to vector<1x1x128xf32>
    %34 = vector.broadcast %33 : vector<1x1x128xf32> to vector<2x2x128xf32>
    %35 = arith.mulf %30, %34 : vector<2x2x128xf32>
    %36 = arith.addf %27, %35 : vector<2x2x128xf32>
    %c0_20 = arith.constant 0 : index
    %c1_21 = arith.constant 1 : index
    %c1_22 = arith.constant 1 : index
    %c0_23 = arith.constant 0 : index
    %37 = vector.load %arg2[%c0_20, %c1_21, %c1_22, %c0_23] : memref<1x4x4x128xbf16, #tpu.memory_space<vmem>>, vector<1x2x2x128xbf16>
    %38 = vector.shape_cast %37 : vector<1x2x2x128xbf16> to vector<2x2x128xbf16>
    %39 = arith.extf %38 : vector<2x2x128xbf16> to vector<2x2x128xf32>
    %c4 = arith.constant 4 : index
    %c0_24 = arith.constant 0 : index
    %40 = vector.load %arg3[%c4, %c0_24] : memref<9x128xf32, #tpu.memory_space<vmem>>, vector<1x128xf32>
    %41 = vector.shape_cast %40 : vector<1x128xf32> to vector<128xf32>
    %42 = vector.shape_cast %41 : vector<128xf32> to vector<1x1x128xf32>
    %43 = vector.broadcast %42 : vector<1x1x128xf32> to vector<2x2x128xf32>
    %44 = arith.mulf %39, %43 : vector<2x2x128xf32>
    %45 = arith.addf %36, %44 : vector<2x2x128xf32>
    %c0_25 = arith.constant 0 : index
    %c1_26 = arith.constant 1 : index
    %c2_27 = arith.constant 2 : index
    %c0_28 = arith.constant 0 : index
    %46 = vector.load %arg2[%c0_25, %c1_26, %c2_27, %c0_28] : memref<1x4x4x128xbf16, #tpu.memory_space<vmem>>, vector<1x2x2x128xbf16>
    %47 = vector.shape_cast %46 : vector<1x2x2x128xbf16> to vector<2x2x128xbf16>
    %48 = arith.extf %47 : vector<2x2x128xbf16> to vector<2x2x128xf32>
    %c5 = arith.constant 5 : index
    %c0_29 = arith.constant 0 : index
    %49 = vector.load %arg3[%c5, %c0_29] : memref<9x128xf32, #tpu.memory_space<vmem>>, vector<1x128xf32>
    %50 = vector.shape_cast %49 : vector<1x128xf32> to vector<128xf32>
    %51 = vector.shape_cast %50 : vector<128xf32> to vector<1x1x128xf32>
    %52 = vector.broadcast %51 : vector<1x1x128xf32> to vector<2x2x128xf32>
    %53 = arith.mulf %48, %52 : vector<2x2x128xf32>
    %54 = arith.addf %45, %53 : vector<2x2x128xf32>
    %c0_30 = arith.constant 0 : index
    %c2_31 = arith.constant 2 : index
    %c0_32 = arith.constant 0 : index
    %c0_33 = arith.constant 0 : index
    %55 = vector.load %arg2[%c0_30, %c2_31, %c0_32, %c0_33] : memref<1x4x4x128xbf16, #tpu.memory_space<vmem>>, vector<1x2x2x128xbf16>
    %56 = vector.shape_cast %55 : vector<1x2x2x128xbf16> to vector<2x2x128xbf16>
    %57 = arith.extf %56 : vector<2x2x128xbf16> to vector<2x2x128xf32>
    %c6 = arith.constant 6 : index
    %c0_34 = arith.constant 0 : index
    %58 = vector.load %arg3[%c6, %c0_34] : memref<9x128xf32, #tpu.memory_space<vmem>>, vector<1x128xf32>
    %59 = vector.shape_cast %58 : vector<1x128xf32> to vector<128xf32>
    %60 = vector.shape_cast %59 : vector<128xf32> to vector<1x1x128xf32>
    %61 = vector.broadcast %60 : vector<1x1x128xf32> to vector<2x2x128xf32>
    %62 = arith.mulf %57, %61 : vector<2x2x128xf32>
    %63 = arith.addf %54, %62 : vector<2x2x128xf32>
    %c0_35 = arith.constant 0 : index
    %c2_36 = arith.constant 2 : index
    %c1_37 = arith.constant 1 : index
    %c0_38 = arith.constant 0 : index
    %64 = vector.load %arg2[%c0_35, %c2_36, %c1_37, %c0_38] : memref<1x4x4x128xbf16, #tpu.memory_space<vmem>>, vector<1x2x2x128xbf16>
    %65 = vector.shape_cast %64 : vector<1x2x2x128xbf16> to vector<2x2x128xbf16>
    %66 = arith.extf %65 : vector<2x2x128xbf16> to vector<2x2x128xf32>
    %c7 = arith.constant 7 : index
    %c0_39 = arith.constant 0 : index
    %67 = vector.load %arg3[%c7, %c0_39] : memref<9x128xf32, #tpu.memory_space<vmem>>, vector<1x128xf32>
    %68 = vector.shape_cast %67 : vector<1x128xf32> to vector<128xf32>
    %69 = vector.shape_cast %68 : vector<128xf32> to vector<1x1x128xf32>
    %70 = vector.broadcast %69 : vector<1x1x128xf32> to vector<2x2x128xf32>
    %71 = arith.mulf %66, %70 : vector<2x2x128xf32>
    %72 = arith.addf %63, %71 : vector<2x2x128xf32>
    %c0_40 = arith.constant 0 : index
    %c2_41 = arith.constant 2 : index
    %c2_42 = arith.constant 2 : index
    %c0_43 = arith.constant 0 : index
    %73 = vector.load %arg2[%c0_40, %c2_41, %c2_42, %c0_43] : memref<1x4x4x128xbf16, #tpu.memory_space<vmem>>, vector<1x2x2x128xbf16>
    %74 = vector.shape_cast %73 : vector<1x2x2x128xbf16> to vector<2x2x128xbf16>
    %75 = arith.extf %74 : vector<2x2x128xbf16> to vector<2x2x128xf32>
    %c8 = arith.constant 8 : index
    %c0_44 = arith.constant 0 : index
    %76 = vector.load %arg3[%c8, %c0_44] : memref<9x128xf32, #tpu.memory_space<vmem>>, vector<1x128xf32>
    %77 = vector.shape_cast %76 : vector<1x128xf32> to vector<128xf32>
    %78 = vector.shape_cast %77 : vector<128xf32> to vector<1x1x128xf32>
    %79 = vector.broadcast %78 : vector<1x1x128xf32> to vector<2x2x128xf32>
    %80 = arith.mulf %75, %79 : vector<2x2x128xf32>
    %81 = arith.addf %72, %80 : vector<2x2x128xf32>
    %c0_45 = arith.constant 0 : index
    %c0_46 = arith.constant 0 : index
    %82 = vector.load %arg4[%c0_45, %c0_46] : memref<1x128xf32, #tpu.memory_space<vmem>>, vector<1x128xf32>
    %83 = vector.shape_cast %82 : vector<1x128xf32> to vector<1x1x128xf32>
    %84 = vector.broadcast %83 : vector<1x1x128xf32> to vector<2x2x128xf32>
    %85 = arith.mulf %81, %84 : vector<2x2x128xf32>
    %c0_47 = arith.constant 0 : index
    %c0_48 = arith.constant 0 : index
    %86 = vector.load %arg5[%c0_47, %c0_48] : memref<1x128xf32, #tpu.memory_space<vmem>>, vector<1x128xf32>
    %87 = vector.shape_cast %86 : vector<1x128xf32> to vector<1x1x128xf32>
    %88 = vector.broadcast %87 : vector<1x1x128xf32> to vector<2x2x128xf32>
    %89 = arith.addf %85, %88 : vector<2x2x128xf32>
    %cst_49 = arith.constant 3.000000e+00 : f32
    %90 = vector.broadcast %cst_49 : f32 to vector<2x2x128xf32>
    %91 = arith.addf %89, %90 : vector<2x2x128xf32>
    %cst_50 = arith.constant 0.000000e+00 : f32
    %cst_51 = arith.constant 6.000000e+00 : f32
    %92 = vector.broadcast %cst_50 : f32 to vector<2x2x128xf32>
    %93 = arith.maximumf %92, %91 : vector<2x2x128xf32>
    %94 = vector.broadcast %cst_51 : f32 to vector<2x2x128xf32>
    %95 = arith.minimumf %94, %93 : vector<2x2x128xf32>
    %96 = arith.mulf %89, %95 : vector<2x2x128xf32>
    %cst_52 = arith.constant 0.166666672 : f32
    %97 = vector.broadcast %cst_52 : f32 to vector<2x2x128xf32>
    %98 = arith.mulf %96, %97 : vector<2x2x128xf32>
    %99 = arith.truncf %98 : vector<2x2x128xf32> to vector<2x2x128xbf16>
    %c0_53 = arith.constant 0 : index
    %c0_54 = arith.constant 0 : index
    %c0_55 = arith.constant 0 : index
    %c0_56 = arith.constant 0 : index
    %100 = vector.load %arg6[%c0_53, %c0_54, %c0_55, %c0_56] : memref<1x2x2x128xbf16, #tpu.memory_space<vmem>>, vector<1x2x2x128xbf16>
    %101 = vector.shape_cast %100 : vector<1x2x2x128xbf16> to vector<2x2x128xbf16>
    %102 = vector.shape_cast %99 : vector<2x2x128xbf16> to vector<1x2x2x128xbf16>
    tpu.vector_store %arg6[%c0_53, %c0_54, %c0_55, %c0_56], %102 {strides = array<i32>} : memref<1x2x2x128xbf16, #tpu.memory_space<vmem>>, vector<1x2x2x128xbf16>,
    return
  }
  func.func @transform_0(%arg0: i32, %arg1: i32) -> (i32, i32, i32, i32) {
    %c0_i32 = arith.constant 0 : i32
    %c0_i32_0 = arith.constant 0 : i32
    %c0_i32_1 = arith.constant 0 : i32
    return %arg0, %c0_i32, %c0_i32_0, %arg1 : i32, i32, i32, i32
  }
  func.func @transform_1(%arg0: i32, %arg1: i32) -> (i32, i32) {
    %c0_i32 = arith.constant 0 : i32
    %c0_i32_0 = arith.constant 0 : i32
    return %c0_i32, %arg1 : i32, i32
  }
  func.func @transform_2(%arg0: i32, %arg1: i32) -> (i32, i32) {
    %c0_i32 = arith.constant 0 : i32
    %c0_i32_0 = arith.constant 0 : i32
    return %c0_i32, %arg1 : i32, i32
  }
  func.func @transform_3(%arg0: i32, %arg1: i32) -> (i32, i32) {
    %c0_i32 = arith.constant 0 : i32
    %c0_i32_0 = arith.constant 0 : i32
    return %c0_i32, %arg1 : i32, i32
  }
  func.func @transform_4(%arg0: i32, %arg1: i32) -> (i32, i32, i32, i32) {
    %c0_i32 = arith.constant 0 : i32
    %c0_i32_0 = arith.constant 0 : i32
    %c0_i32_1 = arith.constant 0 : i32
    return %arg0, %c0_i32, %c0_i32_0, %arg1 : i32, i32, i32, i32
  }
}

module attributes {stable_mosaic.version = 11 : i64} {
  func.func @_pw_kernel(%arg0: i32, %arg1: i32, %arg2: memref<1x8x128xbf16, #tpu.memory_space<vmem>>, %arg3: memref<1x1x128xf32, #tpu.memory_space<vmem>>, %arg4: memref<1x8x128xbf16, #tpu.memory_space<vmem>>, %arg5: memref<128x128xbf16, #tpu.memory_space<vmem>>, %arg6: memref<1x128xf32, #tpu.memory_space<vmem>>, %arg7: memref<1x128xf32, #tpu.memory_space<vmem>>, %arg8: memref<1x8x128xbf16, #tpu.memory_space<vmem>>) attributes {dimension_semantics = [#tpu.dimension_semantics<parallel>, #tpu.dimension_semantics<parallel>], iteration_bounds = array<i64: 2, 1>, scalar_prefetch = 0 : i64, scratch_operands = 0 : i64, tpu.core_type = #tpu.core_type<tc>, window_params = [{transform_indices = @transform_0, window_bounds = array<i64: 1, 8, 128>}, {transform_indices = @transform_1, window_bounds = array<i64: 1, 1, 128>}, {transform_indices = @transform_2, window_bounds = array<i64: 1, 8, 128>}, {pipeline_mode = #tpu.pipeline_mode<synchronous>, transform_indices = @transform_3, window_bounds = array<i64: 128, 128>}, {pipeline_mode = #tpu.pipeline_mode<synchronous>, transform_indices = @transform_4, window_bounds = array<i64: 1, 128>}, {pipeline_mode = #tpu.pipeline_mode<synchronous>, transform_indices = @transform_5, window_bounds = array<i64: 1, 128>}, {transform_indices = @transform_6, window_bounds = array<i64: 1, 8, 128>}]} {
    %c0 = arith.constant 0 : index
    %c0_0 = arith.constant 0 : index
    %c0_1 = arith.constant 0 : index
    %0 = vector.load %arg2[%c0, %c0_0, %c0_1] : memref<1x8x128xbf16, #tpu.memory_space<vmem>>, vector<1x8x128xbf16>
    %1 = vector.shape_cast %0 : vector<1x8x128xbf16> to vector<8x128xbf16>
    %2 = arith.extf %1 : vector<8x128xbf16> to vector<8x128xf32>
    %c0_2 = arith.constant 0 : index
    %c0_3 = arith.constant 0 : index
    %c0_4 = arith.constant 0 : index
    %3 = vector.load %arg3[%c0_2, %c0_3, %c0_4] : memref<1x1x128xf32, #tpu.memory_space<vmem>>, vector<1x1x128xf32>
    %4 = vector.shape_cast %3 : vector<1x1x128xf32> to vector<1x128xf32>
    %5 = vector.broadcast %4 : vector<1x128xf32> to vector<8x128xf32>
    %6 = arith.mulf %2, %5 : vector<8x128xf32>
    %7 = arith.truncf %6 : vector<8x128xf32> to vector<8x128xbf16>
    %c0_5 = arith.constant 0 : index
    %c0_6 = arith.constant 0 : index
    %8 = vector.load %arg5[%c0_5, %c0_6] : memref<128x128xbf16, #tpu.memory_space<vmem>>, vector<128x128xbf16>
    %cst = arith.constant dense<0.000000e+00> : vector<8x128xf32>
    %9 = tpu.matmul %7, %8, %cst {dimension_numbers = #tpu.dot_dimension_numbers<[1], [0], [0], [1], [0, 0, 1, 1], [], []>} : vector<8x128xbf16>, vector<128x128xbf16>, vector<8x128xf32> -> vector<8x128xf32>
    %c0_7 = arith.constant 0 : index
    %c0_8 = arith.constant 0 : index
    %10 = vector.load %arg6[%c0_7, %c0_8] : memref<1x128xf32, #tpu.memory_space<vmem>>, vector<1x128xf32>
    %11 = vector.broadcast %10 : vector<1x128xf32> to vector<8x128xf32>
    %12 = arith.mulf %9, %11 : vector<8x128xf32>
    %c0_9 = arith.constant 0 : index
    %c0_10 = arith.constant 0 : index
    %13 = vector.load %arg7[%c0_9, %c0_10] : memref<1x128xf32, #tpu.memory_space<vmem>>, vector<1x128xf32>
    %14 = vector.broadcast %13 : vector<1x128xf32> to vector<8x128xf32>
    %15 = arith.addf %12, %14 : vector<8x128xf32>
    %c0_11 = arith.constant 0 : index
    %c0_12 = arith.constant 0 : index
    %c0_13 = arith.constant 0 : index
    %16 = vector.load %arg4[%c0_11, %c0_12, %c0_13] : memref<1x8x128xbf16, #tpu.memory_space<vmem>>, vector<1x8x128xbf16>
    %17 = vector.shape_cast %16 : vector<1x8x128xbf16> to vector<8x128xbf16>
    %18 = arith.extf %17 : vector<8x128xbf16> to vector<8x128xf32>
    %19 = arith.addf %15, %18 : vector<8x128xf32>
    %20 = arith.truncf %19 : vector<8x128xf32> to vector<8x128xbf16>
    %c0_14 = arith.constant 0 : index
    %c0_15 = arith.constant 0 : index
    %c0_16 = arith.constant 0 : index
    %21 = vector.load %arg8[%c0_14, %c0_15, %c0_16] : memref<1x8x128xbf16, #tpu.memory_space<vmem>>, vector<1x8x128xbf16>
    %22 = vector.shape_cast %21 : vector<1x8x128xbf16> to vector<8x128xbf16>
    %23 = vector.shape_cast %20 : vector<8x128xbf16> to vector<1x8x128xbf16>
    tpu.vector_store %arg8[%c0_14, %c0_15, %c0_16], %23 {strides = array<i32>} : memref<1x8x128xbf16, #tpu.memory_space<vmem>>, vector<1x8x128xbf16>,
    return
  }
  func.func @transform_0(%arg0: i32, %arg1: i32) -> (i32, i32, i32) {
    %c0_i32 = arith.constant 0 : i32
    %c0_i32_0 = arith.constant 0 : i32
    return %arg0, %arg1, %c0_i32 : i32, i32, i32
  }
  func.func @transform_1(%arg0: i32, %arg1: i32) -> (i32, i32, i32) {
    %c0_i32 = arith.constant 0 : i32
    %c0_i32_0 = arith.constant 0 : i32
    %c0_i32_1 = arith.constant 0 : i32
    return %arg0, %c0_i32, %c0_i32_0 : i32, i32, i32
  }
  func.func @transform_2(%arg0: i32, %arg1: i32) -> (i32, i32, i32) {
    %c0_i32 = arith.constant 0 : i32
    %c0_i32_0 = arith.constant 0 : i32
    return %arg0, %arg1, %c0_i32 : i32, i32, i32
  }
  func.func @transform_3(%arg0: i32, %arg1: i32) -> (i32, i32) {
    %c0_i32 = arith.constant 0 : i32
    %c0_i32_0 = arith.constant 0 : i32
    %c0_i32_1 = arith.constant 0 : i32
    return %c0_i32, %c0_i32_0 : i32, i32
  }
  func.func @transform_4(%arg0: i32, %arg1: i32) -> (i32, i32) {
    %c0_i32 = arith.constant 0 : i32
    %c0_i32_0 = arith.constant 0 : i32
    %c0_i32_1 = arith.constant 0 : i32
    return %c0_i32, %c0_i32_0 : i32, i32
  }
  func.func @transform_5(%arg0: i32, %arg1: i32) -> (i32, i32) {
    %c0_i32 = arith.constant 0 : i32
    %c0_i32_0 = arith.constant 0 : i32
    %c0_i32_1 = arith.constant 0 : i32
    return %c0_i32, %c0_i32_0 : i32, i32
  }
  func.func @transform_6(%arg0: i32, %arg1: i32) -> (i32, i32, i32) {
    %c0_i32 = arith.constant 0 : i32
    %c0_i32_0 = arith.constant 0 : i32
    return %arg0, %arg1, %c0_i32 : i32, i32, i32
  }
}

module attributes {stable_mosaic.version = 11 : i64} {
  func.func @_pw_kernel(%arg0: i32, %arg1: i32, %arg2: memref<1x8x128xbf16, #tpu.memory_space<vmem>>, %arg3: memref<128x256xbf16, #tpu.memory_space<vmem>>, %arg4: memref<1x256xf32, #tpu.memory_space<vmem>>, %arg5: memref<1x256xf32, #tpu.memory_space<vmem>>, %arg6: memref<1x8x256xbf16, #tpu.memory_space<vmem>>) attributes {dimension_semantics = [#tpu.dimension_semantics<parallel>, #tpu.dimension_semantics<parallel>], iteration_bounds = array<i64: 2, 1>, scalar_prefetch = 0 : i64, scratch_operands = 0 : i64, tpu.core_type = #tpu.core_type<tc>, window_params = [{transform_indices = @transform_0, window_bounds = array<i64: 1, 8, 128>}, {pipeline_mode = #tpu.pipeline_mode<synchronous>, transform_indices = @transform_1, window_bounds = array<i64: 128, 256>}, {pipeline_mode = #tpu.pipeline_mode<synchronous>, transform_indices = @transform_2, window_bounds = array<i64: 1, 256>}, {pipeline_mode = #tpu.pipeline_mode<synchronous>, transform_indices = @transform_3, window_bounds = array<i64: 1, 256>}, {transform_indices = @transform_4, window_bounds = array<i64: 1, 8, 256>}]} {
    %c0 = arith.constant 0 : index
    %c0_0 = arith.constant 0 : index
    %c0_1 = arith.constant 0 : index
    %0 = vector.load %arg2[%c0, %c0_0, %c0_1] : memref<1x8x128xbf16, #tpu.memory_space<vmem>>, vector<1x8x128xbf16>
    %1 = vector.shape_cast %0 : vector<1x8x128xbf16> to vector<8x128xbf16>
    %c0_2 = arith.constant 0 : index
    %c0_3 = arith.constant 0 : index
    %2 = vector.load %arg3[%c0_2, %c0_3] : memref<128x256xbf16, #tpu.memory_space<vmem>>, vector<128x256xbf16>
    %cst = arith.constant dense<0.000000e+00> : vector<8x256xf32>
    %3 = tpu.matmul %1, %2, %cst {dimension_numbers = #tpu.dot_dimension_numbers<[1], [0], [0], [1], [0, 0, 1, 1], [], []>} : vector<8x128xbf16>, vector<128x256xbf16>, vector<8x256xf32> -> vector<8x256xf32>
    %c0_4 = arith.constant 0 : index
    %c0_5 = arith.constant 0 : index
    %4 = vector.load %arg4[%c0_4, %c0_5] : memref<1x256xf32, #tpu.memory_space<vmem>>, vector<1x256xf32>
    %5 = vector.broadcast %4 : vector<1x256xf32> to vector<8x256xf32>
    %6 = arith.mulf %3, %5 : vector<8x256xf32>
    %c0_6 = arith.constant 0 : index
    %c0_7 = arith.constant 0 : index
    %7 = vector.load %arg5[%c0_6, %c0_7] : memref<1x256xf32, #tpu.memory_space<vmem>>, vector<1x256xf32>
    %8 = vector.broadcast %7 : vector<1x256xf32> to vector<8x256xf32>
    %9 = arith.addf %6, %8 : vector<8x256xf32>
    %cst_8 = arith.constant 3.000000e+00 : f32
    %10 = vector.broadcast %cst_8 : f32 to vector<8x256xf32>
    %11 = arith.addf %9, %10 : vector<8x256xf32>
    %cst_9 = arith.constant 0.000000e+00 : f32
    %cst_10 = arith.constant 6.000000e+00 : f32
    %12 = vector.broadcast %cst_9 : f32 to vector<8x256xf32>
    %13 = arith.maximumf %12, %11 : vector<8x256xf32>
    %14 = vector.broadcast %cst_10 : f32 to vector<8x256xf32>
    %15 = arith.minimumf %14, %13 : vector<8x256xf32>
    %16 = arith.mulf %9, %15 : vector<8x256xf32>
    %cst_11 = arith.constant 0.166666672 : f32
    %17 = vector.broadcast %cst_11 : f32 to vector<8x256xf32>
    %18 = arith.mulf %16, %17 : vector<8x256xf32>
    %19 = arith.truncf %18 : vector<8x256xf32> to vector<8x256xbf16>
    %c0_12 = arith.constant 0 : index
    %c0_13 = arith.constant 0 : index
    %c0_14 = arith.constant 0 : index
    %20 = vector.load %arg6[%c0_12, %c0_13, %c0_14] : memref<1x8x256xbf16, #tpu.memory_space<vmem>>, vector<1x8x256xbf16>
    %21 = vector.shape_cast %20 : vector<1x8x256xbf16> to vector<8x256xbf16>
    %22 = vector.shape_cast %19 : vector<8x256xbf16> to vector<1x8x256xbf16>
    tpu.vector_store %arg6[%c0_12, %c0_13, %c0_14], %22 {strides = array<i32>} : memref<1x8x256xbf16, #tpu.memory_space<vmem>>, vector<1x8x256xbf16>,
    return
  }
  func.func @transform_0(%arg0: i32, %arg1: i32) -> (i32, i32, i32) {
    %c0_i32 = arith.constant 0 : i32
    %c0_i32_0 = arith.constant 0 : i32
    return %arg0, %arg1, %c0_i32 : i32, i32, i32
  }
  func.func @transform_1(%arg0: i32, %arg1: i32) -> (i32, i32) {
    %c0_i32 = arith.constant 0 : i32
    %c0_i32_0 = arith.constant 0 : i32
    %c0_i32_1 = arith.constant 0 : i32
    return %c0_i32, %c0_i32_0 : i32, i32
  }
  func.func @transform_2(%arg0: i32, %arg1: i32) -> (i32, i32) {
    %c0_i32 = arith.constant 0 : i32
    %c0_i32_0 = arith.constant 0 : i32
    %c0_i32_1 = arith.constant 0 : i32
    return %c0_i32, %c0_i32_0 : i32, i32
  }
  func.func @transform_3(%arg0: i32, %arg1: i32) -> (i32, i32) {
    %c0_i32 = arith.constant 0 : i32
    %c0_i32_0 = arith.constant 0 : i32
    %c0_i32_1 = arith.constant 0 : i32
    return %c0_i32, %c0_i32_0 : i32, i32
  }
  func.func @transform_4(%arg0: i32, %arg1: i32) -> (i32, i32, i32) {
    %c0_i32 = arith.constant 0 : i32
    %c0_i32_0 = arith.constant 0 : i32
    return %arg0, %arg1, %c0_i32 : i32, i32, i32
  }
}

module attributes {stable_mosaic.version = 11 : i64} {
  func.func @_pool_mlp_kernel(%arg0: i32, %arg1: i32, %arg2: memref<1x8x128xbf16, #tpu.memory_space<vmem>>, %arg3: memref<128x128xbf16, #tpu.memory_space<vmem>>, %arg4: memref<1x128xf32, #tpu.memory_space<vmem>>, %arg5: memref<128x128xbf16, #tpu.memory_space<vmem>>, %arg6: memref<1x128xf32, #tpu.memory_space<vmem>>, %arg7: memref<1x1x128xf32, #tpu.memory_space<vmem>>, %arg8: memref<1x128xf32, #tpu.memory_space<vmem>>) attributes {dimension_semantics = [#tpu.dimension_semantics<parallel>, #tpu.dimension_semantics<arbitrary>], iteration_bounds = array<i64: 2, 1>, scalar_prefetch = 0 : i64, scratch_operands = 1 : i64, tpu.core_type = #tpu.core_type<tc>, window_params = [{transform_indices = @transform_0, window_bounds = array<i64: 1, 8, 128>}, {pipeline_mode = #tpu.pipeline_mode<synchronous>, transform_indices = @transform_1, window_bounds = array<i64: 128, 128>}, {pipeline_mode = #tpu.pipeline_mode<synchronous>, transform_indices = @transform_2, window_bounds = array<i64: 1, 128>}, {pipeline_mode = #tpu.pipeline_mode<synchronous>, transform_indices = @transform_3, window_bounds = array<i64: 128, 128>}, {pipeline_mode = #tpu.pipeline_mode<synchronous>, transform_indices = @transform_4, window_bounds = array<i64: 1, 128>}, {transform_indices = @transform_5, window_bounds = array<i64: 1, 1, 128>}]} {
    %c0_i32 = arith.constant 0 : i32
    %0 = arith.cmpi eq, %arg1, %c0_i32 : i32
    %1 = arith.extui %0 : i1 to i32
    %c0_i32_0 = arith.constant 0 : i32
    %2 = arith.cmpi ne, %1, %c0_i32_0 : i32
    scf.if %2 {
      %cst_9 = arith.constant 0.000000e+00 : f32
      %14 = vector.broadcast %cst_9 : f32 to vector<1x128xf32>
      %c0_10 = arith.constant 0 : index
      %c0_11 = arith.constant 0 : index
      %15 = vector.load %arg8[%c0_10, %c0_11] : memref<1x128xf32, #tpu.memory_space<vmem>>, vector<1x128xf32>
      tpu.vector_store %arg8[%c0_10, %c0_11], %14 {strides = array<i32>} : memref<1x128xf32, #tpu.memory_space<vmem>>, vector<1x128xf32>,
    } else {
    }
    %c0 = arith.constant 0 : index
    %c0_1 = arith.constant 0 : index
    %3 = vector.load %arg8[%c0, %c0_1] : memref<1x128xf32, #tpu.memory_space<vmem>>, vector<1x128xf32>
    %c0_2 = arith.constant 0 : index
    %c0_3 = arith.constant 0 : index
    %c0_4 = arith.constant 0 : index
    %4 = vector.load %arg2[%c0_2, %c0_3, %c0_4] : memref<1x8x128xbf16, #tpu.memory_space<vmem>>, vector<1x8x128xbf16>
    %5 = vector.shape_cast %4 : vector<1x8x128xbf16> to vector<8x128xbf16>
    %6 = arith.extf %5 : vector<8x128xbf16> to vector<8x128xf32>
    %cst = arith.constant dense<0.000000e+00> : vector<128xf32>
    %7 = vector.multi_reduction <add>, %6, %cst [0] : vector<8x128xf32> to vector<128xf32>
    %8 = vector.shape_cast %7 : vector<128xf32> to vector<1x128xf32>
    %9 = arith.addf %3, %8 : vector<1x128xf32>
    %c0_5 = arith.constant 0 : index
    %c0_6 = arith.constant 0 : index
    %10 = vector.load %arg8[%c0_5, %c0_6] : memref<1x128xf32, #tpu.memory_space<vmem>>, vector<1x128xf32>
    tpu.vector_store %arg8[%c0_5, %c0_6], %9 {strides = array<i32>} : memref<1x128xf32, #tpu.memory_space<vmem>>, vector<1x128xf32>,
    %c0_i32_7 = arith.constant 0 : i32
    %11 = arith.cmpi eq, %arg1, %c0_i32_7 : i32
    %12 = arith.extui %11 : i1 to i32
    %c0_i32_8 = arith.constant 0 : i32
    %13 = arith.cmpi ne, %12, %c0_i32_8 : i32
    scf.if %13 {
      %c0_9 = arith.constant 0 : index
      %c0_10 = arith.constant 0 : index
      %14 = vector.load %arg8[%c0_9, %c0_10] : memref<1x128xf32, #tpu.memory_space<vmem>>, vector<1x128xf32>
      %cst_11 = arith.constant 2.500000e-01 : f32
      %15 = vector.broadcast %cst_11 : f32 to vector<1x128xf32>
      %16 = arith.mulf %14, %15 : vector<1x128xf32>
      %17 = arith.truncf %16 : vector<1x128xf32> to vector<1x128xbf16>
      %c0_12 = arith.constant 0 : index
      %c0_13 = arith.constant 0 : index
      %18 = vector.load %arg3[%c0_12, %c0_13] : memref<128x128xbf16, #tpu.memory_space<vmem>>, vector<128x128xbf16>
      %cst_14 = arith.constant dense<0.000000e+00> : vector<1x128xf32>
      %19 = tpu.matmul %17, %18, %cst_14 {dimension_numbers = #tpu.dot_dimension_numbers<[1], [0], [0], [1], [0, 0, 1, 1], [], []>} : vector<1x128xbf16>, vector<128x128xbf16>, vector<1x128xf32> -> vector<1x128xf32>
      %c0_15 = arith.constant 0 : index
      %c0_16 = arith.constant 0 : index
      %20 = vector.load %arg4[%c0_15, %c0_16] : memref<1x128xf32, #tpu.memory_space<vmem>>, vector<1x128xf32>
      %21 = arith.addf %19, %20 : vector<1x128xf32>
      %cst_17 = arith.constant 0.000000e+00 : f32
      %22 = vector.broadcast %cst_17 : f32 to vector<1x128xf32>
      %23 = arith.maximumf %21, %22 : vector<1x128xf32>
      %24 = arith.truncf %23 : vector<1x128xf32> to vector<1x128xbf16>
      %c0_18 = arith.constant 0 : index
      %c0_19 = arith.constant 0 : index
      %25 = vector.load %arg5[%c0_18, %c0_19] : memref<128x128xbf16, #tpu.memory_space<vmem>>, vector<128x128xbf16>
      %cst_20 = arith.constant dense<0.000000e+00> : vector<1x128xf32>
      %26 = tpu.matmul %24, %25, %cst_20 {dimension_numbers = #tpu.dot_dimension_numbers<[1], [0], [0], [1], [0, 0, 1, 1], [], []>} : vector<1x128xbf16>, vector<128x128xbf16>, vector<1x128xf32> -> vector<1x128xf32>
      %c0_21 = arith.constant 0 : index
      %c0_22 = arith.constant 0 : index
      %27 = vector.load %arg6[%c0_21, %c0_22] : memref<1x128xf32, #tpu.memory_space<vmem>>, vector<1x128xf32>
      %28 = arith.addf %26, %27 : vector<1x128xf32>
      %cst_23 = arith.constant 3.000000e+00 : f32
      %29 = vector.broadcast %cst_23 : f32 to vector<1x128xf32>
      %30 = arith.addf %28, %29 : vector<1x128xf32>
      %cst_24 = arith.constant 0.000000e+00 : f32
      %cst_25 = arith.constant 6.000000e+00 : f32
      %31 = vector.broadcast %cst_24 : f32 to vector<1x128xf32>
      %32 = arith.maximumf %31, %30 : vector<1x128xf32>
      %33 = vector.broadcast %cst_25 : f32 to vector<1x128xf32>
      %34 = arith.minimumf %33, %32 : vector<1x128xf32>
      %cst_26 = arith.constant 0.166666672 : f32
      %35 = vector.broadcast %cst_26 : f32 to vector<1x128xf32>
      %36 = arith.mulf %34, %35 : vector<1x128xf32>
      %c0_27 = arith.constant 0 : index
      %c0_28 = arith.constant 0 : index
      %c0_29 = arith.constant 0 : index
      %37 = vector.load %arg7[%c0_27, %c0_28, %c0_29] : memref<1x1x128xf32, #tpu.memory_space<vmem>>, vector<1x1x128xf32>
      %38 = vector.shape_cast %37 : vector<1x1x128xf32> to vector<1x128xf32>
      %39 = vector.shape_cast %36 : vector<1x128xf32> to vector<1x1x128xf32>
      tpu.vector_store %arg7[%c0_27, %c0_28, %c0_29], %39 {strides = array<i32>} : memref<1x1x128xf32, #tpu.memory_space<vmem>>, vector<1x1x128xf32>,
    } else {
    }
    return
  }
  func.func @transform_0(%arg0: i32, %arg1: i32) -> (i32, i32, i32) {
    %c0_i32 = arith.constant 0 : i32
    %c0_i32_0 = arith.constant 0 : i32
    return %arg0, %arg1, %c0_i32 : i32, i32, i32
  }
  func.func @transform_1(%arg0: i32, %arg1: i32) -> (i32, i32) {
    %c0_i32 = arith.constant 0 : i32
    %c0_i32_0 = arith.constant 0 : i32
    %c0_i32_1 = arith.constant 0 : i32
    return %c0_i32, %c0_i32_0 : i32, i32
  }
  func.func @transform_2(%arg0: i32, %arg1: i32) -> (i32, i32) {
    %c0_i32 = arith.constant 0 : i32
    %c0_i32_0 = arith.constant 0 : i32
    %c0_i32_1 = arith.constant 0 : i32
    return %c0_i32, %c0_i32_0 : i32, i32
  }
  func.func @transform_3(%arg0: i32, %arg1: i32) -> (i32, i32) {
    %c0_i32 = arith.constant 0 : i32
    %c0_i32_0 = arith.constant 0 : i32
    %c0_i32_1 = arith.constant 0 : i32
    return %c0_i32, %c0_i32_0 : i32, i32
  }
  func.func @transform_4(%arg0: i32, %arg1: i32) -> (i32, i32) {
    %c0_i32 = arith.constant 0 : i32
    %c0_i32_0 = arith.constant 0 : i32
    %c0_i32_1 = arith.constant 0 : i32
    return %c0_i32, %c0_i32_0 : i32, i32
  }
  func.func @transform_5(%arg0: i32, %arg1: i32) -> (i32, i32, i32) {
    %c0_i32 = arith.constant 0 : i32
    %c0_i32_0 = arith.constant 0 : i32
    %c0_i32_1 = arith.constant 0 : i32
    return %arg0, %c0_i32, %c0_i32_0 : i32, i32, i32
  }
}

module attributes {stable_mosaic.version = 11 : i64} {
  func.func @_pool_mlp_kernel(%arg0: i32, %arg1: i32, %arg2: memref<1x8x256xbf16, #tpu.memory_space<vmem>>, %arg3: memref<256x128xbf16, #tpu.memory_space<vmem>>, %arg4: memref<1x128xf32, #tpu.memory_space<vmem>>, %arg5: memref<128x128xbf16, #tpu.memory_space<vmem>>, %arg6: memref<1x128xf32, #tpu.memory_space<vmem>>, %arg7: memref<1x1x128xf32, #tpu.memory_space<vmem>>, %arg8: memref<1x256xf32, #tpu.memory_space<vmem>>) attributes {dimension_semantics = [#tpu.dimension_semantics<parallel>, #tpu.dimension_semantics<arbitrary>], iteration_bounds = array<i64: 2, 1>, scalar_prefetch = 0 : i64, scratch_operands = 1 : i64, tpu.core_type = #tpu.core_type<tc>, window_params = [{transform_indices = @transform_0, window_bounds = array<i64: 1, 8, 256>}, {pipeline_mode = #tpu.pipeline_mode<synchronous>, transform_indices = @transform_1, window_bounds = array<i64: 256, 128>}, {pipeline_mode = #tpu.pipeline_mode<synchronous>, transform_indices = @transform_2, window_bounds = array<i64: 1, 128>}, {pipeline_mode = #tpu.pipeline_mode<synchronous>, transform_indices = @transform_3, window_bounds = array<i64: 128, 128>}, {pipeline_mode = #tpu.pipeline_mode<synchronous>, transform_indices = @transform_4, window_bounds = array<i64: 1, 128>}, {transform_indices = @transform_5, window_bounds = array<i64: 1, 1, 128>}]} {
    %c0_i32 = arith.constant 0 : i32
    %0 = arith.cmpi eq, %arg1, %c0_i32 : i32
    %1 = arith.extui %0 : i1 to i32
    %c0_i32_0 = arith.constant 0 : i32
    %2 = arith.cmpi ne, %1, %c0_i32_0 : i32
    scf.if %2 {
      %cst_9 = arith.constant 0.000000e+00 : f32
      %14 = vector.broadcast %cst_9 : f32 to vector<1x256xf32>
      %c0_10 = arith.constant 0 : index
      %c0_11 = arith.constant 0 : index
      %15 = vector.load %arg8[%c0_10, %c0_11] : memref<1x256xf32, #tpu.memory_space<vmem>>, vector<1x256xf32>
      tpu.vector_store %arg8[%c0_10, %c0_11], %14 {strides = array<i32>} : memref<1x256xf32, #tpu.memory_space<vmem>>, vector<1x256xf32>,
    } else {
    }
    %c0 = arith.constant 0 : index
    %c0_1 = arith.constant 0 : index
    %3 = vector.load %arg8[%c0, %c0_1] : memref<1x256xf32, #tpu.memory_space<vmem>>, vector<1x256xf32>
    %c0_2 = arith.constant 0 : index
    %c0_3 = arith.constant 0 : index
    %c0_4 = arith.constant 0 : index
    %4 = vector.load %arg2[%c0_2, %c0_3, %c0_4] : memref<1x8x256xbf16, #tpu.memory_space<vmem>>, vector<1x8x256xbf16>
    %5 = vector.shape_cast %4 : vector<1x8x256xbf16> to vector<8x256xbf16>
    %6 = arith.extf %5 : vector<8x256xbf16> to vector<8x256xf32>
    %cst = arith.constant dense<0.000000e+00> : vector<256xf32>
    %7 = vector.multi_reduction <add>, %6, %cst [0] : vector<8x256xf32> to vector<256xf32>
    %8 = vector.shape_cast %7 : vector<256xf32> to vector<1x256xf32>
    %9 = arith.addf %3, %8 : vector<1x256xf32>
    %c0_5 = arith.constant 0 : index
    %c0_6 = arith.constant 0 : index
    %10 = vector.load %arg8[%c0_5, %c0_6] : memref<1x256xf32, #tpu.memory_space<vmem>>, vector<1x256xf32>
    tpu.vector_store %arg8[%c0_5, %c0_6], %9 {strides = array<i32>} : memref<1x256xf32, #tpu.memory_space<vmem>>, vector<1x256xf32>,
    %c0_i32_7 = arith.constant 0 : i32
    %11 = arith.cmpi eq, %arg1, %c0_i32_7 : i32
    %12 = arith.extui %11 : i1 to i32
    %c0_i32_8 = arith.constant 0 : i32
    %13 = arith.cmpi ne, %12, %c0_i32_8 : i32
    scf.if %13 {
      %c0_9 = arith.constant 0 : index
      %c0_10 = arith.constant 0 : index
      %14 = vector.load %arg8[%c0_9, %c0_10] : memref<1x256xf32, #tpu.memory_space<vmem>>, vector<1x256xf32>
      %cst_11 = arith.constant 2.500000e-01 : f32
      %15 = vector.broadcast %cst_11 : f32 to vector<1x256xf32>
      %16 = arith.mulf %14, %15 : vector<1x256xf32>
      %17 = arith.truncf %16 : vector<1x256xf32> to vector<1x256xbf16>
      %c0_12 = arith.constant 0 : index
      %c0_13 = arith.constant 0 : index
      %18 = vector.load %arg3[%c0_12, %c0_13] : memref<256x128xbf16, #tpu.memory_space<vmem>>, vector<256x128xbf16>
      %cst_14 = arith.constant dense<0.000000e+00> : vector<1x128xf32>
      %19 = tpu.matmul %17, %18, %cst_14 {dimension_numbers = #tpu.dot_dimension_numbers<[1], [0], [0], [1], [0, 0, 1, 1], [], []>} : vector<1x256xbf16>, vector<256x128xbf16>, vector<1x128xf32> -> vector<1x128xf32>
      %c0_15 = arith.constant 0 : index
      %c0_16 = arith.constant 0 : index
      %20 = vector.load %arg4[%c0_15, %c0_16] : memref<1x128xf32, #tpu.memory_space<vmem>>, vector<1x128xf32>
      %21 = arith.addf %19, %20 : vector<1x128xf32>
      %cst_17 = arith.constant 3.000000e+00 : f32
      %22 = vector.broadcast %cst_17 : f32 to vector<1x128xf32>
      %23 = arith.addf %21, %22 : vector<1x128xf32>
      %cst_18 = arith.constant 0.000000e+00 : f32
      %cst_19 = arith.constant 6.000000e+00 : f32
      %24 = vector.broadcast %cst_18 : f32 to vector<1x128xf32>
      %25 = arith.maximumf %24, %23 : vector<1x128xf32>
      %26 = vector.broadcast %cst_19 : f32 to vector<1x128xf32>
      %27 = arith.minimumf %26, %25 : vector<1x128xf32>
      %28 = arith.mulf %21, %27 : vector<1x128xf32>
      %cst_20 = arith.constant 0.166666672 : f32
      %29 = vector.broadcast %cst_20 : f32 to vector<1x128xf32>
      %30 = arith.mulf %28, %29 : vector<1x128xf32>
      %31 = arith.truncf %30 : vector<1x128xf32> to vector<1x128xbf16>
      %c0_21 = arith.constant 0 : index
      %c0_22 = arith.constant 0 : index
      %32 = vector.load %arg5[%c0_21, %c0_22] : memref<128x128xbf16, #tpu.memory_space<vmem>>, vector<128x128xbf16>
      %cst_23 = arith.constant dense<0.000000e+00> : vector<1x128xf32>
      %33 = tpu.matmul %31, %32, %cst_23 {dimension_numbers = #tpu.dot_dimension_numbers<[1], [0], [0], [1], [0, 0, 1, 1], [], []>} : vector<1x128xbf16>, vector<128x128xbf16>, vector<1x128xf32> -> vector<1x128xf32>
      %c0_24 = arith.constant 0 : index
      %c0_25 = arith.constant 0 : index
      %34 = vector.load %arg6[%c0_24, %c0_25] : memref<1x128xf32, #tpu.memory_space<vmem>>, vector<1x128xf32>
      %35 = arith.addf %33, %34 : vector<1x128xf32>
      %c0_26 = arith.constant 0 : index
      %c0_27 = arith.constant 0 : index
      %c0_28 = arith.constant 0 : index
      %36 = vector.load %arg7[%c0_26, %c0_27, %c0_28] : memref<1x1x128xf32, #tpu.memory_space<vmem>>, vector<1x1x128xf32>
      %37 = vector.shape_cast %36 : vector<1x1x128xf32> to vector<1x128xf32>
      %38 = vector.shape_cast %35 : vector<1x128xf32> to vector<1x1x128xf32>
      tpu.vector_store %arg7[%c0_26, %c0_27, %c0_28], %38 {strides = array<i32>} : memref<1x1x128xf32, #tpu.memory_space<vmem>>, vector<1x1x128xf32>,
    } else {
    }
    return
  }
  func.func @transform_0(%arg0: i32, %arg1: i32) -> (i32, i32, i32) {
    %c0_i32 = arith.constant 0 : i32
    %c0_i32_0 = arith.constant 0 : i32
    return %arg0, %arg1, %c0_i32 : i32, i32, i32
  }
  func.func @transform_1(%arg0: i32, %arg1: i32) -> (i32, i32) {
    %c0_i32 = arith.constant 0 : i32
    %c0_i32_0 = arith.constant 0 : i32
    %c0_i32_1 = arith.constant 0 : i32
    return %c0_i32, %c0_i32_0 : i32, i32
  }
  func.func @transform_2(%arg0: i32, %arg1: i32) -> (i32, i32) {
    %c0_i32 = arith.constant 0 : i32
    %c0_i32_0 = arith.constant 0 : i32
    %c0_i32_1 = arith.constant 0 : i32
    return %c0_i32, %c0_i32_0 : i32, i32
  }
  func.func @transform_3(%arg0: i32, %arg1: i32) -> (i32, i32) {
    %c0_i32 = arith.constant 0 : i32
    %c0_i32_0 = arith.constant 0 : i32
    %c0_i32_1 = arith.constant 0 : i32
    return %c0_i32, %c0_i32_0 : i32, i32
  }
  func.func @transform_4(%arg0: i32, %arg1: i32) -> (i32, i32) {
    %c0_i32 = arith.constant 0 : i32
    %c0_i32_0 = arith.constant 0 : i32
    %c0_i32_1 = arith.constant 0 : i32
    return %c0_i32, %c0_i32_0 : i32, i32
  }
  func.func @transform_5(%arg0: i32, %arg1: i32) -> (i32, i32, i32) {
    %c0_i32 = arith.constant 0 : i32
    %c0_i32_0 = arith.constant 0 : i32
    %c0_i32_1 = arith.constant 0 : i32
    return %arg0, %c0_i32, %c0_i32_0 : i32, i32, i32
  }
}

</mosaic_0001>

<bundles_post_ra>
// kernel: mobilenet_v3_forward.17
= control target key start
LH: loop header
LB: loop body
LE: loop exit
PB: predicated region body
PF: predicated region fallthrough
CT: control target
= control target key end

     0   :  { %s650_s15 = smov 0   ;;  %s652_s16 = smov 0   ;;  %s705_s0 = inlined_call_operand.vmem [shape: bf16[2,64,27], index: 0, kind: input, shape index: {}]   ;;  %s706_s1 = inlined_call_operand.vmem [shape: bf16[27,128], index: 1, kind: input, shape index: {}]   ;;  %s707_s2 = inlined_call_operand.vmem [shape: f32[1,128], index: 2, kind: input, shape index: {}]   ;;  %s708_s3 = inlined_call_operand.vmem [shape: f32[1,128], index: 3, kind: input, shape index: {}]   ;;  %s709_s4 = inlined_call_operand.vmem [shape: bf16[2,64,128], index: 4, kind: output, shape index: {}]  }
   0x1   :  { %s654_s17 = smov 0  }
   0x2 LB: > { %s26_s18 = sadd.s32 1, %s618_s16  ;;  %p501_p0 = scmp.ge.s32.totalorder %s622_s17, 1  ;;  %s622_s17 = sphi %s654_s17, %s14_s17   ;;  %s618_s16 = sphi %s652_s16, %s711_s16   ;;  %s614_s15 = sphi %s650_s15, %s710_s15  }
   0x3   : > { %p28_p1 = scmp.ge.s32.totalorder %s26_s18, 2  ;;  %p183_p2 = scmp.lt.s32.totalorder %s622_s17, 3 }
   0x5   : > { %s713_s18 = smov (%p28_p1, %s26_s18), 0  ;;  %p184_p3 = pnand %p501_p0, %p183_p2 }
   0x6   : > { %p218_p4 = scmp.lt.s32.totalorder (!%p184_p3), %s614_s15, 1 }
   0x7   : > { %187 = sbr.rel (%p184_p3) target bundleno = 184 (0xb8), region = 36 }
   0xc   : > { %v528_v0 = vld [vmem:[%s706_s1 + $0x8] sm:$0xf]  ;;  %v543_v1 = vld [vmem:[%s706_s1 + $0x8] sm:$0x30]  ;;  %vm294_vm0 = vcmask 1044480   ;;  %vm295_vm1 = vcmask 1045504  }
   0xd   : > { %v529_v2 = vor.u32 %v543_v1, %v528_v0  ;;  %v624_v3 = vmov 65535   ;;  %s715_s15 = smov (!%p218_p4, %s614_s15), 1  ;;  %v542_v7 = vld [vmem:[%s706_s1] sm:$0xff]  ;;  %vm281_vm2 = vcmask 220160  }
   0xe   : > { %v296_v4 = vsel %vm294_vm0, 4294967295, %v624_v3  ;;  %s536_s23 = sshll.u32 %s715_s15, 5  ;;  %v598_v12 = vld [vmem:[%s707_s2] ss:$0 sm:$0xff] }
   0xf   : > { %v297_v5 = vsel %vm295_vm1, %v296_v4, 0  ;;  %s225_s28 = scalar_lea.vmem %s705_s0, %s536_s23  ;;  %v599_v13 = vld [vmem:[%s708_s3] ss:$0 sm:$0xff]  ;;  %s235_s9 = scalar_lea.vmem %s709_s4, %s536_s23 }
  0x10   : > { %v299_v6 = vand.u32 %v529_v2, %v297_v5  ;;  %v538_v8 = vld [vmem:[%s225_s28] sm:$0xff]  ;;  %v539_v9 = vld [vmem:[%s225_s28 + $0x8] sm:$0xff]  ;;  %v540_v10 = vld [vmem:[%s225_s28 + $0x10] sm:$0xff] }
  0x11   : > { %v541_v11 = vld [vmem:[%s225_s28 + $0x18] sm:$0xff] }
  0x12   : > { %307 = vmatpush.bf16.msra.mxu0 %v299_v6  ;;  %567 = vmatpush.bf16.msra.mxu1 %v299_v6 }
  0x13   : > { %568 = vmatpush.bf16.msra.mxu2 %v299_v6  ;;  %569 = vmatpush.bf16.msra.mxu3 %v299_v6 }
  0x16   : > { %308 = vmatpush.bf16.msra.mxu0 %v542_v7  ;;  %570 = vmatpush.bf16.msra.mxu1 %v542_v7 }
  0x17   : > { %571 = vmatpush.bf16.msra.mxu2 %v542_v7  ;;  %572 = vmatpush.bf16.msra.mxu3 %v542_v7 }
  0x19   : > { %530 = vmatmul.msk.bf16.vlgmr.msra.gmra.mxu0 %vm281_vm2, %v538_v8  ;;  %531 = vmatmul.msk.bf16.vlgmr.msra.gmra.mxu1 %vm281_vm2, %v539_v9 }
  0x1a   : > { %532 = vmatmul.msk.bf16.vlgmr.msra.gmra.mxu2 %vm281_vm2, %v540_v10  ;;  %533 = vmatmul.msk.bf16.vlgmr.msra.gmra.mxu3 %vm281_vm2, %v541_v11 }
  0x96   : > { %v310_v14 = vpop.f32.mrf.mxu0  ;;  %v315_v15 = vpop.f32.mrf.mxu1 }
  0x97   : > { %v334_v16 = vmul.f32 %v598_v12, %v310_v14  ;;  %v336_v17 = vmul.f32 %v598_v12, %v315_v15 }
  0x99   : > { %v346_v18 = vadd.f32 %v599_v13, %v334_v16  ;;  %v348_v19 = vadd.f32 %v599_v13, %v336_v17 }
  0x9b   : > { %v354_v20 = vadd.f32 3.0, %v346_v18  ;;  %v356_v21 = vadd.f32 3.0, %v348_v19 }
  0x9d   : > { %v320_v22 = vpop.f32.mrf.mxu2  ;;  %v325_v23 = vpop.f32.mrf.mxu3  ;;  %v362_v24 = vmax.f32 %v354_v20, 0.0  ;;  %v364_v29 = vmax.f32 %v356_v21, 0.0 }
  0x9e   : > { %v338_v25 = vmul.f32 %v598_v12, %v320_v22  ;;  %v340_v26 = vmul.f32 %v598_v12, %v325_v23  ;;  %v312_v27 = vpop.f32.mrf.mxu0  ;;  %v317_v28 = vpop.f32.mrf.mxu1 }
  0x9f   : > { %v335_v30 = vmul.f32 %v598_v12, %v312_v27  ;;  %v337_v31 = vmul.f32 %v598_v12, %v317_v28  ;;  %v370_v36 = vmin.f32 %v362_v24, 6.0  ;;  %v372_v39 = vmin.f32 %v364_v29, 6.0 }
  0xa0   : > { %v350_v32 = vadd.f32 %v599_v13, %v338_v25  ;;  %v352_v33 = vadd.f32 %v599_v13, %v340_v26 }
  0xa1   : > { %v347_v34 = vadd.f32 %v599_v13, %v335_v30  ;;  %v349_v35 = vadd.f32 %v599_v13, %v337_v31  ;;  %v378_v47 = vmul.f32 %v370_v36, %v346_v18  ;;  %v380_v51 = vmul.f32 %v372_v39, %v348_v19 }
  0xa2   : > { %v358_v37 = vadd.f32 3.0, %v350_v32  ;;  %v360_v38 = vadd.f32 3.0, %v352_v33 }
  0xa3   : > { %v355_v40 = vadd.f32 3.0, %v347_v34  ;;  %v357_v41 = vadd.f32 3.0, %v349_v35  ;;  %v386_v59 = vmul.f32 0.16666667, %v378_v47  ;;  %v388_v63 = vmul.f32 0.16666667, %v380_v51 }
  0xa4   : > { %v366_v42 = vmax.f32 %v358_v37, 0.0  ;;  %v368_v48 = vmax.f32 %v360_v38, 0.0 }
  0xa5   : > { %v363_v43 = vmax.f32 %v355_v40, 0.0  ;;  %v365_v44 = vmax.f32 %v357_v41, 0.0  ;;  %v322_v45 = vpop.f32.mrf.mxu2  ;;  %v327_v46 = vpop.f32.mrf.mxu3 }
  0xa6   : > { %v339_v49 = vmul.f32 %v598_v12, %v322_v45  ;;  %v341_v50 = vmul.f32 %v598_v12, %v327_v46  ;;  %v374_v56 = vmin.f32 %v366_v42, 6.0  ;;  %v376_v60 = vmin.f32 %v368_v48, 6.0 }
  0xa7   : > { %v371_v52 = vmin.f32 %v363_v43, 6.0  ;;  %v373_v53 = vmin.f32 %v365_v44, 6.0 }
  0xa8   : > { %v351_v54 = vadd.f32 %v599_v13, %v339_v49  ;;  %v353_v55 = vadd.f32 %v599_v13, %v341_v50  ;;  %v382_v4 = vmul.f32 %v374_v56, %v350_v32  ;;  %v384_v7 = vmul.f32 %v376_v60, %v352_v33 }
  0xa9   : > { %v379_v57 = vmul.f32 %v371_v52, %v347_v34  ;;  %v381_v58 = vmul.f32 %v373_v53, %v349_v35 }
  0xaa   : > { %v359_v61 = vadd.f32 3.0, %v351_v54  ;;  %v361_v62 = vadd.f32 3.0, %v353_v55  ;;  %v390_v12 = vmul.f32 0.16666667, %v382_v4  ;;  %v392_v13 = vmul.f32 0.16666667, %v384_v7 }
  0xab   : > { %v387_v0 = vmul.f32 0.16666667, %v379_v57  ;;  %v389_v1 = vmul.f32 0.16666667, %v381_v58 }
  0xac   : > { %v367_v2 = vmax.f32 %v359_v61, 0.0  ;;  %v369_v3 = vmax.f32 %v361_v62, 0.0 }
  0xad   : > { %v547_v5 = vpack.c.bf16 %v387_v0, %v386_v59  ;;  %v552_v6 = vpack.c.bf16 %v389_v1, %v388_v63 }
  0xae   : > { %v375_v8 = vmin.f32 %v367_v2, 6.0  ;;  %v377_v9 = vmin.f32 %v369_v3, 6.0 }
  0xaf   : > { %548 = vst [vmem:[%s235_s9] sm:$0xff] %v547_v5  }
  0xb0   : > { %564 = vst [vmem:[%s235_s9 + $0x8] sm:$0xff] %v552_v6   ;;  %v383_v10 = vmul.f32 %v375_v8, %v351_v54  ;;  %v385_v11 = vmul.f32 %v377_v9, %v353_v55 }
  0xb2   : > { %v391_v14 = vmul.f32 0.16666667, %v383_v10  ;;  %v393_v15 = vmul.f32 0.16666667, %v385_v11 }
  0xb4   : > { %v557_v16 = vpack.c.bf16 %v391_v14, %v390_v12  ;;  %v562_v17 = vpack.c.bf16 %v393_v15, %v392_v13 }
  0xb6   : > { %565 = vst [vmem:[%s235_s9 + $0x10] sm:$0xff] %v557_v16  }
  0xb7   : > { %566 = vst [vmem:[%s235_s9 + $0x18] sm:$0xff] %v562_v17  }
  0xb8 PF: > { %s14_s17 = sadd.s32 1, %s622_s17   ;;  %s710_s15 = smov %s618_s16 }
  0xb9   : > { %p11_p5 = scmp.ge.s32.totalorder %s14_s17, 4   ;;  %s711_s16 = smov %s713_s18 }
  0xbb   :  { %13 = sbr.rel (!%p11_p5) target bundleno = 2 (0x2), region = 66 }

// kernel: mobilenet_v3_forward.20
= control target key start
LH: loop header
LB: loop body
LE: loop exit
PB: predicated region body
PF: predicated region fallthrough
CT: control target
= control target key end

     0   :  { %s622_s18 = smov 0   ;;  %s624_s19 = smov 0   ;;  %s692_s0 = inlined_call_operand.vmem [shape: bf16[2,16,128], index: 0, kind: input, shape index: {}]   ;;  %s693_s1 = inlined_call_operand.vmem [shape: f32[2,1,128], index: 1, kind: input, shape index: {}]   ;;  %s694_s2 = inlined_call_operand.vmem [shape: bf16[128,128], index: 2, kind: input, shape index: {}]   ;;  %s695_s3 = inlined_call_operand.vmem [shape: f32[1,128], index: 3, kind: input, shape index: {}]   ;;  %s696_s4 = inlined_call_operand.vmem [shape: f32[1,128], index: 4, kind: input, shape index: {}]   ;;  %s697_s5 = inlined_call_operand.vmem [shape: bf16[2,16,128], index: 5, kind: output, shape index: {}]  }
   0x1   :  { %s626_s20 = smov 0  }
   0x2 LB: > { %s27_s21 = sadd.s32 1, %s586_s19  ;;  %p483_p0 = scmp.ge.s32.totalorder %s590_s20, 1  ;;  %s590_s20 = sphi %s626_s20, %s15_s20   ;;  %s586_s19 = sphi %s624_s19, %s699_s19   ;;  %s582_s18 = sphi %s622_s18, %s698_s18  }
   0x3   : > { %p29_p1 = scmp.ge.s32.totalorder %s27_s21, 2  ;;  %p216_p2 = scmp.lt.s32.totalorder %s590_s20, 3 }
   0x5   : > { %s701_s21 = smov (%p29_p1, %s27_s21), 0  ;;  %p217_p3 = pnand %p483_p0, %p216_p2 }
   0x6   : > { %p256_p4 = scmp.lt.s32.totalorder (!%p217_p3), %s582_s18, 1 }
   0x7   : > { %220 = sbr.rel (%p217_p3) target bundleno = 185 (0xb9), region = 40 }
   0xc   : > { %v531_v0 = vld [vmem:[%s694_s2 + $0x38] sm:$0xff]  ;;  %v530_v1 = vld [vmem:[%s694_s2 + $0x30] sm:$0xff]  ;;  %s703_s18 = smov (!%p256_p4, %s582_s18), 1  ;;  %v529_v2 = vld [vmem:[%s694_s2 + $0x28] sm:$0xff] }
   0xd   : > { %353 = vmatpush.bf16.msra.mxu0 %v531_v0  ;;  %s267_s28 = scalar_lea.vmem %s693_s1, %s703_s18  ;;  %v528_v3 = vld [vmem:[%s694_s2 + $0x20] sm:$0xff]  ;;  %s522_s8 = sshll.u32 %s703_s18, 3  ;;  %v527_v4 = vld [vmem:[%s694_s2 + $0x18] sm:$0xff]  ;;  %v526_v5 = vld [vmem:[%s694_s2 + $0x10] sm:$0xff] }
   0xe   : > { %s263_s13 = scalar_lea.vmem %s692_s0, %s522_s8  ;;  %v565_v9 = vld [vmem:[%s267_s28] ss:$0 sm:$0xff]  ;;  %v525_v10 = vld [vmem:[%s694_s2 + $0x8] sm:$0xff]  ;;  %s276_s29 = scalar_lea.vmem %s697_s5, %s522_s8 }
   0xf   : > { %v533_v6 = vld [vmem:[%s263_s13] sm:$0xff]  }
  0x10   : > { %v534_v7 = vunpack.c.l.bf16 %v533_v6  ;;  %v535_v8 = vunpack.c.h.bf16 %v533_v6  ;;  %v524_v13 = vld [vmem:[%s694_s2] sm:$0xff] }
  0x11   : > { %354 = vmatpush.bf16.msra.mxu0 %v530_v1  ;;  %v566_v16 = vld [vmem:[%s695_s3] ss:$0 sm:$0xff] }
  0x12   : > { %v286_v11 = vmul.f32 %v565_v9, %v534_v7  ;;  %v287_v12 = vmul.f32 %v565_v9, %v535_v8  ;;  %v567_v18 = vld [vmem:[%s696_s4] ss:$0 sm:$0xff] }
  0x14   : > { %v288_v14 = vpack.c.bf16 %v287_v12, %v286_v11 }
  0x15   : > { %355 = vmatpush.bf16.msra.mxu0 %v529_v2 }
  0x19   : > { %356 = vmatpush.bf16.msra.mxu0 %v528_v3 }
  0x1d   : > { %357 = vmatpush.bf16.msra.mxu0 %v527_v4 }
  0x21   : > { %358 = vmatpush.bf16.msra.mxu0 %v526_v5 }
  0x25   : > { %359 = vmatpush.bf16.msra.mxu0 %v525_v10 }
  0x29   : > { %360 = vmatpush.bf16.msra.mxu0 %v524_v13 }
  0x2c   : > { %361 = vmatmul.bf16.vlgmr.msra.gmra.mxu0 %v288_v14 }
  0xa9   : > { %v362_v15 = vpop.f32.mrf.mxu0 }
  0xaa   : > { %v371_v17 = vmul.f32 %v566_v16, %v362_v15 }
  0xac   : > { %v377_v21 = vadd.f32 %v567_v18, %v371_v17 }
  0xb1   : > { %v364_v19 = vpop.f32.mrf.mxu0 }
  0xb2   : > { %v372_v20 = vmul.f32 %v566_v16, %v364_v19 }
  0xb4   : > { %v378_v22 = vadd.f32 %v567_v18, %v372_v20 }
  0xb6   : > { %v539_v23 = vpack.c.bf16 %v378_v22, %v377_v21 }
  0xb8   : > { %540 = vst [vmem:[%s276_s29] sm:$0xff] %v539_v23  }
  0xb9 PF: > { %s15_s20 = sadd.s32 1, %s590_s20   ;;  %s698_s18 = smov %s586_s19 }
  0xba   : > { %p12_p5 = scmp.ge.s32.totalorder %s15_s20, 4   ;;  %s699_s19 = smov %s701_s21 }
  0xbc   :  { %14 = sbr.rel (!%p12_p5) target bundleno = 2 (0x2), region = 73 }

// kernel: mobilenet_v3_forward.18
= control target key start
LH: loop header
LB: loop body
LE: loop exit
PB: predicated region body
PF: predicated region fallthrough
CT: control target
= control target key end

     0   :  { %s982_s24 = smov 0   ;;  %s984_s25 = smov 0   ;;  %s1177_s0 = inlined_call_operand.vmem [shape: bf16[2,5,5,128], index: 0, kind: input, shape index: {}]   ;;  %s1178_s1 = inlined_call_operand.vmem [shape: bf16[2,5,5,128], index: 1, kind: input, shape index: {}]   ;;  %s1179_s2 = inlined_call_operand.vmem [shape: bf16[2,5,5,128], index: 2, kind: input, shape index: {}]   ;;  %s1180_s3 = inlined_call_operand.vmem [shape: bf16[2,5,5,128], index: 3, kind: input, shape index: {}]   ;;  %s1181_s4 = inlined_call_operand.vmem [shape: f32[9,128], index: 4, kind: input, shape index: {}]   ;;  %s1182_s5 = inlined_call_operand.vmem [shape: f32[1,128], index: 5, kind: input, shape index: {}]   ;;  %s1183_s6 = inlined_call_operand.vmem [shape: f32[1,128], index: 6, kind: input, shape index: {}]   ;;  %s1184_s7 = inlined_call_operand.vmem [shape: bf16[2,4,4,128], index: 7, kind: output, shape index: {}]  }
   0x1   :  { %s986_s26 = smov 0  }
   0x2 LB: > { %s29_s27 = sadd.s32 1, %s936_s25  ;;  %p860_p0 = scmp.ge.s32.totalorder %s940_s26, 1  ;;  %s940_s26 = sphi %s986_s26, %s17_s26   ;;  %s936_s25 = sphi %s984_s25, %s1186_s25   ;;  %s932_s24 = sphi %s982_s24, %s1185_s24  }
   0x3   : > { %p31_p1 = scmp.ge.s32.totalorder %s29_s27, 2  ;;  %p326_p2 = scmp.lt.s32.totalorder %s940_s26, 3 }
   0x5   : > { %s1188_s27 = smov (%p31_p1, %s29_s27), 0  ;;  %p327_p3 = pnand %p860_p0, %p326_p2 }
   0x6   : > { %p398_p4 = scmp.lt.s32.totalorder (!%p327_p3), %s932_s24, 1 }
   0x7   : > { %330 = sbr.rel (%p327_p3) target bundleno = 67 (0x43), region = 48 }
   0xc   : > { %s1190_s24 = smov (!%p398_p4, %s932_s24), 1  ;;  %v1006_v0 = vld [vmem:[%s1181_s4] ss:$0 sm:$0xff]  ;;  %v1011_v1 = vld [vmem:[%s1181_s4 + $0x1] ss:$0 sm:$0xff] }
   0xd   : > { %s882_s28 = smul.u32 20, %s1190_s24  ;;  %v1016_v2 = vld [vmem:[%s1181_s4 + $0x2] ss:$0 sm:$0xff]  ;;  %v1021_v3 = vld [vmem:[%s1181_s4 + $0x3] ss:$0 sm:$0xff]  ;;  %s881_s23 = sshll.u32 %s1190_s24, 3 }
   0xe   : > { %v1036_v4 = vld [vmem:[%s1181_s4 + $0x4] ss:$0 sm:$0xff]  ;;  %v1041_v5 = vld [vmem:[%s1181_s4 + $0x5] ss:$0 sm:$0xff]  ;;  %v1064_v20 = vld [vmem:[%s1181_s4 + $0x8] ss:$0 sm:$0xff]  ;;  %s1149_s30 = scalar_lea.vmem %s1184_s7, %s881_s23 }
   0xf   : > { %s1026_s16 = scalar_lea.vmem %s1177_s0, %s882_s28  ;;  %s1031_s19 = scalar_lea.vmem %s1178_s1, %s882_s28  ;;  %v1072_v24 = vld [vmem:[%s1181_s4 + $0x6] ss:$0 sm:$0xff]  ;;  %v1080_v29 = vld [vmem:[%s1181_s4 + $0x7] ss:$0 sm:$0xff] }
  0x10   : > { %s1046_s8 = scalar_lea.vmem %s1179_s2, %s882_s28  ;;  %s1051_s11 = scalar_lea.vmem %s1180_s3, %s882_s28  ;;  %v448_v6 = vld [vmem:[%s1026_s16] sm:$0x3]  ;;  %v867_v18 = vld [vmem:[%s1026_s16 + $0x4] sm:$0x3]  ;;  %v876_v52 = vld [vmem:[%s1026_s16 + $0x8] sm:$0x7] }
  0x11   : > { %v466_v7 = vld [vmem:[%s1031_s19] sm:$0x3]  ;;  %v452_v9 = vunpack.c.l.bf16 %v448_v6  ;;  %v875_v19 = vld [vmem:[%s1026_s16 + $0x4] sm:$0x7]  ;;  %v585_v28 = vunpack.c.l.bf16 %v867_v18  ;;  %v868_v56 = vld [vmem:[%s1026_s16 + $0x8] sm:$0x3] }
  0x12   : > { %v484_v8 = vld [vmem:[%s1026_s16] sm:$0x7]  ;;  %v470_v10 = vunpack.c.l.bf16 %v466_v7  ;;  %v871_v25 = vld [vmem:[%s1031_s19 + $0x4] sm:$0x3]  ;;  %v622_v35 = vunpack.c.l.bf16 %v875_v19  ;;  %v450_v57 = vld [vmem:[%s1026_s16 + $0x8] sm:$0x3] }
  0x13   : > { %v488_v11 = vunpack.c.l.bf16 %v484_v8  ;;  %v514_v12 = vld [vmem:[%s1046_s8] sm:$0x3]  ;;  %v458_v21 = vmul.f32 %v1006_v0, %v452_v9  ;;  %v449_v30 = vld [vmem:[%s1026_s16 + $0x4] sm:$0x3]  ;;  %v604_v39 = vunpack.c.l.bf16 %v871_v25  ;;  %v591_v54 = vmul.f32 %v1072_v24, %v585_v28  ;;  %v468_v58 = vld [vmem:[%s1031_s19 + $0x8] sm:$0x3] }
  0x14   : > { %v532_v13 = vld [vmem:[%s1051_s11] sm:$0x3]  ;;  %v518_v15 = vunpack.c.l.bf16 %v514_v12  ;;  %v476_v22 = vmul.f32 %v1011_v1, %v470_v10  ;;  %v467_v31 = vld [vmem:[%s1031_s19 + $0x4] sm:$0x3]  ;;  %v453_v40 = vunpack.c.l.bf16 %v449_v30  ;;  %v628_v45 = vmul.f32 %v1064_v20, %v622_v35  ;;  %v872_v63 = vld [vmem:[%s1031_s19 + $0x8] sm:$0x3] }
  0x15   : > { %v550_v14 = vld [vmem:[%s1046_s8] sm:$0x7]  ;;  %v536_v16 = vunpack.c.l.bf16 %v532_v13  ;;  %v494_v23 = vmul.f32 %v1016_v2, %v488_v11  ;;  %v485_v36 = vld [vmem:[%s1026_s16 + $0x4] sm:$0x7]  ;;  %v471_v41 = vunpack.c.l.bf16 %v467_v31  ;;  %v610_v59 = vmul.f32 %v1080_v29, %v604_v39  ;;  %v486_v10 = vld [vmem:[%s1026_s16 + $0x8] sm:$0x7] }
  0x16   : > { %v554_v17 = vunpack.c.l.bf16 %v550_v14  ;;  %v524_v26 = vmul.f32 %v1021_v3, %v518_v15  ;;  %v480_v32 = vadd.f32 %v476_v22, %v458_v21  ;;  %v515_v37 = vld [vmem:[%s1046_s8 + $0x4] sm:$0x3]  ;;  %v489_v46 = vunpack.c.l.bf16 %v485_v36  ;;  %v516_v11 = vld [vmem:[%s1046_s8 + $0x8] sm:$0x3]  ;;  %v451_v39 = vld [vmem:[%s1026_s16 + $0xc] sm:$0x3] }
  0x17   : > { %v502_v33 = vrot.slane %v494_v23, 1  ;;  %v542_v34 = vmul.f32 %v1036_v4, %v536_v16  ;;  %v533_v42 = vld [vmem:[%s1051_s11 + $0x4] sm:$0x3]  ;;  %v519_v47 = vunpack.c.l.bf16 %v515_v37  ;;  %v459_v48 = vmul.f32 %v1006_v0, %v453_v40  ;;  %v534_v16 = vld [vmem:[%s1051_s11 + $0x8] sm:$0x3] }
  0x18   : > { %v560_v27 = vmul.f32 %v1041_v5, %v554_v17  ;;  %v551_v43 = vld [vmem:[%s1046_s8 + $0x4] sm:$0x7]  ;;  %v477_v49 = vmul.f32 %v1011_v1, %v471_v41  ;;  %v537_v50 = vunpack.c.l.bf16 %v533_v42  ;;  %v495_v55 = vmul.f32 %v1016_v2, %v489_v46  ;;  %v552_v22 = vld [vmem:[%s1046_s8 + $0x8] sm:$0x7] }
  0x19   : > { %v510_v44 = vadd.f32 %v502_v33, %v480_v32  ;;  %v555_v51 = vunpack.c.l.bf16 %v551_v43  ;;  %v636_v60 = vrot.slane %v628_v45, 1  ;;  %v525_v62 = vmul.f32 %v1021_v3, %v519_v47  ;;  %v877_v33 = vld [vmem:[%s1026_s16 + $0xc] sm:$0x7] }
  0x1a   : > { %v568_v38 = vrot.slane %v560_v27, 1  ;;  %v481_v61 = vadd.f32 %v477_v49, %v459_v48  ;;  %v503_v7 = vrot.slane %v495_v55, 1  ;;  %v623_v9 = vunpack.c.l.bf16 %v876_v52  ;;  %v873_v45 = vld [vmem:[%s1031_s19 + $0xc] sm:$0x3]  ;;  %v1128_v52 = vld [vmem:[%s1183_s6] ss:$0 sm:$0xff] }
  0x1b   : > { %v528_v53 = vadd.f32 %v524_v26, %v510_v44  ;;  %v561_v8 = vmul.f32 %v1041_v5, %v555_v51  ;;  %v543_v12 = vmul.f32 %v1036_v4, %v537_v50  ;;  %v586_v13 = vunpack.c.l.bf16 %v868_v56  ;;  %v869_v44 = vld [vmem:[%s1026_s16 + $0xc] sm:$0x3] }
  0x1c   : > { %v454_v14 = vunpack.c.l.bf16 %v450_v57  ;;  %v472_v15 = vunpack.c.l.bf16 %v468_v58  ;;  %v511_v18 = vadd.f32 %v503_v7, %v481_v61  ;;  %v605_v19 = vunpack.c.l.bf16 %v872_v63  ;;  %v469_v50 = vld [vmem:[%s1031_s19 + $0xc] sm:$0x3] }
  0x1d   : > { %v546_v6 = vadd.f32 %v542_v34, %v528_v53  ;;  %v629_v21 = vmul.f32 %v1064_v20, %v623_v9  ;;  %v490_v26 = vunpack.c.l.bf16 %v486_v10  ;;  %v520_v27 = vunpack.c.l.bf16 %v516_v11  ;;  %v1114_v34 = vld [vmem:[%s1182_s5] ss:$0 sm:$0xff]  ;;  %v487_v56 = vld [vmem:[%s1026_s16 + $0xc] sm:$0x7] }
  0x1e   : > { %v460_v23 = vmul.f32 %v1006_v0, %v454_v14  ;;  %v478_v25 = vmul.f32 %v1011_v1, %v472_v15  ;;  %v529_v30 = vadd.f32 %v525_v62, %v511_v18  ;;  %v569_v31 = vrot.slane %v561_v8, 1  ;;  %v517_v57 = vld [vmem:[%s1046_s8 + $0xc] sm:$0x3] }
  0x1f   : > { %v576_v17 = vadd.f32 %v568_v38, %v546_v6  ;;  %v538_v32 = vunpack.c.l.bf16 %v534_v16  ;;  %v592_v35 = vmul.f32 %v1072_v24, %v586_v13  ;;  %v496_v37 = vmul.f32 %v1016_v2, %v490_v26  ;;  %v535_v63 = vld [vmem:[%s1051_s11 + $0xc] sm:$0x3] }
  0x20   : > { %v482_v36 = vadd.f32 %v478_v25, %v460_v23  ;;  %v556_v38 = vunpack.c.l.bf16 %v552_v22  ;;  %v547_v41 = vadd.f32 %v543_v12, %v529_v30  ;;  %v611_v42 = vmul.f32 %v1080_v29, %v605_v19  ;;  %v553_v9 = vld [vmem:[%s1046_s8 + $0xc] sm:$0x7] }
  0x21   : > { %v595_v28 = vadd.f32 %v591_v54, %v576_v17  ;;  %v637_v43 = vrot.slane %v629_v21, 1  ;;  %v504_v46 = vrot.slane %v496_v37, 1  ;;  %v526_v47 = vmul.f32 %v1021_v3, %v520_v27  ;;  %v870_v27 = vld [vmem:[%s1026_s16 + $0x10] sm:$0x3] }
  0x22   : > { %v562_v48 = vmul.f32 %v1041_v5, %v556_v38  ;;  %v624_v49 = vunpack.c.l.bf16 %v877_v33  ;;  %v577_v53 = vadd.f32 %v569_v31, %v547_v41  ;;  %v544_v54 = vmul.f32 %v1036_v4, %v538_v32  ;;  %v874_v37 = vld [vmem:[%s1031_s19 + $0x10] sm:$0x3] }
  0x23   : > { %v614_v40 = vadd.f32 %v610_v59, %v595_v28  ;;  %v455_v55 = vunpack.c.l.bf16 %v451_v39  ;;  %v512_v58 = vadd.f32 %v504_v46, %v482_v36  ;;  %v587_v61 = vunpack.c.l.bf16 %v869_v44  ;;  %v878_v28 = vld [vmem:[%s1026_s16 + $0x10] sm:$0x7] }
  0x24   : > { %v570_v59 = vrot.slane %v562_v48, 1  ;;  %v606_v62 = vunpack.c.l.bf16 %v873_v45  ;;  %v596_v6 = vadd.f32 %v592_v35, %v577_v53  ;;  %v473_v8 = vunpack.c.l.bf16 %v469_v50 }
  0x25   : > { %v644_v51 = vadd.f32 %v636_v60, %v614_v40  ;;  %v461_v7 = vmul.f32 %v1006_v0, %v455_v55  ;;  %v530_v10 = vadd.f32 %v526_v47, %v512_v58  ;;  %v630_v11 = vmul.f32 %v1064_v20, %v624_v49 }
  0x26   : > { %v491_v12 = vunpack.c.l.bf16 %v487_v56  ;;  %v521_v13 = vunpack.c.l.bf16 %v517_v57  ;;  %v615_v15 = vadd.f32 %v611_v42, %v596_v6  ;;  %v479_v16 = vmul.f32 %v1011_v1, %v473_v8 }
  0x27   : > { %v652_v60 = vmul.f32 %v1114_v34, %v644_v51  ;;  %v539_v17 = vunpack.c.l.bf16 %v535_v63  ;;  %v548_v18 = vadd.f32 %v544_v54, %v530_v10  ;;  %v593_v19 = vmul.f32 %v1072_v24, %v587_v61 }
  0x28   : > { %v497_v0 = vmul.f32 %v1016_v2, %v491_v12  ;;  %v557_v21 = vunpack.c.l.bf16 %v553_v9  ;;  %v645_v23 = vadd.f32 %v637_v43, %v615_v15  ;;  %v612_v25 = vmul.f32 %v1080_v29, %v606_v62 }
  0x29   : > { %v660_v14 = vadd.f32 %v1128_v52, %v652_v60  ;;  %v483_v26 = vadd.f32 %v479_v16, %v461_v7  ;;  %v578_v1 = vadd.f32 %v570_v59, %v548_v18  ;;  %v527_v31 = vmul.f32 %v1021_v3, %v521_v13 }
  0x2a   : > { %v505_v30 = vrot.slane %v497_v0, 1  ;;  %v563_v2 = vmul.f32 %v1041_v5, %v557_v21  ;;  %v653_v33 = vmul.f32 %v1114_v34, %v645_v23  ;;  %v638_v35 = vrot.slane %v630_v11, 1 }
  0x2b   : > { %v664_v22 = vmax.f32 %v660_v14, 0.0  ;;  %v545_v36 = vmul.f32 %v1036_v4, %v539_v17  ;;  %v597_v38 = vadd.f32 %v593_v19, %v578_v1  ;;  %v588_v40 = vunpack.c.l.bf16 %v870_v27 }
  0x2c   : > { %v513_v39 = vadd.f32 %v505_v30, %v483_v26  ;;  %v625_v41 = vunpack.c.l.bf16 %v878_v28  ;;  %v661_v42 = vadd.f32 %v1128_v52, %v653_v33  ;;  %v571_v3 = vrot.slane %v563_v2, 1 }
  0x2d   : > { %v668_v32 = vpack.c.bf16 %v664_v22, %v664_v22  ;;  %v616_v43 = vadd.f32 %v612_v25, %v597_v38  ;;  %v607_v45 = vunpack.c.l.bf16 %v874_v37  ;;  %v594_v48 = vmul.f32 %v1072_v24, %v588_v40 }
  0x2e   : > { %v531_v44 = vadd.f32 %v527_v31, %v513_v39  ;;  %v665_v5 = vmax.f32 %v661_v42, 0.0  ;;  %v631_v4 = vmul.f32 %v1064_v20, %v625_v41 }
  0x2f   : > { %672 = vst [vmem:[%s1149_s30] sm:$0x3] %v668_v32  ;;  %v646_v46 = vadd.f32 %v638_v35, %v616_v43  ;;  %v613_v53 = vmul.f32 %v1080_v29, %v607_v45 }
  0x30   : > { %v549_v47 = vadd.f32 %v545_v36, %v531_v44  ;;  %v669_v49 = vpack.c.bf16 %v665_v5, %v665_v5  ;;  %v639_v56 = vrot.slane %v631_v4, 1 }
  0x31   : > { %v654_v50 = vmul.f32 %v1114_v34, %v646_v46 }
  0x32   : > { %v579_v51 = vadd.f32 %v571_v3, %v549_v47  ;;  %673 = vst [vmem:[%s1149_s30 + $0x2] sm:$0x3] %v669_v49 }
  0x33   : > { %v662_v54 = vadd.f32 %v1128_v52, %v654_v50 }
  0x34   : > { %v598_v55 = vadd.f32 %v594_v48, %v579_v51 }
  0x35   : > { %v666_v57 = vmax.f32 %v662_v54, 0.0 }
  0x36   : > { %v617_v58 = vadd.f32 %v613_v53, %v598_v55 }
  0x37   : > { %v670_v59 = vpack.c.bf16 %v666_v57, %v666_v57 }
  0x38   : > { %v647_v61 = vadd.f32 %v639_v56, %v617_v58 }
  0x39   : > { %674 = vst [vmem:[%s1149_s30 + $0x4] sm:$0x3] %v670_v59 }
  0x3a   : > { %v655_v24 = vmul.f32 %v1114_v34, %v647_v61 }
  0x3c   : > { %v663_v20 = vadd.f32 %v1128_v52, %v655_v24 }
  0x3e   : > { %v667_v62 = vmax.f32 %v663_v20, 0.0 }
  0x40   : > { %v671_v63 = vpack.c.bf16 %v667_v62, %v667_v62 }
  0x42   : > { %675 = vst [vmem:[%s1149_s30 + $0x6] sm:$0x3] %v671_v63 }
  0x43 PF: > { %s17_s26 = sadd.s32 1, %s940_s26   ;;  %s1185_s24 = smov %s936_s25 }
  0x44   : > { %p14_p5 = scmp.ge.s32.totalorder %s17_s26, 4   ;;  %s1186_s25 = smov %s1188_s27 }
  0x46   :  { %16 = sbr.rel (!%p14_p5) target bundleno = 2 (0x2), region = 98 }

// kernel: mobilenet_v3_forward.19
= control target key start
LH: loop header
LB: loop body
LE: loop exit
PB: predicated region body
PF: predicated region fallthrough
CT: control target
= control target key end

     0   :  { %s672_s18 = smov 0   ;;  %s674_s19 = smov 0   ;;  %s763_s0 = inlined_call_operand.vmem [shape: bf16[2,16,128], index: 0, kind: input, shape index: {}]   ;;  %s764_s1 = inlined_call_operand.vmem [shape: bf16[128,128], index: 1, kind: input, shape index: {}]   ;;  %s765_s2 = inlined_call_operand.vmem [shape: f32[1,128], index: 2, kind: input, shape index: {}]   ;;  %s766_s3 = inlined_call_operand.vmem [shape: bf16[128,128], index: 3, kind: input, shape index: {}]   ;;  %s767_s4 = inlined_call_operand.vmem [shape: f32[1,128], index: 4, kind: input, shape index: {}]   ;;  %s768_s5 = inlined_call_operand.vmem [shape: f32[2,1,128], index: 5, kind: output, shape index: {}]  }
   0x1   :  { %s676_s20 = smov 0  }
   0x2 LB: > { %s27_s21 = sadd.s32 1, %s635_s19  ;;  %p502_p0 = scmp.ge.s32.totalorder %s639_s20, 1  ;;  %s639_s20 = sphi %s676_s20, %s15_s20   ;;  %s635_s19 = sphi %s674_s19, %s770_s19   ;;  %s631_s18 = sphi %s672_s18, %s769_s18  }
   0x3   : > { %p29_p1 = scmp.ge.s32.totalorder %s27_s21, 2  ;;  %p206_p2 = scmp.lt.s32.totalorder %s639_s20, 3 }
   0x5   : > { %s772_s21 = smov (%p29_p1, %s27_s21), 0  ;;  %p207_p3 = pnand %p502_p0, %p206_p2 }
   0x6   : > { %p237_p4 = scmp.lt.s32.totalorder (!%p207_p3), %s631_s18, 1 }
   0x7   : > { %210 = sbr.rel (%p207_p3) target bundleno = 315 (0x13b), region = 40 }
   0xc   : > { %v579_v0 = vld [vmem:[%s764_s1 + $0x38] sm:$0xff]  ;;  %v641_v1 = vmov 0.0   ;;  %v578_v2 = vld [vmem:[%s764_s1 + $0x30] sm:$0xff]  ;;  %s774_s18 = smov (!%p237_p4, %s631_s18), 1  ;;  %v577_v4 = vld [vmem:[%s764_s1 + $0x28] sm:$0xff] }
   0xd   : > { %253 = vst [vmem:[#allocation2] sm:$0x1] %v641_v1  ;;  %339 = vmatpush.bf16.msra.mxu0 %v579_v0  ;;  %s571_s26 = sshll.u32 %s774_s18, 3  ;;  %v587_v3 = vld [vmem:[%s766_s3 + $0x38] sm:$0xff]  ;;  %v586_v8 = vld [vmem:[%s766_s3 + $0x30] sm:$0xff]  ;;  %v576_v10 = vld [vmem:[%s764_s1 + $0x20] sm:$0xff]  ;;  %s248_s22 = scalar_lea.vmem %s768_s5, %s774_s18 }
   0xe   : > { %s244_s29 = scalar_lea.vmem %s763_s0, %s571_s26  ;;  %419 = vmatpush.bf16.msra.mxu1 %v587_v3  ;;  %v585_v12 = vld [vmem:[%s766_s3 + $0x28] sm:$0xff]  ;;  %v575_v14 = vld [vmem:[%s764_s1 + $0x18] sm:$0xff]  ;;  %v584_v16 = vld [vmem:[%s766_s3 + $0x20] sm:$0xff] }
   0xf   : > { %v589_v5 = vld [vmem:[%s244_s29] sm:$0xff]   ;;  %v574_v18 = vld [vmem:[%s764_s1 + $0x10] sm:$0xff]  ;;  %v583_v20 = vld [vmem:[%s766_s3 + $0x18] sm:$0xff] }
  0x10   : > { %v590_v6 = vunpack.c.l.bf16 %v589_v5  ;;  %v591_v7 = vunpack.c.h.bf16 %v589_v5  ;;  %v573_v23 = vld [vmem:[%s764_s1 + $0x8] sm:$0xff]  ;;  %v582_v25 = vld [vmem:[%s766_s3 + $0x10] sm:$0xff]  ;;  %v572_v26 = vld [vmem:[%s764_s1] sm:$0xff] }
  0x11   : > { %340 = vmatpush.bf16.msra.mxu0 %v578_v2  ;;  %v581_v30 = vld [vmem:[%s766_s3 + $0x8] sm:$0xff]  ;;  %v580_v31 = vld [vmem:[%s766_s3] sm:$0xff] }
  0x12   : > { %v259_v9 = vadd.f32 %v591_v7, %v590_v6  ;;  %420 = vmatpush.bf16.msra.mxu1 %v586_v8  ;;  %v290_v32 = vld [vmem:[%s765_s2] sm:$0x1] }
  0x13   : > { %v370_v38 = vld [vmem:[%s767_s4] sm:$0x1] }
  0x14   : > { %v260_v11 = vrot.slane %v259_v9, 4  ;;  %v254_v21 = vld [vmem:[#allocation2] sm:$0x1] }
  0x15   : > { %341 = vmatpush.bf16.msra.mxu0 %v577_v4 }
  0x16   : > { %v261_v13 = vadd.f32 %v260_v11, %v259_v9  ;;  %421 = vmatpush.bf16.msra.mxu1 %v585_v12 }
  0x18   : > { %v262_v15 = vrot.slane %v261_v13, 2 }
  0x19   : > { %342 = vmatpush.bf16.msra.mxu0 %v576_v10 }
  0x1a   : > { %v263_v17 = vadd.f32 %v262_v15, %v261_v13  ;;  %422 = vmatpush.bf16.msra.mxu1 %v584_v16 }
  0x1c   : > { %v264_v19 = vrot.slane %v263_v17, 1 }
  0x1d   : > { %343 = vmatpush.bf16.msra.mxu0 %v575_v14 }
  0x1e   : > { %v265_v22 = vadd.f32 %v264_v19, %v263_v17  ;;  %423 = vmatpush.bf16.msra.mxu1 %v583_v20 }
  0x20   : > { %v266_v24 = vadd.f32 %v265_v22, %v254_v21 }
  0x21   : > { %344 = vmatpush.bf16.msra.mxu0 %v574_v18 }
  0x22   : > { %267 = vst [vmem:[#allocation2] sm:$0x1] %v266_v24  ;;  %424 = vmatpush.bf16.msra.mxu1 %v582_v25 }
  0x25   : > { %345 = vmatpush.bf16.msra.mxu0 %v573_v23 }
  0x26   : > { %425 = vmatpush.bf16.msra.mxu1 %v581_v30 }
  0x29   : > { %346 = vmatpush.bf16.msra.mxu0 %v572_v26  ;;  %v271_v27 = vld [vmem:[#allocation2] sm:$0x1] }
  0x2a   : > { %v272_v28 = vmul.f32 0.0625, %v271_v27  ;;  %426 = vmatpush.bf16.msra.mxu1 %v580_v31 }
  0x2c   : > { %v273_v29 = vpack.c.bf16 %v272_v28, %v272_v28 }
  0x2e   : > { %347 = vmatmul.bf16.vlgmr.msra.gmra.mxu0 %v273_v29 }
  0xab   : > { %v348_v33 = vpop.f32.mrf.mxu0 }
  0xac   : > { %v349_v34 = vadd.f32 %v348_v33, %v290_v32 }
  0xae   : > { %v352_v35 = vmax.f32 %v349_v34, 0.0 }
  0xb0   : > { %v353_v36 = vpack.c.bf16 %v352_v35, %v352_v35 }
  0xb2   : > { %427 = vmatmul.bf16.vlgmr.msra.gmra.mxu1 %v353_v36 }
  0xb3   : > { %v350_v37 = vpop.f32.mrf.mxu0 }
 0x12f   : > { %v428_v39 = vpop.f32.mrf.mxu1 }
 0x130   : > { %v429_v40 = vadd.f32 %v428_v39, %v370_v38 }
 0x132   : > { %v432_v41 = vadd.f32 3.0, %v429_v40 }
 0x134   : > { %v433_v42 = vmax.f32 %v432_v41, 0.0 }
 0x136   : > { %v434_v43 = vmin.f32 %v433_v42, 6.0 }
 0x137   : > { %v430_v44 = vpop.f32.mrf.mxu1 }
 0x138   : > { %v435_v45 = vmul.f32 0.16666667, %v434_v43 }
 0x13a   : > { %436 = vst [vmem:[%s248_s22] sm:$0x1] %v435_v45 }
 0x13b PF: > { %s15_s20 = sadd.s32 1, %s639_s20   ;;  %s769_s18 = smov %s635_s19 }
 0x13c   : > { %p12_p5 = scmp.ge.s32.totalorder %s15_s20, 4   ;;  %s770_s19 = smov %s772_s21 }
 0x13e   :  { %14 = sbr.rel (!%p12_p5) target bundleno = 2 (0x2), region = 78 }

// kernel: mobilenet_v3_forward.21
= control target key start
LH: loop header
LB: loop body
LE: loop exit
PB: predicated region body
PF: predicated region fallthrough
CT: control target
= control target key end

     0   :  { %s566_s15 = smov 0   ;;  %s568_s16 = smov 0   ;;  %s629_s0 = inlined_call_operand.vmem [shape: bf16[2,16,128], index: 0, kind: input, shape index: {}]   ;;  %s630_s1 = inlined_call_operand.vmem [shape: bf16[128,128], index: 1, kind: input, shape index: {}]   ;;  %s631_s2 = inlined_call_operand.vmem [shape: f32[1,128], index: 2, kind: input, shape index: {}]   ;;  %s632_s3 = inlined_call_operand.vmem [shape: f32[1,128], index: 3, kind: input, shape index: {}]   ;;  %s633_s4 = inlined_call_operand.vmem [shape: bf16[2,16,128], index: 4, kind: output, shape index: {}]  }
   0x1   :  { %s570_s17 = smov 0  }
   0x2 LB: > { %s26_s18 = sadd.s32 1, %s535_s16  ;;  %p432_p0 = scmp.ge.s32.totalorder %s539_s17, 1  ;;  %s539_s17 = sphi %s570_s17, %s14_s17   ;;  %s535_s16 = sphi %s568_s16, %s635_s16   ;;  %s531_s15 = sphi %s566_s15, %s634_s15  }
   0x3   : > { %p28_p1 = scmp.ge.s32.totalorder %s26_s18, 2  ;;  %p183_p2 = scmp.lt.s32.totalorder %s539_s17, 3 }
   0x5   : > { %s637_s18 = smov (%p28_p1, %s26_s18), 0  ;;  %p184_p3 = pnand %p432_p0, %p183_p2 }
   0x6   : > { %p218_p4 = scmp.lt.s32.totalorder (!%p184_p3), %s531_s15, 1 }
   0x7   : > { %187 = sbr.rel (%p184_p3) target bundleno = 187 (0xbb), region = 36 }
   0xc   : > { %v485_v0 = vld [vmem:[%s630_s1 + $0x38] sm:$0xff]  ;;  %v484_v1 = vld [vmem:[%s630_s1 + $0x30] sm:$0xff]  ;;  %v483_v2 = vld [vmem:[%s630_s1 + $0x28] sm:$0xff]  ;;  %s639_s15 = smov (!%p218_p4, %s531_s15), 1 }
   0xd   : > { %309 = vmatpush.bf16.msra.mxu0 %v485_v0  ;;  %v482_v3 = vld [vmem:[%s630_s1 + $0x20] sm:$0xff]  ;;  %v481_v4 = vld [vmem:[%s630_s1 + $0x18] sm:$0xff]  ;;  %v480_v5 = vld [vmem:[%s630_s1 + $0x10] sm:$0xff]  ;;  %s475_s7 = sshll.u32 %s639_s15, 3 }
   0xe   : > { %v479_v6 = vld [vmem:[%s630_s1 + $0x8] sm:$0xff]  ;;  %v478_v7 = vld [vmem:[%s630_s1] sm:$0xff]  ;;  %s225_s12 = scalar_lea.vmem %s629_s0, %s475_s7  ;;  %s235_s22 = scalar_lea.vmem %s633_s4, %s475_s7 }
   0xf   : > { %v477_v8 = vld [vmem:[%s225_s12] sm:$0xff] }
  0x10   : > { %v515_v10 = vld [vmem:[%s631_s2] ss:$0 sm:$0xff] }
  0x11   : > { %310 = vmatpush.bf16.msra.mxu0 %v484_v1  ;;  %v516_v12 = vld [vmem:[%s632_s3] ss:$0 sm:$0xff] }
  0x15   : > { %311 = vmatpush.bf16.msra.mxu0 %v483_v2 }
  0x19   : > { %312 = vmatpush.bf16.msra.mxu0 %v482_v3 }
  0x1d   : > { %313 = vmatpush.bf16.msra.mxu0 %v481_v4 }
  0x21   : > { %314 = vmatpush.bf16.msra.mxu0 %v480_v5 }
  0x25   : > { %315 = vmatpush.bf16.msra.mxu0 %v479_v6 }
  0x29   : > { %316 = vmatpush.bf16.msra.mxu0 %v478_v7 }
  0x2c   : > { %317 = vmatmul.bf16.vlgmr.msra.gmra.mxu0 %v477_v8 }
  0xa9   : > { %v318_v9 = vpop.f32.mrf.mxu0 }
  0xaa   : > { %v327_v11 = vmul.f32 %v515_v10, %v318_v9 }
  0xac   : > { %v333_v14 = vadd.f32 %v516_v12, %v327_v11 }
  0xae   : > { %v335_v17 = vmax.f32 %v333_v14, 0.0 }
  0xb1   : > { %v320_v13 = vpop.f32.mrf.mxu0 }
  0xb2   : > { %v328_v15 = vmul.f32 %v515_v10, %v320_v13 }
  0xb4   : > { %v334_v16 = vadd.f32 %v516_v12, %v328_v15 }
  0xb6   : > { %v336_v18 = vmax.f32 %v334_v16, 0.0 }
  0xb8   : > { %v489_v19 = vpack.c.bf16 %v336_v18, %v335_v17 }
  0xba   : > { %490 = vst [vmem:[%s235_s22] sm:$0xff] %v489_v19  }
  0xbb PF: > { %s14_s17 = sadd.s32 1, %s539_s17   ;;  %s634_s15 = smov %s535_s16 }
  0xbc   : > { %p11_p5 = scmp.ge.s32.totalorder %s14_s17, 4   ;;  %s635_s16 = smov %s637_s18 }
  0xbe   :  { %13 = sbr.rel (!%p11_p5) target bundleno = 2 (0x2), region = 66 }

// kernel: mobilenet_v3_forward.22
= control target key start
LH: loop header
LB: loop body
LE: loop exit
PB: predicated region body
PF: predicated region fallthrough
CT: control target
= control target key end

     0   :  { %s878_s24 = smov 0   ;;  %s880_s25 = smov 0   ;;  %s973_s0 = inlined_call_operand.vmem [shape: bf16[2,3,3,128], index: 0, kind: input, shape index: {}]   ;;  %s974_s1 = inlined_call_operand.vmem [shape: bf16[2,3,3,128], index: 1, kind: input, shape index: {}]   ;;  %s975_s2 = inlined_call_operand.vmem [shape: bf16[2,3,3,128], index: 2, kind: input, shape index: {}]   ;;  %s976_s3 = inlined_call_operand.vmem [shape: bf16[2,3,3,128], index: 3, kind: input, shape index: {}]   ;;  %s977_s4 = inlined_call_operand.vmem [shape: f32[9,128], index: 4, kind: input, shape index: {}]   ;;  %s978_s5 = inlined_call_operand.vmem [shape: f32[1,128], index: 5, kind: input, shape index: {}]   ;;  %s979_s6 = inlined_call_operand.vmem [shape: f32[1,128], index: 6, kind: input, shape index: {}]   ;;  %s980_s7 = inlined_call_operand.vmem [shape: bf16[2,2,2,128], index: 7, kind: output, shape index: {}]  }
   0x1   :  { %s882_s26 = smov 0  }
   0x2 LB: > { %s29_s27 = sadd.s32 1, %s832_s25  ;;  %p758_p0 = scmp.ge.s32.totalorder %s836_s26, 1  ;;  %s836_s26 = sphi %s882_s26, %s17_s26   ;;  %s832_s25 = sphi %s880_s25, %s982_s25   ;;  %s828_s24 = sphi %s878_s24, %s981_s24  }
   0x3   : > { %p31_p1 = scmp.ge.s32.totalorder %s29_s27, 2  ;;  %p326_p2 = scmp.lt.s32.totalorder %s836_s26, 3 }
   0x5   : > { %s984_s27 = smov (%p31_p1, %s29_s27), 0  ;;  %p327_p3 = pnand %p758_p0, %p326_p2 }
   0x6   : > { %p397_p4 = scmp.lt.s32.totalorder (!%p327_p3), %s828_s24, 1 }
   0x7   : > { %330 = sbr.rel (%p327_p3) target bundleno = 53 (0x35), region = 48 }
   0xc   : > { %s986_s24 = smov (!%p397_p4, %s828_s24), 1  ;;  %v803_v0 = vld [vmem:[%s977_s4] ss:$0 sm:$0xff]  ;;  %v804_v1 = vld [vmem:[%s977_s4 + $0x1] ss:$0 sm:$0xff] }
   0xd   : > { %s778_s28 = smul.u32 6, %s986_s24  ;;  %v805_v2 = vld [vmem:[%s977_s4 + $0x2] ss:$0 sm:$0xff]  ;;  %v806_v10 = vld [vmem:[%s977_s4 + $0x3] ss:$0 sm:$0xff]  ;;  %s763_s21 = sshll.u32 %s986_s24, 1 }
   0xe   : > { %v808_v15 = vld [vmem:[%s977_s4 + $0x5] ss:$0 sm:$0xff]  ;;  %v807_v20 = vld [vmem:[%s977_s4 + $0x4] ss:$0 sm:$0xff]  ;;  %v809_v42 = vld [vmem:[%s977_s4 + $0x6] ss:$0 sm:$0xff]  ;;  %s445_s29 = scalar_lea.vmem %s980_s7, %s763_s21 }
   0xf   : > { %s905_s10 = scalar_lea.vmem %s973_s0, %s778_s28  ;;  %s910_s13 = scalar_lea.vmem %s974_s1, %s778_s28  ;;  %v811_v44 = vld [vmem:[%s977_s4 + $0x8] ss:$0 sm:$0xff]  ;;  %v810_v46 = vld [vmem:[%s977_s4 + $0x7] ss:$0 sm:$0xff] }
  0x10   : > { %s420_s20 = scalar_lea.vmem %s975_s2, %s778_s28  ;;  %s428_s23 = scalar_lea.vmem %s976_s3, %s778_s28  ;;  %v446_v3 = vld [vmem:[%s905_s10] sm:$0x1]  ;;  %v457_v5 = vld [vmem:[%s910_s13 + $0x2] sm:$0x1]  ;;  %v769_v53 = vld [vmem:[%s905_s10 + $0x4] sm:$0x1] }
  0x11   : > { %v456_v4 = vld [vmem:[%s910_s13] sm:$0x1]  ;;  %v448_v6 = vunpack.c.l.bf16 %v446_v3  ;;  %v459_v17 = vunpack.c.l.bf16 %v457_v5  ;;  %v485_v19 = vld [vmem:[%s420_s20 + $0x2] sm:$0x1]  ;;  %v773_v54 = vld [vmem:[%s905_s10 + $0x4] sm:$0x3]  ;;  %v526_v3 = vunpack.c.l.bf16 %v769_v53 }
  0x12   : > { %v458_v7 = vunpack.c.l.bf16 %v456_v4  ;;  %v466_v8 = vld [vmem:[%s905_s10] sm:$0x3]  ;;  %v495_v22 = vld [vmem:[%s428_s23 + $0x2] sm:$0x1]  ;;  %v487_v35 = vunpack.c.l.bf16 %v485_v19  ;;  %v771_v62 = vld [vmem:[%s910_s13 + $0x4] sm:$0x1]  ;;  %v547_v4 = vunpack.c.l.bf16 %v773_v54 }
  0x13   : > { %v484_v9 = vld [vmem:[%s420_s20] sm:$0x1]  ;;  %v468_v11 = vunpack.c.l.bf16 %v466_v8  ;;  %v452_v16 = vmul.f32 %v803_v0, %v448_v6  ;;  %v768_v25 = vld [vmem:[%s905_s10 + $0x2] sm:$0x1]  ;;  %v463_v34 = vmul.f32 %v804_v1, %v459_v17  ;;  %v497_v45 = vunpack.c.l.bf16 %v495_v22 }
  0x14   : > { %v486_v12 = vunpack.c.l.bf16 %v484_v9  ;;  %v494_v13 = vld [vmem:[%s428_s23] sm:$0x1]  ;;  %v462_v18 = vmul.f32 %v804_v1, %v458_v7  ;;  %v772_v27 = vld [vmem:[%s905_s10 + $0x2] sm:$0x3]  ;;  %v525_v41 = vunpack.c.l.bf16 %v768_v25  ;;  %v491_v57 = vmul.f32 %v806_v10, %v487_v35 }
  0x15   : > { %v504_v14 = vld [vmem:[%s420_s20] sm:$0x3]  ;;  %v472_v21 = vmul.f32 %v805_v2, %v468_v11  ;;  %v496_v23 = vunpack.c.l.bf16 %v494_v13  ;;  %v447_v28 = vld [vmem:[%s905_s10 + $0x2] sm:$0x1]  ;;  %v546_v43 = vunpack.c.l.bf16 %v772_v27  ;;  %v501_v63 = vmul.f32 %v807_v20, %v497_v45 }
  0x16   : > { %v506_v24 = vunpack.c.l.bf16 %v504_v14  ;;  %v464_v26 = vadd.f32 %v462_v18, %v452_v16  ;;  %v490_v30 = vmul.f32 %v806_v10, %v486_v12  ;;  %v505_v31 = vld [vmem:[%s420_s20 + $0x2] sm:$0x3]  ;;  %v449_v37 = vunpack.c.l.bf16 %v447_v28  ;;  %v812_v14 = vld [vmem:[%s978_s5] ss:$0 sm:$0xff] }
  0x17   : > { %v764_v29 = vrot.slane %v472_v21, 9  ;;  %v467_v33 = vld [vmem:[%s905_s10 + $0x2] sm:$0x3]  ;;  %v500_v40 = vmul.f32 %v807_v20, %v496_v23  ;;  %v507_v49 = vunpack.c.l.bf16 %v505_v31  ;;  %v529_v60 = vmul.f32 %v809_v42, %v525_v41  ;;  %v813_v18 = vld [vmem:[%s979_s6] ss:$0 sm:$0xff] }
  0x18   : > { %v510_v32 = vmul.f32 %v808_v15, %v506_v24  ;;  %v770_v36 = vld [vmem:[%s910_s13 + $0x2] sm:$0x1]  ;;  %v469_v38 = vunpack.c.l.bf16 %v467_v33  ;;  %v453_v47 = vmul.f32 %v803_v0, %v449_v37  ;;  %v550_v61 = vmul.f32 %v811_v44, %v546_v43 }
  0x19   : > { %v482_v39 = vadd.f32 %v764_v29, %v464_v26  ;;  %v536_v52 = vunpack.c.l.bf16 %v770_v36  ;;  %v511_v58 = vmul.f32 %v808_v15, %v507_v49  ;;  %v537_v7 = vunpack.c.l.bf16 %v771_v62 }
  0x1a   : > { %v473_v48 = vmul.f32 %v805_v2, %v469_v38  ;;  %v766_v51 = vrot.slane %v510_v32, 9  ;;  %v465_v55 = vadd.f32 %v463_v34, %v453_v47  ;;  %v774_v9 = vrot.slane %v550_v61, 9 }
  0x1b   : > { %v492_v50 = vadd.f32 %v490_v30, %v482_v39  ;;  %v540_v2 = vmul.f32 %v810_v46, %v536_v52  ;;  %v767_v6 = vrot.slane %v511_v58, 9  ;;  %v530_v12 = vmul.f32 %v809_v42, %v526_v3 }
  0x1c   : > { %v765_v56 = vrot.slane %v473_v48, 9  ;;  %v551_v10 = vmul.f32 %v811_v44, %v547_v4  ;;  %v541_v16 = vmul.f32 %v810_v46, %v537_v7 }
  0x1d   : > { %v502_v59 = vadd.f32 %v500_v40, %v492_v50 }
  0x1e   : > { %v483_v1 = vadd.f32 %v765_v56, %v465_v55  ;;  %v775_v20 = vrot.slane %v551_v10, 9 }
  0x1f   : > { %v520_v0 = vadd.f32 %v766_v51, %v502_v59 }
  0x20   : > { %v493_v5 = vadd.f32 %v491_v57, %v483_v1 }
  0x21   : > { %v531_v8 = vadd.f32 %v529_v60, %v520_v0 }
  0x22   : > { %v503_v11 = vadd.f32 %v501_v63, %v493_v5 }
  0x23   : > { %v542_v13 = vadd.f32 %v540_v2, %v531_v8 }
  0x24   : > { %v521_v15 = vadd.f32 %v767_v6, %v503_v11 }
  0x25   : > { %v560_v17 = vadd.f32 %v774_v9, %v542_v13 }
  0x26   : > { %v532_v19 = vadd.f32 %v530_v12, %v521_v15 }
  0x27   : > { %v566_v21 = vmul.f32 %v812_v14, %v560_v17 }
  0x28   : > { %v543_v22 = vadd.f32 %v541_v16, %v532_v19 }
  0x29   : > { %v572_v23 = vadd.f32 %v813_v18, %v566_v21 }
  0x2a   : > { %v561_v24 = vadd.f32 %v775_v20, %v543_v22 }
  0x2b   : > { %v574_v25 = vmax.f32 %v572_v23, 0.0 }
  0x2c   : > { %v567_v26 = vmul.f32 %v812_v14, %v561_v24 }
  0x2d   : > { %v576_v27 = vpack.c.bf16 %v574_v25, %v574_v25 }
  0x2e   : > { %v573_v28 = vadd.f32 %v813_v18, %v567_v26 }
  0x2f   : > { %578 = vst [vmem:[%s445_s29] sm:$0x1] %v576_v27 }
  0x30   : > { %v575_v29 = vmax.f32 %v573_v28, 0.0 }
  0x32   : > { %v577_v30 = vpack.c.bf16 %v575_v29, %v575_v29 }
  0x34   : > { %579 = vst [vmem:[%s445_s29 + $0x1] sm:$0x1] %v577_v30 }
  0x35 PF: > { %s17_s26 = sadd.s32 1, %s836_s26   ;;  %s981_s24 = smov %s832_s25 }
  0x36   : > { %p14_p5 = scmp.ge.s32.totalorder %s17_s26, 4   ;;  %s982_s25 = smov %s984_s27 }
  0x38   :  { %16 = sbr.rel (!%p14_p5) target bundleno = 2 (0x2), region = 98 }

// kernel: mobilenet_v3_forward.24
= control target key start
LH: loop header
LB: loop body
LE: loop exit
PB: predicated region body
PF: predicated region fallthrough
CT: control target
= control target key end

     0   :  { %s517_s15 = smov 0   ;;  %s519_s16 = smov 0   ;;  %s580_s0 = inlined_call_operand.vmem [shape: bf16[2,8,128], index: 0, kind: input, shape index: {}]   ;;  %s581_s1 = inlined_call_operand.vmem [shape: bf16[128,128], index: 1, kind: input, shape index: {}]   ;;  %s582_s2 = inlined_call_operand.vmem [shape: f32[1,128], index: 2, kind: input, shape index: {}]   ;;  %s583_s3 = inlined_call_operand.vmem [shape: f32[1,128], index: 3, kind: input, shape index: {}]   ;;  %s584_s4 = inlined_call_operand.vmem [shape: bf16[2,8,128], index: 4, kind: output, shape index: {}]  }
   0x1   :  { %s521_s17 = smov 0  }
   0x2 LB: > { %s26_s18 = sadd.s32 1, %s486_s16  ;;  %p397_p0 = scmp.ge.s32.totalorder %s490_s17, 1  ;;  %s490_s17 = sphi %s521_s17, %s14_s17   ;;  %s486_s16 = sphi %s519_s16, %s586_s16   ;;  %s482_s15 = sphi %s517_s15, %s585_s15  }
   0x3   : > { %p28_p1 = scmp.ge.s32.totalorder %s26_s18, 2  ;;  %p180_p2 = scmp.lt.s32.totalorder %s490_s17, 3 }
   0x5   : > { %s588_s18 = smov (%p28_p1, %s26_s18), 0  ;;  %p181_p3 = pnand %p397_p0, %p180_p2 }
   0x6   : > { %p210_p4 = scmp.lt.s32.totalorder (!%p181_p3), %s482_s15, 1 }
   0x7   : > { %184 = sbr.rel (%p181_p3) target bundleno = 187 (0xbb), region = 36 }
   0xc   : > { %v441_v0 = vld [vmem:[%s581_s1 + $0x38] sm:$0xff]  ;;  %v440_v1 = vld [vmem:[%s581_s1 + $0x30] sm:$0xff]  ;;  %v439_v2 = vld [vmem:[%s581_s1 + $0x28] sm:$0xff]  ;;  %s590_s15 = smov (!%p210_p4, %s482_s15), 1 }
   0xd   : > { %289 = vmatpush.bf16.msra.mxu0 %v441_v0  ;;  %v438_v3 = vld [vmem:[%s581_s1 + $0x20] sm:$0xff]  ;;  %v437_v4 = vld [vmem:[%s581_s1 + $0x18] sm:$0xff]  ;;  %v436_v5 = vld [vmem:[%s581_s1 + $0x10] sm:$0xff]  ;;  %s398_s7 = sshll.u32 %s590_s15, 2 }
   0xe   : > { %v435_v6 = vld [vmem:[%s581_s1 + $0x8] sm:$0xff]  ;;  %v434_v7 = vld [vmem:[%s581_s1] sm:$0xff]  ;;  %s216_s12 = scalar_lea.vmem %s580_s0, %s398_s7  ;;  %s223_s22 = scalar_lea.vmem %s584_s4, %s398_s7 }
   0xf   : > { %v224_v8 = vld [vmem:[%s216_s12] sm:$0xf] }
  0x10   : > { %v466_v9 = vld [vmem:[%s582_s2] ss:$0 sm:$0xff] }
  0x11   : > { %290 = vmatpush.bf16.msra.mxu0 %v440_v1  ;;  %v467_v10 = vld [vmem:[%s583_s3] ss:$0 sm:$0xff] }
  0x15   : > { %291 = vmatpush.bf16.msra.mxu0 %v439_v2 }
  0x19   : > { %292 = vmatpush.bf16.msra.mxu0 %v438_v3 }
  0x1d   : > { %293 = vmatpush.bf16.msra.mxu0 %v437_v4 }
  0x21   : > { %294 = vmatpush.bf16.msra.mxu0 %v436_v5 }
  0x25   : > { %295 = vmatpush.bf16.msra.mxu0 %v435_v6 }
  0x29   : > { %296 = vmatpush.bf16.msra.mxu0 %v434_v7 }
  0x2c   : > { %297 = vmatmul.bf16.vlgmr.msra.gmra.mxu0 %v224_v8 }
  0xa9   : > { %v298_v11 = vpop.f32.mrf.mxu0 }
  0xaa   : > { %v306_v12 = vmul.f32 %v466_v9, %v298_v11 }
  0xac   : > { %v311_v13 = vadd.f32 %v467_v10, %v306_v12 }
  0xae   : > { %v312_v14 = vadd.f32 3.0, %v311_v13 }
  0xb0   : > { %v313_v15 = vmax.f32 %v312_v14, 0.0 }
  0xb1   : > { %v300_v16 = vpop.f32.mrf.mxu0 }
  0xb2   : > { %v314_v17 = vmin.f32 %v313_v15, 6.0 }
  0xb4   : > { %v315_v18 = vmul.f32 %v314_v17, %v311_v13 }
  0xb6   : > { %v316_v19 = vmul.f32 0.16666667, %v315_v18 }
  0xb8   : > { %v317_v20 = vpack.c.bf16 %v316_v19, %v316_v19 }
  0xba   : > { %318 = vst [vmem:[%s223_s22] sm:$0xf] %v317_v20 }
  0xbb PF: > { %s14_s17 = sadd.s32 1, %s490_s17   ;;  %s585_s15 = smov %s486_s16 }
  0xbc   : > { %p11_p5 = scmp.ge.s32.totalorder %s14_s17, 4   ;;  %s586_s16 = smov %s588_s18 }
  0xbe   :  { %13 = sbr.rel (!%p11_p5) target bundleno = 2 (0x2), region = 66 }

// kernel: mobilenet_v3_forward.23
= control target key start
LH: loop header
LB: loop body
LE: loop exit
PB: predicated region body
PF: predicated region fallthrough
CT: control target
= control target key end

     0   :  { %s512_s15 = smov 0   ;;  %s514_s16 = smov 0   ;;  %s575_s0 = inlined_call_operand.vmem [shape: bf16[2,8,128], index: 0, kind: input, shape index: {}]   ;;  %s576_s1 = inlined_call_operand.vmem [shape: bf16[128,128], index: 1, kind: input, shape index: {}]   ;;  %s577_s2 = inlined_call_operand.vmem [shape: f32[1,128], index: 2, kind: input, shape index: {}]   ;;  %s578_s3 = inlined_call_operand.vmem [shape: f32[1,128], index: 3, kind: input, shape index: {}]   ;;  %s579_s4 = inlined_call_operand.vmem [shape: bf16[2,8,128], index: 4, kind: output, shape index: {}]  }
   0x1   :  { %s516_s17 = smov 0  }
   0x2 LB: > { %s26_s18 = sadd.s32 1, %s481_s16  ;;  %p392_p0 = scmp.ge.s32.totalorder %s485_s17, 1  ;;  %s485_s17 = sphi %s516_s17, %s14_s17   ;;  %s481_s16 = sphi %s514_s16, %s581_s16   ;;  %s477_s15 = sphi %s512_s15, %s580_s15  }
   0x3   : > { %p28_p1 = scmp.ge.s32.totalorder %s26_s18, 2  ;;  %p180_p2 = scmp.lt.s32.totalorder %s485_s17, 3 }
   0x5   : > { %s583_s18 = smov (%p28_p1, %s26_s18), 0  ;;  %p181_p3 = pnand %p392_p0, %p180_p2 }
   0x6   : > { %p210_p4 = scmp.lt.s32.totalorder (!%p181_p3), %s477_s15, 1 }
   0x7   : > { %184 = sbr.rel (%p181_p3) target bundleno = 178 (0xb2), region = 36 }
   0xc   : > { %v436_v0 = vld [vmem:[%s576_s1 + $0x38] sm:$0xff]  ;;  %v435_v1 = vld [vmem:[%s576_s1 + $0x30] sm:$0xff]  ;;  %v434_v2 = vld [vmem:[%s576_s1 + $0x28] sm:$0xff]  ;;  %s585_s15 = smov (!%p210_p4, %s477_s15), 1 }
   0xd   : > { %289 = vmatpush.bf16.msra.mxu0 %v436_v0  ;;  %v433_v3 = vld [vmem:[%s576_s1 + $0x20] sm:$0xff]  ;;  %v432_v4 = vld [vmem:[%s576_s1 + $0x18] sm:$0xff]  ;;  %v431_v5 = vld [vmem:[%s576_s1 + $0x10] sm:$0xff]  ;;  %s393_s7 = sshll.u32 %s585_s15, 2 }
   0xe   : > { %v430_v6 = vld [vmem:[%s576_s1 + $0x8] sm:$0xff]  ;;  %v429_v7 = vld [vmem:[%s576_s1] sm:$0xff]  ;;  %s216_s12 = scalar_lea.vmem %s575_s0, %s393_s7  ;;  %s223_s22 = scalar_lea.vmem %s579_s4, %s393_s7 }
   0xf   : > { %v224_v8 = vld [vmem:[%s216_s12] sm:$0xf] }
  0x10   : > { %v461_v9 = vld [vmem:[%s577_s2] ss:$0 sm:$0xff] }
  0x11   : > { %290 = vmatpush.bf16.msra.mxu0 %v435_v1  ;;  %v462_v10 = vld [vmem:[%s578_s3] ss:$0 sm:$0xff] }
  0x15   : > { %291 = vmatpush.bf16.msra.mxu0 %v434_v2 }
  0x19   : > { %292 = vmatpush.bf16.msra.mxu0 %v433_v3 }
  0x1d   : > { %293 = vmatpush.bf16.msra.mxu0 %v432_v4 }
  0x21   : > { %294 = vmatpush.bf16.msra.mxu0 %v431_v5 }
  0x25   : > { %295 = vmatpush.bf16.msra.mxu0 %v430_v6 }
  0x29   : > { %296 = vmatpush.bf16.msra.mxu0 %v429_v7 }
  0x2c   : > { %297 = vmatmul.bf16.vlgmr.msra.gmra.mxu0 %v224_v8 }
  0xa9   : > { %v298_v11 = vpop.f32.mrf.mxu0 }
  0xaa   : > { %v306_v12 = vmul.f32 %v461_v9, %v298_v11 }
  0xac   : > { %v311_v13 = vadd.f32 %v462_v10, %v306_v12 }
  0xae   : > { %v312_v14 = vpack.c.bf16 %v311_v13, %v311_v13 }
  0xb0   : > { %313 = vst [vmem:[%s223_s22] sm:$0xf] %v312_v14 }
  0xb1   : > { %v300_v15 = vpop.f32.mrf.mxu0 }
  0xb2 PF: > { %s14_s17 = sadd.s32 1, %s485_s17   ;;  %s580_s15 = smov %s481_s16 }
  0xb3   : > { %p11_p5 = scmp.ge.s32.totalorder %s14_s17, 4   ;;  %s581_s16 = smov %s583_s18 }
  0xb5   :  { %13 = sbr.rel (!%p11_p5) target bundleno = 2 (0x2), region = 66 }

// kernel: mobilenet_v3_forward.25
= control target key start
LH: loop header
LB: loop body
LE: loop exit
PB: predicated region body
PF: predicated region fallthrough
CT: control target
= control target key end

     0   :  { %s942_s15 = smov 0   ;;  %s944_s16 = smov 0   ;;  %s1112_s0 = inlined_call_operand.vmem [shape: bf16[2,6,6,128], index: 0, kind: input, shape index: {}]   ;;  %s1113_s1 = inlined_call_operand.vmem [shape: f32[25,128], index: 1, kind: input, shape index: {}]   ;;  %s1114_s2 = inlined_call_operand.vmem [shape: f32[1,128], index: 2, kind: input, shape index: {}]   ;;  %s1115_s3 = inlined_call_operand.vmem [shape: f32[1,128], index: 3, kind: input, shape index: {}]   ;;  %s1116_s4 = inlined_call_operand.vmem [shape: bf16[2,2,2,128], index: 4, kind: output, shape index: {}]  }
   0x1   :  { %s946_s17 = smov 0  }
   0x2 LB: > { %s26_s18 = sadd.s32 1, %s911_s16  ;;  %p796_p0 = scmp.ge.s32.totalorder %s915_s17, 1  ;;  %s915_s17 = sphi %s946_s17, %s14_s17   ;;  %s911_s16 = sphi %s944_s16, %s1118_s16   ;;  %s907_s15 = sphi %s942_s15, %s1117_s15  }
   0x3   : > { %p28_p1 = scmp.ge.s32.totalorder %s26_s18, 2  ;;  %p206_p2 = scmp.lt.s32.totalorder %s915_s17, 3 }
   0x5   : > { %s1120_s18 = smov (%p28_p1, %s26_s18), 0  ;;  %p207_p3 = pnand %p796_p0, %p206_p2 }
   0x6   : > { %p247_p4 = scmp.lt.s32.totalorder (!%p207_p3), %s907_s15, 1 }
   0x7   : > { %210 = sbr.rel (%p207_p3) target bundleno = 90 (0x5a), region = 36 }
   0xc   : > { %s1122_s15 = smov (!%p247_p4, %s907_s15), 1  ;;  %v866_v0 = vld [vmem:[%s1113_s1] ss:$0 sm:$0xff]  ;;  %v867_v1 = vld [vmem:[%s1113_s1 + $0x1] ss:$0 sm:$0xff] }
   0xd   : > { %s841_s19 = smul.u32 24, %s1122_s15  ;;  %v868_v2 = vld [vmem:[%s1113_s1 + $0x2] ss:$0 sm:$0xff]  ;;  %v869_v3 = vld [vmem:[%s1113_s1 + $0x3] ss:$0 sm:$0xff]  ;;  %s798_s8 = sshll.u32 %s1122_s15, 1 }
   0xe   : > { %v870_v24 = vld [vmem:[%s1113_s1 + $0x4] ss:$0 sm:$0xff]  ;;  %v871_v29 = vld [vmem:[%s1113_s1 + $0x5] ss:$0 sm:$0xff]  ;;  %v872_v36 = vld [vmem:[%s1113_s1 + $0x6] ss:$0 sm:$0xff]  ;;  %s271_s11 = scalar_lea.vmem %s1116_s4, %s798_s8 }
   0xf   : > { %s972_s26 = scalar_lea.vmem %s1112_s0, %s841_s19  ;;  %v873_v48 = vld [vmem:[%s1113_s1 + $0x7] ss:$0 sm:$0xff] }
  0x10   : > { %v272_v4 = vld [vmem:[%s972_s26] sm:$0x1]  ;;  %v273_v5 = vld [vmem:[%s972_s26 + $0x4] sm:$0x1]  ;;  %v298_v11 = vld [vmem:[%s972_s26] sm:$0x2] }
  0x11   : > { %v282_v6 = vld [vmem:[%s972_s26] sm:$0x3]  ;;  %v274_v7 = vunpack.c.l.bf16 %v272_v4  ;;  %v275_v8 = vunpack.c.l.bf16 %v273_v5  ;;  %v283_v9 = vld [vmem:[%s972_s26 + $0x4] sm:$0x3]  ;;  %v300_v14 = vunpack.c.l.bf16 %v298_v11  ;;  %v330_v18 = vld [vmem:[%s972_s26] sm:$0x4] }
  0x12   : > { %v284_v10 = vunpack.c.l.bf16 %v282_v6  ;;  %v299_v12 = vld [vmem:[%s972_s26 + $0x4] sm:$0x2]  ;;  %v285_v13 = vunpack.c.l.bf16 %v283_v9  ;;  %v314_v16 = vld [vmem:[%s972_s26] sm:$0x6]  ;;  %v331_v23 = vld [vmem:[%s972_s26 + $0x4] sm:$0x4]  ;;  %v332_v32 = vunpack.c.l.bf16 %v330_v18 }
  0x13   : > { %v301_v15 = vunpack.c.l.bf16 %v299_v12  ;;  %v315_v17 = vld [vmem:[%s972_s26 + $0x4] sm:$0x6]  ;;  %v278_v19 = vmul.f32 %v866_v0, %v274_v7  ;;  %v279_v20 = vmul.f32 %v866_v0, %v275_v8  ;;  %v316_v22 = vunpack.c.l.bf16 %v314_v16  ;;  %v799_v34 = vld [vmem:[%s972_s26 + $0x4] sm:$0x1]  ;;  %v800_v35 = vld [vmem:[%s972_s26 + $0x8] sm:$0x1] }
  0x14   : > { %v288_v21 = vmul.f32 %v867_v1, %v284_v10  ;;  %v289_v25 = vmul.f32 %v867_v1, %v285_v13  ;;  %v304_v26 = vmul.f32 %v868_v2, %v300_v14  ;;  %v317_v28 = vunpack.c.l.bf16 %v315_v17  ;;  %v801_v41 = vld [vmem:[%s972_s26 + $0x4] sm:$0x3]  ;;  %v802_v46 = vld [vmem:[%s972_s26 + $0x8] sm:$0x3]  ;;  %v807_v5 = vld [vmem:[%s972_s26 + $0x4] sm:$0x4] }
  0x15   : > { %v305_v27 = vmul.f32 %v868_v2, %v301_v15  ;;  %v320_v31 = vmul.f32 %v869_v3, %v316_v22  ;;  %v333_v33 = vunpack.c.l.bf16 %v331_v23  ;;  %v336_v44 = vmul.f32 %v870_v24, %v332_v32  ;;  %v803_v47 = vld [vmem:[%s972_s26 + $0x4] sm:$0x2]  ;;  %v804_v53 = vld [vmem:[%s972_s26 + $0x8] sm:$0x2]  ;;  %v874_v0 = vld [vmem:[%s1113_s1 + $0x8] ss:$0 sm:$0xff] }
  0x16   : > { %v292_v30 = vrot.slane %v288_v21, 1  ;;  %v293_v37 = vrot.slane %v289_v25, 1  ;;  %v308_v38 = vrot.slane %v304_v26, 2  ;;  %v321_v40 = vmul.f32 %v869_v3, %v317_v28  ;;  %v805_v58 = vld [vmem:[%s972_s26 + $0x4] sm:$0x6] }
  0x17   : > { %v309_v39 = vrot.slane %v305_v27, 2  ;;  %v324_v43 = vrot.slane %v320_v31, 3  ;;  %v337_v45 = vmul.f32 %v870_v24, %v333_v33  ;;  %v349_v51 = vunpack.c.l.bf16 %v799_v34  ;;  %v806_v59 = vld [vmem:[%s972_s26 + $0x8] sm:$0x6]  ;;  %v809_v16 = vld [vmem:[%s972_s26 + $0x8] sm:$0x1] }
  0x18   : > { %v296_v42 = vadd.f32 %v292_v30, %v278_v19  ;;  %v297_v49 = vadd.f32 %v293_v37, %v279_v20  ;;  %v325_v50 = vrot.slane %v321_v40, 3  ;;  %v350_v52 = vunpack.c.l.bf16 %v800_v35  ;;  %v808_v10 = vld [vmem:[%s972_s26 + $0x8] sm:$0x4]  ;;  %v875_v11 = vld [vmem:[%s1113_s1 + $0x9] ss:$0 sm:$0xff] }
  0x19   : > { %v340_v55 = vrot.slane %v336_v44, 4  ;;  %v341_v56 = vrot.slane %v337_v45, 4  ;;  %v359_v57 = vunpack.c.l.bf16 %v801_v41  ;;  %v353_v61 = vmul.f32 %v871_v29, %v349_v51  ;;  %v810_v17 = vld [vmem:[%s972_s26 + $0xc] sm:$0x1]  ;;  %v876_v22 = vld [vmem:[%s1113_s1 + $0xa] ss:$0 sm:$0xff] }
  0x1a   : > { %v312_v54 = vadd.f32 %v308_v38, %v296_v42  ;;  %v313_v60 = vadd.f32 %v309_v39, %v297_v49  ;;  %v354_v62 = vmul.f32 %v871_v29, %v350_v52  ;;  %v360_v63 = vunpack.c.l.bf16 %v802_v46  ;;  %v811_v27 = vld [vmem:[%s972_s26 + $0x8] sm:$0x3]  ;;  %v812_v28 = vld [vmem:[%s972_s26 + $0xc] sm:$0x3]  ;;  %v877_v33 = vld [vmem:[%s1113_s1 + $0xb] ss:$0 sm:$0xff] }
  0x1b   : > { %v363_v2 = vmul.f32 %v872_v36, %v359_v57  ;;  %v375_v3 = vunpack.c.l.bf16 %v803_v47  ;;  %v376_v4 = vunpack.c.l.bf16 %v804_v53  ;;  %v391_v8 = vunpack.c.l.bf16 %v805_v58  ;;  %v813_v38 = vld [vmem:[%s972_s26 + $0x8] sm:$0x2]  ;;  %v814_v39 = vld [vmem:[%s972_s26 + $0xc] sm:$0x2]  ;;  %v878_v40 = vld [vmem:[%s1113_s1 + $0xc] ss:$0 sm:$0xff] }
  0x1c   : > { %v328_v1 = vadd.f32 %v324_v43, %v312_v54  ;;  %v329_v6 = vadd.f32 %v325_v50, %v313_v60  ;;  %v364_v7 = vmul.f32 %v872_v36, %v360_v63  ;;  %v392_v9 = vunpack.c.l.bf16 %v806_v59  ;;  %v815_v45 = vld [vmem:[%s972_s26 + $0x8] sm:$0x6]  ;;  %v816_v46 = vld [vmem:[%s972_s26 + $0xc] sm:$0x6] }
  0x1d   : > { %v367_v13 = vrot.slane %v363_v2, 1  ;;  %v379_v14 = vmul.f32 %v873_v48, %v375_v3  ;;  %v380_v15 = vmul.f32 %v873_v48, %v376_v4  ;;  %v395_v20 = vmul.f32 %v874_v0, %v391_v8  ;;  %v879_v51 = vld [vmem:[%s1113_s1 + $0xd] ss:$0 sm:$0xff]  ;;  %v817_v60 = vld [vmem:[%s972_s26 + $0x8] sm:$0x4] }
  0x1e   : > { %v344_v12 = vadd.f32 %v340_v55, %v328_v1  ;;  %v345_v18 = vadd.f32 %v341_v56, %v329_v6  ;;  %v368_v19 = vrot.slane %v364_v7, 1  ;;  %v396_v21 = vmul.f32 %v874_v0, %v392_v9  ;;  %v880_v2 = vld [vmem:[%s1113_s1 + $0xe] ss:$0 sm:$0xff]  ;;  %v819_v7 = vld [vmem:[%s972_s26 + $0xc] sm:$0x1] }
  0x1f   : > { %v383_v24 = vrot.slane %v379_v14, 2  ;;  %v384_v25 = vrot.slane %v380_v15, 2  ;;  %v407_v26 = vunpack.c.l.bf16 %v807_v5  ;;  %v399_v30 = vrot.slane %v395_v20, 3  ;;  %v820_v8 = vld [vmem:[%s972_s26 + $0x10] sm:$0x1] }
  0x20   : > { %v355_v23 = vadd.f32 %v353_v61, %v344_v12  ;;  %v356_v29 = vadd.f32 %v354_v62, %v345_v18  ;;  %v400_v31 = vrot.slane %v396_v21, 3  ;;  %v408_v32 = vunpack.c.l.bf16 %v808_v10  ;;  %v818_v61 = vld [vmem:[%s972_s26 + $0xc] sm:$0x4]  ;;  %v821_v14 = vld [vmem:[%s972_s26 + $0xc] sm:$0x3] }
  0x21   : > { %v411_v35 = vmul.f32 %v875_v11, %v407_v26  ;;  %v424_v36 = vunpack.c.l.bf16 %v809_v16  ;;  %v425_v37 = vunpack.c.l.bf16 %v810_v17  ;;  %v434_v43 = vunpack.c.l.bf16 %v811_v27  ;;  %v822_v18 = vld [vmem:[%s972_s26 + $0x10] sm:$0x3] }
  0x22   : > { %v371_v34 = vadd.f32 %v367_v13, %v355_v23  ;;  %v372_v41 = vadd.f32 %v368_v19, %v356_v29  ;;  %v412_v42 = vmul.f32 %v875_v11, %v408_v32  ;;  %v435_v44 = vunpack.c.l.bf16 %v812_v28  ;;  %v881_v13 = vld [vmem:[%s1113_s1 + $0xf] ss:$0 sm:$0xff]  ;;  %v882_v19 = vld [vmem:[%s1113_s1 + $0x10] ss:$0 sm:$0xff]  ;;  %v824_v29 = vld [vmem:[%s972_s26 + $0x10] sm:$0x2] }
  0x23   : > { %v415_v48 = vrot.slane %v411_v35, 4  ;;  %v428_v49 = vmul.f32 %v876_v22, %v424_v36  ;;  %v429_v50 = vmul.f32 %v876_v22, %v425_v37  ;;  %v438_v54 = vmul.f32 %v877_v33, %v434_v43  ;;  %v826_v36 = vld [vmem:[%s972_s26 + $0x10] sm:$0x6] }
  0x24   : > { %v387_v47 = vadd.f32 %v383_v24, %v371_v34  ;;  %v388_v52 = vadd.f32 %v384_v25, %v372_v41  ;;  %v416_v53 = vrot.slane %v412_v42, 4  ;;  %v439_v55 = vmul.f32 %v877_v33, %v435_v44  ;;  %v823_v24 = vld [vmem:[%s972_s26 + $0xc] sm:$0x2]  ;;  %v884_v41 = vld [vmem:[%s1113_s1 + $0x12] ss:$0 sm:$0xff] }
  0x25   : > { %v450_v57 = vunpack.c.l.bf16 %v813_v38  ;;  %v451_v58 = vunpack.c.l.bf16 %v814_v39  ;;  %v466_v59 = vunpack.c.l.bf16 %v815_v45  ;;  %v442_v63 = vrot.slane %v438_v54, 1 }
  0x26   : > { %v403_v56 = vadd.f32 %v399_v30, %v387_v47  ;;  %v404_v62 = vadd.f32 %v400_v31, %v388_v52  ;;  %v443_v0 = vrot.slane %v439_v55, 1  ;;  %v467_v1 = vunpack.c.l.bf16 %v816_v46  ;;  %v883_v30 = vld [vmem:[%s1113_s1 + $0x11] ss:$0 sm:$0xff]  ;;  %v825_v31 = vld [vmem:[%s972_s26 + $0xc] sm:$0x6] }
  0x27   : > { %v454_v4 = vmul.f32 %v878_v40, %v450_v57  ;;  %v455_v5 = vmul.f32 %v878_v40, %v451_v58  ;;  %v470_v6 = vmul.f32 %v879_v51, %v466_v59  ;;  %v482_v11 = vunpack.c.l.bf16 %v817_v60  ;;  %v827_v46 = vld [vmem:[%s972_s26 + $0xc] sm:$0x4]  ;;  %v885_v52 = vld [vmem:[%s1113_s1 + $0x13] ss:$0 sm:$0xff]  ;;  %v829_v57 = vld [vmem:[%s972_s26 + $0x10] sm:$0x1] }
  0x28   : > { %v419_v3 = vadd.f32 %v415_v48, %v403_v56  ;;  %v420_v9 = vadd.f32 %v416_v53, %v404_v62  ;;  %v471_v10 = vmul.f32 %v879_v51, %v467_v1  ;;  %v483_v12 = vunpack.c.l.bf16 %v818_v61  ;;  %v828_v51 = vld [vmem:[%s972_s26 + $0x10] sm:$0x4]  ;;  %v830_v62 = vld [vmem:[%s972_s26 + $0x14] sm:$0x1] }
  0x29   : > { %v458_v16 = vrot.slane %v454_v4, 2  ;;  %v459_v17 = vrot.slane %v455_v5, 2  ;;  %v474_v21 = vrot.slane %v470_v6, 3  ;;  %v486_v22 = vmul.f32 %v880_v2, %v482_v11 }
  0x2a   : > { %v430_v15 = vadd.f32 %v428_v49, %v419_v3  ;;  %v431_v20 = vadd.f32 %v429_v50, %v420_v9  ;;  %v487_v23 = vmul.f32 %v880_v2, %v483_v12  ;;  %v499_v26 = vunpack.c.l.bf16 %v819_v7  ;;  %v832_v3 = vld [vmem:[%s972_s26 + $0x14] sm:$0x3] }
  0x2b   : > { %v500_v27 = vunpack.c.l.bf16 %v820_v8  ;;  %v509_v28 = vunpack.c.l.bf16 %v821_v14  ;;  %v475_v33 = vrot.slane %v471_v10, 3  ;;  %v490_v34 = vrot.slane %v486_v22, 4  ;;  %v886_v8 = vld [vmem:[%s1113_s1 + $0x14] ss:$0 sm:$0xff]  ;;  %v887_v9 = vld [vmem:[%s1113_s1 + $0x15] ss:$0 sm:$0xff] }
  0x2c   : > { %v446_v25 = vadd.f32 %v442_v63, %v430_v15  ;;  %v447_v32 = vadd.f32 %v443_v0, %v431_v20  ;;  %v510_v35 = vunpack.c.l.bf16 %v822_v18  ;;  %v491_v38 = vrot.slane %v487_v23, 4  ;;  %v831_v63 = vld [vmem:[%s972_s26 + $0x10] sm:$0x3]  ;;  %v834_v15 = vld [vmem:[%s972_s26 + $0x14] sm:$0x2] }
  0x2d   : > { %v503_v39 = vmul.f32 %v881_v13, %v499_v26  ;;  %v513_v40 = vmul.f32 %v882_v19, %v509_v28  ;;  %v525_v44 = vunpack.c.l.bf16 %v823_v24  ;;  %v526_v45 = vunpack.c.l.bf16 %v824_v29  ;;  %v833_v14 = vld [vmem:[%s972_s26 + $0x10] sm:$0x2]  ;;  %v888_v20 = vld [vmem:[%s1113_s1 + $0x16] ss:$0 sm:$0xff] }
  0x2e   : > { %v462_v37 = vadd.f32 %v458_v16, %v446_v25  ;;  %v463_v42 = vadd.f32 %v459_v17, %v447_v32  ;;  %v514_v43 = vmul.f32 %v882_v19, %v510_v35  ;;  %v504_v48 = vmul.f32 %v881_v13, %v500_v27  ;;  %v836_v22 = vld [vmem:[%s972_s26 + $0x14] sm:$0x6] }
  0x2f   : > { %v541_v49 = vunpack.c.l.bf16 %v825_v31  ;;  %v542_v50 = vunpack.c.l.bf16 %v826_v36  ;;  %v517_v54 = vrot.slane %v513_v40, 1  ;;  %v529_v55 = vmul.f32 %v883_v30, %v525_v44  ;;  %v889_v31 = vld [vmem:[%s1113_s1 + $0x17] ss:$0 sm:$0xff]  ;;  %v837_v36 = vld [vmem:[%s972_s26 + $0x10] sm:$0x4] }
  0x30   : > { %v478_v47 = vadd.f32 %v474_v21, %v462_v37  ;;  %v479_v53 = vadd.f32 %v475_v33, %v463_v42  ;;  %v530_v56 = vmul.f32 %v883_v30, %v526_v45  ;;  %v557_v61 = vunpack.c.l.bf16 %v827_v46  ;;  %v835_v21 = vld [vmem:[%s972_s26 + $0x10] sm:$0x6]  ;;  %v838_v37 = vld [vmem:[%s972_s26 + $0x14] sm:$0x4] }
  0x31   : > { %v545_v59 = vmul.f32 %v884_v41, %v541_v49  ;;  %v546_v60 = vmul.f32 %v884_v41, %v542_v50  ;;  %v518_v1 = vrot.slane %v514_v43, 1  ;;  %v558_v2 = vunpack.c.l.bf16 %v828_v51  ;;  %v890_v41 = vld [vmem:[%s1113_s1 + $0x18] ss:$0 sm:$0xff] }
  0x32   : > { %v494_v58 = vadd.f32 %v490_v34, %v478_v47  ;;  %v495_v0 = vadd.f32 %v491_v38, %v479_v53  ;;  %v533_v5 = vrot.slane %v529_v55, 2  ;;  %v534_v6 = vrot.slane %v530_v56, 2 }
  0x33   : > { %v561_v7 = vmul.f32 %v885_v52, %v557_v61  ;;  %v549_v11 = vrot.slane %v545_v59, 3  ;;  %v550_v12 = vrot.slane %v546_v60, 3  ;;  %v562_v13 = vmul.f32 %v885_v52, %v558_v2 }
  0x34   : > { %v505_v4 = vadd.f32 %v503_v39, %v494_v58  ;;  %v506_v10 = vadd.f32 %v504_v48, %v495_v0  ;;  %v574_v17 = vunpack.c.l.bf16 %v829_v57  ;;  %v584_v18 = vunpack.c.l.bf16 %v831_v63 }
  0x35   : > { %v585_v19 = vunpack.c.l.bf16 %v832_v3  ;;  %v565_v24 = vrot.slane %v561_v7, 4  ;;  %v566_v25 = vrot.slane %v562_v13, 4  ;;  %v575_v26 = vunpack.c.l.bf16 %v830_v62  ;;  %v892_v7 = vld [vmem:[%s1115_s3] ss:$0 sm:$0xff] }
  0x36   : > { %v521_v16 = vadd.f32 %v517_v54, %v505_v4  ;;  %v522_v23 = vadd.f32 %v518_v1, %v506_v10  ;;  %v588_v28 = vmul.f32 %v887_v9, %v584_v18  ;;  %v600_v30 = vunpack.c.l.bf16 %v833_v14  ;;  %v891_v4 = vld [vmem:[%s1114_s2] ss:$0 sm:$0xff] }
  0x37   : > { %v589_v29 = vmul.f32 %v887_v9, %v585_v19  ;;  %v601_v33 = vunpack.c.l.bf16 %v834_v15  ;;  %v616_v34 = vunpack.c.l.bf16 %v835_v21  ;;  %v617_v35 = vunpack.c.l.bf16 %v836_v22 }
  0x38   : > { %v537_v27 = vadd.f32 %v533_v5, %v521_v16  ;;  %v538_v32 = vadd.f32 %v534_v6, %v522_v23  ;;  %v578_v39 = vmul.f32 %v886_v8, %v574_v17  ;;  %v604_v40 = vmul.f32 %v888_v20, %v600_v30 }
  0x39   : > { %v579_v43 = vmul.f32 %v886_v8, %v575_v26  ;;  %v592_v44 = vrot.slane %v588_v28, 1  ;;  %v605_v45 = vmul.f32 %v888_v20, %v601_v33  ;;  %v620_v47 = vmul.f32 %v889_v31, %v616_v34 }
  0x3a   : > { %v553_v38 = vadd.f32 %v549_v11, %v537_v27  ;;  %v554_v42 = vadd.f32 %v550_v12, %v538_v32  ;;  %v632_v48 = vunpack.c.l.bf16 %v837_v36  ;;  %v633_v49 = vunpack.c.l.bf16 %v838_v37 }
  0x3b   : > { %v593_v51 = vrot.slane %v589_v29, 1  ;;  %v621_v52 = vmul.f32 %v889_v31, %v617_v35  ;;  %v608_v54 = vrot.slane %v604_v40, 2  ;;  %v609_v57 = vrot.slane %v605_v45, 2 }
  0x3c   : > { %v569_v46 = vadd.f32 %v565_v24, %v553_v38  ;;  %v570_v50 = vadd.f32 %v566_v25, %v554_v42  ;;  %v636_v55 = vmul.f32 %v890_v41, %v632_v48  ;;  %v637_v58 = vmul.f32 %v890_v41, %v633_v49 }
  0x3d   : > { %v624_v60 = vrot.slane %v620_v47, 3  ;;  %v625_v62 = vrot.slane %v621_v52, 3 }
  0x3e   : > { %v580_v53 = vadd.f32 %v578_v39, %v569_v46  ;;  %v581_v56 = vadd.f32 %v579_v43, %v570_v50  ;;  %v640_v0 = vrot.slane %v636_v55, 4  ;;  %v641_v2 = vrot.slane %v637_v58, 4 }
  0x40   : > { %v596_v59 = vadd.f32 %v592_v44, %v580_v53  ;;  %v597_v61 = vadd.f32 %v593_v51, %v581_v56 }
  0x42   : > { %v612_v63 = vadd.f32 %v608_v54, %v596_v59  ;;  %v613_v1 = vadd.f32 %v609_v57, %v597_v61 }
  0x44   : > { %v628_v3 = vadd.f32 %v624_v60, %v612_v63  ;;  %v629_v5 = vadd.f32 %v625_v62, %v613_v1 }
  0x46   : > { %v644_v6 = vadd.f32 %v640_v0, %v628_v3  ;;  %v645_v8 = vadd.f32 %v641_v2, %v629_v5 }
  0x48   : > { %v650_v9 = vmul.f32 %v891_v4, %v644_v6  ;;  %v651_v10 = vmul.f32 %v891_v4, %v645_v8 }
  0x4a   : > { %v656_v11 = vadd.f32 %v892_v7, %v650_v9  ;;  %v657_v12 = vadd.f32 %v892_v7, %v651_v10 }
  0x4c   : > { %v658_v13 = vadd.f32 3.0, %v656_v11  ;;  %v659_v14 = vadd.f32 3.0, %v657_v12 }
  0x4e   : > { %v660_v15 = vmax.f32 %v658_v13, 0.0  ;;  %v661_v16 = vmax.f32 %v659_v14, 0.0 }
  0x50   : > { %v662_v17 = vmin.f32 %v660_v15, 6.0  ;;  %v663_v18 = vmin.f32 %v661_v16, 6.0 }
  0x52   : > { %v664_v19 = vmul.f32 %v662_v17, %v656_v11  ;;  %v665_v20 = vmul.f32 %v663_v18, %v657_v12 }
  0x54   : > { %v666_v21 = vmul.f32 0.16666667, %v664_v19  ;;  %v667_v22 = vmul.f32 0.16666667, %v665_v20 }
  0x56   : > { %v668_v23 = vpack.c.bf16 %v666_v21, %v666_v21  ;;  %v669_v24 = vpack.c.bf16 %v667_v22, %v667_v22 }
  0x58   : > { %670 = vst [vmem:[%s271_s11] sm:$0x1] %v668_v23 }
  0x59   : > { %671 = vst [vmem:[%s271_s11 + $0x1] sm:$0x1] %v669_v24 }
  0x5a PF: > { %s14_s17 = sadd.s32 1, %s915_s17   ;;  %s1117_s15 = smov %s911_s16 }
  0x5b   : > { %p11_p5 = scmp.ge.s32.totalorder %s14_s17, 4   ;;  %s1118_s16 = smov %s1120_s18 }
  0x5d   :  { %13 = sbr.rel (!%p11_p5) target bundleno = 2 (0x2), region = 79 }

// kernel: mobilenet_v3_forward.27
= control target key start
LH: loop header
LB: loop body
LE: loop exit
PB: predicated region body
PF: predicated region fallthrough
CT: control target
= control target key end

     0   :  { %10 = vsyncpa [#allocation3], 0  ;;  %s820_s0 = inlined_call_operand.vmem [shape: bf16[2,8,128], index: 0, kind: input, shape index: {}]   ;;  %s821_s1 = inlined_call_operand.vmem [shape: f32[2,1,128], index: 1, kind: input, shape index: {}]   ;;  %s822_s2 = inlined_call_operand.vmem [shape: bf16[128,128], index: 2, kind: input, shape index: {}]   ;;  %s823_s3 = inlined_call_operand.hbm [shape: f32[1,128], index: 3, kind: input, shape index: {}]   ;;  %s824_s4 = inlined_call_operand.hbm [shape: f32[1,128], index: 4, kind: input, shape index: {}]   ;;  %s825_s5 = inlined_call_operand.vmem [shape: bf16[2,8,128], index: 5, kind: output, shape index: {}]  }
   0x1   :  { %11 = vsyncpa [#allocation5], 0  ;;  %s723_s18 = smov 0   ;;  %s725_s19 = smov 0  }
   0x2   :  { %s727_s20 = smov 0  }
   0x3 LB: > { %s498_s21 = sadd.s32 4294967295, %s689_s20   ;;  %s29_s22 = sadd.s32 1, %s685_s19  ;;  %s689_s20 = sphi %s727_s20, %s17_s20   ;;  %s685_s19 = sphi %s725_s19, %s829_s19   ;;  %s681_s18 = sphi %s723_s18, %s828_s18  }
   0x4   : > { %p31_p0 = scmp.ge.s32.totalorder %s29_s22, 2  ;;  %p500_p1 = scmp.ge.s32.totalorder %s689_s20, 1 }
   0x5   : > { %p179_p2 = scmp.lt.s32.totalorder %s689_s20, 3  ;;  %p748_p4 = scmp.eq.s32.totalorder %s498_s21, 0 }
   0x6   : > { %s831_s22 = smov (%p31_p0, %s29_s22), 0  ;;  %s194_s27 = sshll.u32 %s823_s3, 4  ;;  %s195_s27 = int_to_ptr.hbm [resolvable:$true] %s194_s27 }
   0x7   : > { %p744_p3 = pnand %p500_p1, %p179_p2  ;;  %s691_s28 = smov [#allocation2]  }
   0x8   : > { %s196_s29 = sshll.u32 %s691_s28, 4  ;;  %s206_s7 = sshll.u32 %s824_s4, 4  ;;  %s197_s29 = int_to_ptr.vmem [resolvable:$true] %s196_s29  ;;  %s207_s7 = int_to_ptr.hbm [resolvable:$true] %s206_s7 }
   0x9   : > { %p559_p5 = pneg %p744_p3  ;;  %s692_s8 = smov [#allocation4]  }
   0xa   : > { %s208_s9 = sshll.u32 %s692_s8, 4  ;;  %237 = sbr.rel (%p744_p3) target bundleno = 184 (0xb8), region = 40  ;;  %s209_s9 = int_to_ptr.vmem [resolvable:$true] %s208_s9 }
   0xb   : > { %p560_p6 = pnand %p748_p4, %p559_p5 }
   0xd   : > { %562 = dma.hbm_to_vmem [thread:$0]  (!%p560_p6), %s195_s27, 16, %s197_s29, [#allocation3]  }
   0xe   : > { %565 = dma.hbm_to_vmem [thread:$0]  (!%p560_p6), %s207_s7, 16, %s209_s9, [#allocation5]  }
   0xf   : > { %672 = dma.done.wait (%p748_p4), [#allocation3], 16  }
  0x10   : > { %674 = vsyncadd (%p748_p4), [#allocation3], 4294967280 }
  0x11   : > { %676 = dma.done.wait (%p748_p4), [#allocation5], 16  }
  0x12   : > { %678 = vsyncadd (%p748_p4), [#allocation5], 4294967280  ;;  %p278_p7 = scmp.lt.s32.totalorder %s681_s18, 1  ;;  %v550_v0 = vld [vmem:[%s822_s2 + $0x38] sm:$0xff]  ;;  %v549_v1 = vld [vmem:[%s822_s2 + $0x30] sm:$0xff] }
  0x13   : > { %367 = vmatpush.bf16.msra.mxu0 %v550_v0  ;;  %v548_v2 = vld [vmem:[%s822_s2 + $0x28] sm:$0xff]  ;;  %v547_v3 = vld [vmem:[%s822_s2 + $0x20] sm:$0xff]  ;;  %v546_v4 = vld [vmem:[%s822_s2 + $0x18] sm:$0xff] }
  0x14   : > { %s833_s18 = smov (!%p278_p7, %s681_s18), 1  ;;  %v545_v5 = vld [vmem:[%s822_s2 + $0x10] sm:$0xff]  ;;  %v544_v9 = vld [vmem:[%s822_s2 + $0x8] sm:$0xff]  ;;  %v543_v11 = vld [vmem:[%s822_s2] sm:$0xff] }
  0x15   : > { %s287_s16 = scalar_lea.vmem %s821_s1, %s833_s18  ;;  %s507_s25 = sshll.u32 %s833_s18, 2  ;;  %v597_v13 = vld [vmem:[#allocation2] ss:$0 sm:$0xff]  ;;  %v598_v14 = vld [vmem:[#allocation4] ss:$0 sm:$0xff] }
  0x16   : > { %s284_s30 = scalar_lea.vmem %s820_s0, %s507_s25  ;;  %v596_v8 = vld [vmem:[%s287_s16] ss:$0 sm:$0xff]  ;;  %s294_s13 = scalar_lea.vmem %s825_s5, %s507_s25 }
  0x17   : > { %368 = vmatpush.bf16.msra.mxu0 %v549_v1  ;;  %v295_v6 = vld [vmem:[%s284_s30] sm:$0xf] }
  0x18   : > { %v296_v7 = vunpack.c.l.bf16 %v295_v6 }
  0x1a   : > { %v301_v10 = vmul.f32 %v596_v8, %v296_v7 }
  0x1b   : > { %369 = vmatpush.bf16.msra.mxu0 %v548_v2 }
  0x1c   : > { %v302_v12 = vpack.c.bf16 %v301_v10, %v301_v10 }
  0x1f   : > { %370 = vmatpush.bf16.msra.mxu0 %v547_v3 }
  0x23   : > { %371 = vmatpush.bf16.msra.mxu0 %v546_v4 }
  0x27   : > { %372 = vmatpush.bf16.msra.mxu0 %v545_v5 }
  0x2b   : > { %373 = vmatpush.bf16.msra.mxu0 %v544_v9 }
  0x2f   : > { %374 = vmatpush.bf16.msra.mxu0 %v543_v11 }
  0x32   : > { %375 = vmatmul.bf16.vlgmr.msra.gmra.mxu0 %v302_v12 }
  0xaf   : > { %v376_v15 = vpop.f32.mrf.mxu0 }
  0xb0   : > { %v384_v16 = vmul.f32 %v597_v13, %v376_v15 }
  0xb2   : > { %v389_v17 = vadd.f32 %v598_v14, %v384_v16 }
  0xb4   : > { %v390_v18 = vpack.c.bf16 %v389_v17, %v389_v17 }
  0xb6   : > { %391 = vst [vmem:[%s294_s13] sm:$0xf] %v390_v18 }
  0xb7   : > { %v378_v19 = vpop.f32.mrf.mxu0 }
  0xb8 PF: > { %s17_s20 = sadd.s32 1, %s689_s20   ;;  %s828_s18 = smov %s685_s19 }
  0xb9   : > { %p14_p8 = scmp.ge.s32.totalorder %s17_s20, 4   ;;  %s829_s19 = smov %s831_s22 }
  0xbb   :  { %16 = sbr.rel (!%p14_p8) target bundleno = 3 (0x3), region = 82 }
  0xc0   :  { %417 = vsyncpa [#allocation3], 1 }
  0xc1   :  { %419 = vsyncpa [#allocation3 + $0x1], 1 }
  0xc2   :  { %420 = vsyncpa [#allocation5], 1 }

// kernel: mobilenet_v3_forward.26
= control target key start
LH: loop header
LB: loop body
LE: loop exit
PB: predicated region body
PF: predicated region fallthrough
CT: control target
= control target key end

     0   :  { %10 = vsyncpa [#allocation4], 0  ;;  %s918_s0 = inlined_call_operand.vmem [shape: bf16[2,8,128], index: 0, kind: input, shape index: {}]   ;;  %s919_s1 = inlined_call_operand.vmem [shape: bf16[128,128], index: 1, kind: input, shape index: {}]   ;;  %s920_s2 = inlined_call_operand.hbm [shape: f32[1,128], index: 2, kind: input, shape index: {}]   ;;  %s921_s3 = inlined_call_operand.vmem [shape: bf16[128,128], index: 3, kind: input, shape index: {}]   ;;  %s922_s4 = inlined_call_operand.hbm [shape: f32[1,128], index: 4, kind: input, shape index: {}]   ;;  %s923_s5 = inlined_call_operand.vmem [shape: f32[2,1,128], index: 5, kind: output, shape index: {}]  }
   0x1   :  { %11 = vsyncpa [#allocation6], 0  ;;  %s800_s18 = smov 0   ;;  %s802_s19 = smov 0  }
   0x2   :  { %s804_s20 = smov 0  }
   0x3 LB: > { %s537_s21 = sadd.s32 4294967295, %s765_s20   ;;  %s29_s22 = sadd.s32 1, %s761_s19  ;;  %s765_s20 = sphi %s804_s20, %s17_s20   ;;  %s761_s19 = sphi %s802_s19, %s927_s19   ;;  %s757_s18 = sphi %s800_s18, %s926_s18  }
   0x4   : > { %p31_p0 = scmp.ge.s32.totalorder %s29_s22, 2  ;;  %p539_p1 = scmp.ge.s32.totalorder %s765_s20, 1 }
   0x5   : > { %p172_p2 = scmp.lt.s32.totalorder %s765_s20, 3  ;;  %p825_p4 = scmp.eq.s32.totalorder %s537_s21, 0 }
   0x6   : > { %s929_s22 = smov (%p31_p0, %s29_s22), 0  ;;  %s187_s27 = sshll.u32 %s920_s2, 4  ;;  %s188_s27 = int_to_ptr.hbm [resolvable:$true] %s187_s27 }
   0x7   : > { %p821_p3 = pnand %p539_p1, %p172_p2  ;;  %s767_s28 = smov [#allocation3]  }
   0x8   : > { %s189_s29 = sshll.u32 %s767_s28, 4  ;;  %s202_s7 = sshll.u32 %s922_s4, 4  ;;  %s190_s29 = int_to_ptr.vmem [resolvable:$true] %s189_s29  ;;  %s203_s7 = int_to_ptr.hbm [resolvable:$true] %s202_s7 }
   0x9   : > { %p637_p5 = pneg %p821_p3  ;;  %s768_s8 = smov [#allocation5]  }
   0xa   : > { %s204_s9 = sshll.u32 %s768_s8, 4  ;;  %227 = sbr.rel (%p821_p3) target bundleno = 321 (0x141), region = 40  ;;  %s205_s9 = int_to_ptr.vmem [resolvable:$true] %s204_s9 }
   0xb   : > { %p638_p6 = pnand %p825_p4, %p637_p5 }
   0xd   : > { %640 = dma.hbm_to_vmem [thread:$0]  (!%p638_p6), %s188_s27, 16, %s190_s29, [#allocation4]  }
   0xe   : > { %643 = dma.hbm_to_vmem [thread:$0]  (!%p638_p6), %s203_s7, 16, %s205_s9, [#allocation6]  }
   0xf   : > { %748 = dma.done.wait (%p825_p4), [#allocation4], 16  }
  0x10   : > { %750 = vsyncadd (%p825_p4), [#allocation4], 4294967280 }
  0x11   : > { %752 = dma.done.wait (%p825_p4), [#allocation6], 16  }
  0x12   : > { %754 = vsyncadd (%p825_p4), [#allocation6], 4294967280  ;;  %p261_p7 = scmp.lt.s32.totalorder %s757_s18, 1  ;;  %v769_v0 = vmov 0.0   ;;  %v620_v1 = vld [vmem:[%s919_s1 + $0x38] sm:$0xff]  ;;  %v619_v2 = vld [vmem:[%s919_s1 + $0x30] sm:$0xff] }
  0x13   : > { %275 = vst [vmem:[#allocation2] sm:$0x1] %v769_v0  ;;  %358 = vmatpush.bf16.msra.mxu0 %v620_v1  ;;  %v628_v4 = vld [vmem:[%s921_s3 + $0x38] sm:$0xff]  ;;  %v627_v6 = vld [vmem:[%s921_s3 + $0x30] sm:$0xff]  ;;  %v618_v7 = vld [vmem:[%s919_s1 + $0x28] sm:$0xff] }
  0x14   : > { %s931_s18 = smov (!%p261_p7, %s757_s18), 1  ;;  %438 = vmatpush.bf16.msra.mxu1 %v628_v4  ;;  %v626_v10 = vld [vmem:[%s921_s3 + $0x28] sm:$0xff]  ;;  %v617_v11 = vld [vmem:[%s919_s1 + $0x20] sm:$0xff]  ;;  %v616_v15 = vld [vmem:[%s919_s1 + $0x18] sm:$0xff] }
  0x15   : > { %s546_s10 = sshll.u32 %s931_s18, 2  ;;  %v625_v14 = vld [vmem:[%s921_s3 + $0x20] sm:$0xff]  ;;  %v624_v19 = vld [vmem:[%s921_s3 + $0x18] sm:$0xff]  ;;  %v615_v20 = vld [vmem:[%s919_s1 + $0x10] sm:$0xff]  ;;  %s270_s6 = scalar_lea.vmem %s923_s5, %s931_s18 }
  0x16   : > { %s267_s15 = scalar_lea.vmem %s918_s0, %s546_s10  ;;  %v623_v22 = vld [vmem:[%s921_s3 + $0x10] sm:$0xff]  ;;  %v614_v23 = vld [vmem:[%s919_s1 + $0x8] sm:$0xff]  ;;  %v613_v24 = vld [vmem:[%s919_s1] sm:$0xff] }
  0x17   : > { %v277_v3 = vld [vmem:[%s267_s15] sm:$0xf]  ;;  %359 = vmatpush.bf16.msra.mxu0 %v619_v2  ;;  %v622_v28 = vld [vmem:[%s921_s3 + $0x8] sm:$0xff] }
  0x18   : > { %v278_v5 = vunpack.c.l.bf16 %v277_v3  ;;  %439 = vmatpush.bf16.msra.mxu1 %v627_v6  ;;  %v621_v29 = vld [vmem:[%s921_s3] sm:$0xff] }
  0x19   : > { %v309_v30 = vld [vmem:[#allocation3] sm:$0x1]  ;;  %v389_v36 = vld [vmem:[#allocation5] sm:$0x1] }
  0x1a   : > { %v279_v8 = vrot.slane %v278_v5, 4  ;;  %v276_v17 = vld [vmem:[#allocation2] sm:$0x1] }
  0x1b   : > { %360 = vmatpush.bf16.msra.mxu0 %v618_v7 }
  0x1c   : > { %v280_v9 = vadd.f32 %v279_v8, %v278_v5  ;;  %440 = vmatpush.bf16.msra.mxu1 %v626_v10 }
  0x1e   : > { %v281_v12 = vrot.slane %v280_v9, 2 }
  0x1f   : > { %361 = vmatpush.bf16.msra.mxu0 %v617_v11 }
  0x20   : > { %v282_v13 = vadd.f32 %v281_v12, %v280_v9  ;;  %441 = vmatpush.bf16.msra.mxu1 %v625_v14 }
  0x22   : > { %v283_v16 = vrot.slane %v282_v13, 1 }
  0x23   : > { %362 = vmatpush.bf16.msra.mxu0 %v616_v15 }
  0x24   : > { %v284_v18 = vadd.f32 %v283_v16, %v282_v13  ;;  %442 = vmatpush.bf16.msra.mxu1 %v624_v19 }
  0x26   : > { %v285_v21 = vadd.f32 %v284_v18, %v276_v17 }
  0x27   : > { %363 = vmatpush.bf16.msra.mxu0 %v615_v20 }
  0x28   : > { %286 = vst [vmem:[#allocation2] sm:$0x1] %v285_v21  ;;  %443 = vmatpush.bf16.msra.mxu1 %v623_v22 }
  0x2b   : > { %364 = vmatpush.bf16.msra.mxu0 %v614_v23 }
  0x2c   : > { %444 = vmatpush.bf16.msra.mxu1 %v622_v28 }
  0x2f   : > { %v290_v25 = vld [vmem:[#allocation2] sm:$0x1]  ;;  %365 = vmatpush.bf16.msra.mxu0 %v613_v24 }
  0x30   : > { %v291_v26 = vmul.f32 0.25, %v290_v25  ;;  %445 = vmatpush.bf16.msra.mxu1 %v621_v29 }
  0x32   : > { %v292_v27 = vpack.c.bf16 %v291_v26, %v291_v26 }
  0x34   : > { %366 = vmatmul.bf16.vlgmr.msra.gmra.mxu0 %v292_v27 }
  0xb1   : > { %v367_v31 = vpop.f32.mrf.mxu0 }
  0xb2   : > { %v368_v32 = vadd.f32 %v367_v31, %v309_v30 }
  0xb4   : > { %v371_v33 = vmax.f32 %v368_v32, 0.0 }
  0xb6   : > { %v372_v34 = vpack.c.bf16 %v371_v33, %v371_v33 }
  0xb8   : > { %446 = vmatmul.bf16.vlgmr.msra.gmra.mxu1 %v372_v34 }
  0xb9   : > { %v369_v35 = vpop.f32.mrf.mxu0 }
 0x135   : > { %v447_v37 = vpop.f32.mrf.mxu1 }
 0x136   : > { %v448_v38 = vadd.f32 %v447_v37, %v389_v36 }
 0x138   : > { %v451_v39 = vadd.f32 3.0, %v448_v38 }
 0x13a   : > { %v452_v40 = vmax.f32 %v451_v39, 0.0 }
 0x13c   : > { %v453_v41 = vmin.f32 %v452_v40, 6.0 }
 0x13d   : > { %v449_v42 = vpop.f32.mrf.mxu1 }
 0x13e   : > { %v454_v43 = vmul.f32 0.16666667, %v453_v41 }
 0x140   : > { %455 = vst [vmem:[%s270_s6] sm:$0x1] %v454_v43 }
 0x141 PF: > { %s17_s20 = sadd.s32 1, %s765_s20   ;;  %s926_s18 = smov %s761_s19 }
 0x142   : > { %p14_p8 = scmp.ge.s32.totalorder %s17_s20, 4   ;;  %s927_s19 = smov %s929_s22 }
 0x144   :  { %16 = sbr.rel (!%p14_p8) target bundleno = 3 (0x3), region = 87 }
 0x149   :  { %473 = vsyncpa [#allocation4], 1 }
 0x14a   :  { %475 = vsyncpa [#allocation4 + $0x1], 1 }
 0x14b   :  { %476 = vsyncpa [#allocation6], 1 }

// kernel: mobilenet_v3_forward.28
= control target key start
LH: loop header
LB: loop body
LE: loop exit
PB: predicated region body
PF: predicated region fallthrough
CT: control target
= control target key end

     0   :  { %9 = vsyncpa [#allocation3], 0  ;;  %s755_s0 = inlined_call_operand.vmem [shape: bf16[2,8,128], index: 0, kind: input, shape index: {}]   ;;  %s756_s1 = inlined_call_operand.vmem [shape: bf16[128,128], index: 1, kind: input, shape index: {}]   ;;  %s757_s2 = inlined_call_operand.hbm [shape: f32[1,128], index: 2, kind: input, shape index: {}]   ;;  %s758_s3 = inlined_call_operand.hbm [shape: f32[1,128], index: 3, kind: input, shape index: {}]   ;;  %s759_s4 = inlined_call_operand.vmem [shape: bf16[2,8,128], index: 4, kind: output, shape index: {}]  }
   0x1   :  { %10 = vsyncpa [#allocation5], 0  ;;  %s665_s15 = smov 0   ;;  %s667_s16 = smov 0  }
   0x2   :  { %s669_s17 = smov 0  }
   0x3 LB: > { %s446_s18 = sadd.s32 4294967295, %s636_s17   ;;  %s28_s19 = sadd.s32 1, %s632_s16  ;;  %s636_s17 = sphi %s669_s17, %s16_s17   ;;  %s632_s16 = sphi %s667_s16, %s763_s16   ;;  %s628_s15 = sphi %s665_s15, %s762_s15  }
   0x4   : > { %p30_p0 = scmp.ge.s32.totalorder %s28_s19, 2  ;;  %p448_p1 = scmp.ge.s32.totalorder %s636_s17, 1 }
   0x5   : > { %p152_p2 = scmp.lt.s32.totalorder %s636_s17, 3  ;;  %p690_p4 = scmp.eq.s32.totalorder %s446_s18, 0 }
   0x6   : > { %s765_s19 = smov (%p30_p0, %s28_s19), 0  ;;  %s167_s24 = sshll.u32 %s757_s2, 4  ;;  %s168_s24 = int_to_ptr.hbm [resolvable:$true] %s167_s24 }
   0x7   : > { %p686_p3 = pnand %p448_p1, %p152_p2  ;;  %s638_s25 = smov [#allocation2]  }
   0x8   : > { %s169_s26 = sshll.u32 %s638_s25, 4  ;;  %s179_s29 = sshll.u32 %s758_s3, 4  ;;  %s170_s26 = int_to_ptr.vmem [resolvable:$true] %s169_s26  ;;  %s180_s29 = int_to_ptr.hbm [resolvable:$true] %s179_s29 }
   0x9   : > { %p507_p5 = pneg %p686_p3  ;;  %s639_s30 = smov [#allocation4]  }
   0xa   : > { %s181_s5 = sshll.u32 %s639_s30, 4  ;;  %204 = sbr.rel (%p686_p3) target bundleno = 193 (0xc1), region = 36  ;;  %s182_s5 = int_to_ptr.vmem [resolvable:$true] %s181_s5 }
   0xb   : > { %p508_p6 = pnand %p690_p4, %p507_p5 }
   0xd   : > { %510 = dma.hbm_to_vmem [thread:$0]  (!%p508_p6), %s168_s24, 16, %s170_s26, [#allocation3]  }
   0xe   : > { %513 = dma.hbm_to_vmem [thread:$0]  (!%p508_p6), %s180_s29, 16, %s182_s5, [#allocation5]  }
   0xf   : > { %619 = dma.done.wait (%p690_p4), [#allocation3], 16  }
  0x10   : > { %621 = vsyncadd (%p690_p4), [#allocation3], 4294967280 }
  0x11   : > { %623 = dma.done.wait (%p690_p4), [#allocation5], 16  }
  0x12   : > { %625 = vsyncadd (%p690_p4), [#allocation5], 4294967280  ;;  %v498_v0 = vld [vmem:[%s756_s1 + $0x38] sm:$0xff]  ;;  %v497_v1 = vld [vmem:[%s756_s1 + $0x30] sm:$0xff]  ;;  %p240_p7 = scmp.lt.s32.totalorder %s628_s15, 1 }
  0x13   : > { %319 = vmatpush.bf16.msra.mxu0 %v498_v0  ;;  %v496_v2 = vld [vmem:[%s756_s1 + $0x28] sm:$0xff]  ;;  %v495_v3 = vld [vmem:[%s756_s1 + $0x20] sm:$0xff]  ;;  %v494_v4 = vld [vmem:[%s756_s1 + $0x18] sm:$0xff] }
  0x14   : > { %v493_v5 = vld [vmem:[%s756_s1 + $0x10] sm:$0xff]  ;;  %s767_s15 = smov (!%p240_p7, %s628_s15), 1  ;;  %v492_v6 = vld [vmem:[%s756_s1 + $0x8] sm:$0xff]  ;;  %v491_v7 = vld [vmem:[%s756_s1] sm:$0xff] }
  0x15   : > { %s455_s24 = sshll.u32 %s767_s15, 2  ;;  %v544_v9 = vld [vmem:[#allocation2] ss:$0 sm:$0xff]  ;;  %v545_v10 = vld [vmem:[#allocation4] ss:$0 sm:$0xff] }
  0x16   : > { %s246_s29 = scalar_lea.vmem %s755_s0, %s455_s24  ;;  %s253_s5 = scalar_lea.vmem %s759_s4, %s455_s24 }
  0x17   : > { %320 = vmatpush.bf16.msra.mxu0 %v497_v1  ;;  %v254_v8 = vld [vmem:[%s246_s29] sm:$0xf] }
  0x1b   : > { %321 = vmatpush.bf16.msra.mxu0 %v496_v2 }
  0x1f   : > { %322 = vmatpush.bf16.msra.mxu0 %v495_v3 }
  0x23   : > { %323 = vmatpush.bf16.msra.mxu0 %v494_v4 }
  0x27   : > { %324 = vmatpush.bf16.msra.mxu0 %v493_v5 }
  0x2b   : > { %325 = vmatpush.bf16.msra.mxu0 %v492_v6 }
  0x2f   : > { %326 = vmatpush.bf16.msra.mxu0 %v491_v7 }
  0x32   : > { %327 = vmatmul.bf16.vlgmr.msra.gmra.mxu0 %v254_v8 }
  0xaf   : > { %v328_v11 = vpop.f32.mrf.mxu0 }
  0xb0   : > { %v336_v12 = vmul.f32 %v544_v9, %v328_v11 }
  0xb2   : > { %v341_v13 = vadd.f32 %v545_v10, %v336_v12 }
  0xb4   : > { %v342_v14 = vadd.f32 3.0, %v341_v13 }
  0xb6   : > { %v343_v15 = vmax.f32 %v342_v14, 0.0 }
  0xb7   : > { %v330_v16 = vpop.f32.mrf.mxu0 }
  0xb8   : > { %v344_v17 = vmin.f32 %v343_v15, 6.0 }
  0xba   : > { %v345_v18 = vmul.f32 %v344_v17, %v341_v13 }
  0xbc   : > { %v346_v19 = vmul.f32 0.16666667, %v345_v18 }
  0xbe   : > { %v347_v20 = vpack.c.bf16 %v346_v19, %v346_v19 }
  0xc0   : > { %348 = vst [vmem:[%s253_s5] sm:$0xf] %v347_v20 }
  0xc1 PF: > { %s16_s17 = sadd.s32 1, %s636_s17   ;;  %s762_s15 = smov %s632_s16 }
  0xc2   : > { %p13_p8 = scmp.ge.s32.totalorder %s16_s17, 4   ;;  %s763_s16 = smov %s765_s19 }
  0xc4   :  { %15 = sbr.rel (!%p13_p8) target bundleno = 3 (0x3), region = 75 }
  0xc9   :  { %374 = vsyncpa [#allocation3], 1 }
  0xca   :  { %376 = vsyncpa [#allocation3 + $0x1], 1 }
  0xcb   :  { %377 = vsyncpa [#allocation5], 1 }

// kernel: mobilenet_v3_forward.31
= control target key start
LH: loop header
LB: loop body
LE: loop exit
PB: predicated region body
PF: predicated region fallthrough
CT: control target
= control target key end

     0   :  { %s654_s21 = smov 0   ;;  %s656_s22 = smov 0   ;;  %s728_s0 = inlined_call_operand.vmem [shape: bf16[2,8,128], index: 0, kind: input, shape index: {}]   ;;  %s729_s1 = inlined_call_operand.vmem [shape: f32[2,1,128], index: 1, kind: input, shape index: {}]   ;;  %s730_s2 = inlined_call_operand.vmem [shape: bf16[2,8,128], index: 2, kind: input, shape index: {}]   ;;  %s731_s3 = inlined_call_operand.vmem [shape: bf16[128,128], index: 3, kind: input, shape index: {}]   ;;  %s732_s4 = inlined_call_operand.vmem [shape: f32[1,128], index: 4, kind: input, shape index: {}]   ;;  %s733_s5 = inlined_call_operand.vmem [shape: f32[1,128], index: 5, kind: input, shape index: {}]   ;;  %s734_s6 = inlined_call_operand.vmem [shape: bf16[2,8,128], index: 6, kind: output, shape index: {}]  }
   0x1   :  { %s658_s23 = smov 0  }
   0x2 LB: > { %s28_s24 = sadd.s32 1, %s613_s22  ;;  %p522_p0 = scmp.ge.s32.totalorder %s617_s23, 1  ;;  %s617_s23 = sphi %s658_s23, %s16_s23   ;;  %s613_s22 = sphi %s656_s22, %s736_s22   ;;  %s609_s21 = sphi %s654_s21, %s735_s21  }
   0x3   : > { %p30_p1 = scmp.ge.s32.totalorder %s28_s24, 2  ;;  %p252_p2 = scmp.lt.s32.totalorder %s617_s23, 3 }
   0x5   : > { %s738_s24 = smov (%p30_p1, %s28_s24), 0  ;;  %p253_p3 = pnand %p522_p0, %p252_p2 }
   0x6   : > { %p296_p4 = scmp.lt.s32.totalorder (!%p253_p3), %s609_s21, 1 }
   0x7   : > { %256 = sbr.rel (%p253_p3) target bundleno = 179 (0xb3), region = 44 }
   0xc   : > { %v567_v0 = vld [vmem:[%s731_s3 + $0x38] sm:$0xff]  ;;  %v566_v1 = vld [vmem:[%s731_s3 + $0x30] sm:$0xff]  ;;  %s740_s21 = smov (!%p296_p4, %s609_s21), 1  ;;  %v565_v2 = vld [vmem:[%s731_s3 + $0x28] sm:$0xff] }
   0xd   : > { %392 = vmatpush.bf16.msra.mxu0 %v567_v0  ;;  %s305_s7 = scalar_lea.vmem %s729_s1, %s740_s21  ;;  %v564_v3 = vld [vmem:[%s731_s3 + $0x20] sm:$0xff]  ;;  %s687_s12 = sshll.u32 %s740_s21, 2  ;;  %v563_v4 = vld [vmem:[%s731_s3 + $0x18] sm:$0xff]  ;;  %v562_v5 = vld [vmem:[%s731_s3 + $0x10] sm:$0xff] }
   0xe   : > { %s302_s17 = scalar_lea.vmem %s728_s0, %s687_s12  ;;  %v592_v8 = vld [vmem:[%s305_s7] ss:$0 sm:$0xff]  ;;  %v561_v9 = vld [vmem:[%s731_s3 + $0x8] sm:$0xff]  ;;  %s312_s29 = scalar_lea.vmem %s730_s2, %s687_s12 }
   0xf   : > { %v320_v6 = vld [vmem:[%s302_s17] sm:$0xf]  ;;  %s319_s13 = scalar_lea.vmem %s734_s6, %s687_s12 }
  0x10   : > { %v321_v7 = vunpack.c.l.bf16 %v320_v6  ;;  %v560_v11 = vld [vmem:[%s731_s3] sm:$0xff] }
  0x11   : > { %393 = vmatpush.bf16.msra.mxu0 %v566_v1  ;;  %v593_v13 = vld [vmem:[%s732_s4] ss:$0 sm:$0xff] }
  0x12   : > { %v326_v10 = vmul.f32 %v592_v8, %v321_v7  ;;  %v415_v14 = vld [vmem:[%s312_s29] sm:$0xf] }
  0x13   : > { %v594_v15 = vld [vmem:[%s733_s5] ss:$0 sm:$0xff]  ;;  %v416_v18 = vunpack.c.l.bf16 %v415_v14 }
  0x14   : > { %v327_v12 = vpack.c.bf16 %v326_v10, %v326_v10 }
  0x15   : > { %394 = vmatpush.bf16.msra.mxu0 %v565_v2 }
  0x19   : > { %395 = vmatpush.bf16.msra.mxu0 %v564_v3 }
  0x1d   : > { %396 = vmatpush.bf16.msra.mxu0 %v563_v4 }
  0x21   : > { %397 = vmatpush.bf16.msra.mxu0 %v562_v5 }
  0x25   : > { %398 = vmatpush.bf16.msra.mxu0 %v561_v9 }
  0x29   : > { %399 = vmatpush.bf16.msra.mxu0 %v560_v11 }
  0x2c   : > { %400 = vmatmul.bf16.vlgmr.msra.gmra.mxu0 %v327_v12 }
  0xa9   : > { %v401_v16 = vpop.f32.mrf.mxu0 }
  0xaa   : > { %v409_v17 = vmul.f32 %v593_v13, %v401_v16 }
  0xac   : > { %v414_v19 = vadd.f32 %v594_v15, %v409_v17 }
  0xae   : > { %v417_v20 = vadd.f32 %v416_v18, %v414_v19 }
  0xb0   : > { %v418_v21 = vpack.c.bf16 %v417_v20, %v417_v20 }
  0xb1   : > { %v403_v22 = vpop.f32.mrf.mxu0 }
  0xb2   : > { %419 = vst [vmem:[%s319_s13] sm:$0xf] %v418_v21 }
  0xb3 PF: > { %s16_s23 = sadd.s32 1, %s617_s23   ;;  %s735_s21 = smov %s613_s22 }
  0xb4   : > { %p13_p5 = scmp.ge.s32.totalorder %s16_s23, 4   ;;  %s736_s22 = smov %s738_s24 }
  0xb6   :  { %15 = sbr.rel (!%p13_p5) target bundleno = 2 (0x2), region = 80 }

// kernel: mobilenet_v3_forward.29
= control target key start
LH: loop header
LB: loop body
LE: loop exit
PB: predicated region body
PF: predicated region fallthrough
CT: control target
= control target key end

     0   :  { %s677_s15 = smov 0   ;;  %s679_s16 = smov 0   ;;  %s767_s0 = inlined_call_operand.vmem [shape: bf16[2,4,4,128], index: 0, kind: input, shape index: {}]   ;;  %s768_s1 = inlined_call_operand.vmem [shape: f32[9,128], index: 1, kind: input, shape index: {}]   ;;  %s769_s2 = inlined_call_operand.vmem [shape: f32[1,128], index: 2, kind: input, shape index: {}]   ;;  %s770_s3 = inlined_call_operand.vmem [shape: f32[1,128], index: 3, kind: input, shape index: {}]   ;;  %s771_s4 = inlined_call_operand.vmem [shape: bf16[2,2,2,128], index: 4, kind: output, shape index: {}]  }
   0x1   :  { %s681_s17 = smov 0  }
   0x2 LB: > { %s26_s18 = sadd.s32 1, %s646_s16  ;;  %p562_p0 = scmp.ge.s32.totalorder %s650_s17, 1  ;;  %s650_s17 = sphi %s681_s17, %s14_s17   ;;  %s646_s16 = sphi %s679_s16, %s773_s16   ;;  %s642_s15 = sphi %s677_s15, %s772_s15  }
   0x3   : > { %p28_p1 = scmp.ge.s32.totalorder %s26_s18, 2  ;;  %p206_p2 = scmp.lt.s32.totalorder %s650_s17, 3 }
   0x5   : > { %s775_s18 = smov (%p28_p1, %s26_s18), 0  ;;  %p207_p3 = pnand %p562_p0, %p206_p2 }
   0x6   : > { %p247_p4 = scmp.lt.s32.totalorder (!%p207_p3), %s642_s15, 1 }
   0x7   : > { %210 = sbr.rel (%p207_p3) target bundleno = 59 (0x3b), region = 36 }
   0xc   : > { %s777_s15 = smov (!%p247_p4, %s642_s15), 1  ;;  %v617_v0 = vld [vmem:[%s768_s1] ss:$0 sm:$0xff]  ;;  %v618_v1 = vld [vmem:[%s768_s1 + $0x1] ss:$0 sm:$0xff] }
   0xd   : > { %s592_s23 = sshll.u32 %s777_s15, 3  ;;  %v619_v2 = vld [vmem:[%s768_s1 + $0x2] ss:$0 sm:$0xff]  ;;  %v621_v3 = vld [vmem:[%s768_s1 + $0x4] ss:$0 sm:$0xff] }
   0xe   : > { %s710_s28 = scalar_lea.vmem %s767_s0, %s592_s23  ;;  %v620_v13 = vld [vmem:[%s768_s1 + $0x3] ss:$0 sm:$0xff]  ;;  %v622_v16 = vld [vmem:[%s768_s1 + $0x5] ss:$0 sm:$0xff]  ;;  %v624_v31 = vld [vmem:[%s768_s1 + $0x7] ss:$0 sm:$0xff] }
   0xf   : > { %v272_v4 = vld [vmem:[%s710_s28] sm:$0x1]  ;;  %v300_v6 = vld [vmem:[%s710_s28] sm:$0x2]  ;;  %v570_v10 = vld [vmem:[%s710_s28 + $0x2] sm:$0x1] }
  0x10   : > { %v282_v5 = vld [vmem:[%s710_s28] sm:$0x3]  ;;  %v274_v7 = vunpack.c.l.bf16 %v272_v4  ;;  %v302_v9 = vunpack.c.l.bf16 %v300_v6  ;;  %v572_v11 = vld [vmem:[%s710_s28 + $0x2] sm:$0x3]  ;;  %v321_v20 = vunpack.c.l.bf16 %v570_v10  ;;  %v580_v21 = vld [vmem:[%s710_s28 + $0x4] sm:$0x1] }
  0x11   : > { %v284_v8 = vunpack.c.l.bf16 %v282_v5  ;;  %v576_v12 = vld [vmem:[%s710_s28 + $0x2] sm:$0x2]  ;;  %v331_v14 = vunpack.c.l.bf16 %v572_v11  ;;  %v582_v22 = vld [vmem:[%s710_s28 + $0x4] sm:$0x3]  ;;  %v273_v27 = vld [vmem:[%s710_s28 + $0x2] sm:$0x1]  ;;  %v368_v29 = vunpack.c.l.bf16 %v580_v21 }
  0x12   : > { %v349_v15 = vunpack.c.l.bf16 %v576_v12  ;;  %v278_v17 = vmul.f32 %v617_v0, %v274_v7  ;;  %v306_v19 = vmul.f32 %v619_v2, %v302_v9  ;;  %v586_v26 = vld [vmem:[%s710_s28 + $0x4] sm:$0x2]  ;;  %v378_v30 = vunpack.c.l.bf16 %v582_v22  ;;  %v283_v33 = vld [vmem:[%s710_s28 + $0x2] sm:$0x3]  ;;  %v571_v39 = vld [vmem:[%s710_s28 + $0x4] sm:$0x1] }
  0x13   : > { %v288_v18 = vmul.f32 %v618_v1, %v284_v8  ;;  %v335_v23 = vmul.f32 %v621_v3, %v331_v14  ;;  %v275_v32 = vunpack.c.l.bf16 %v273_v27  ;;  %v301_v34 = vld [vmem:[%s710_s28 + $0x2] sm:$0x2]  ;;  %v325_v36 = vmul.f32 %v620_v13, %v321_v20  ;;  %v573_v40 = vld [vmem:[%s710_s28 + $0x4] sm:$0x3]  ;;  %v623_v43 = vld [vmem:[%s768_s1 + $0x6] ss:$0 sm:$0xff] }
  0x14   : > { %v568_v25 = vrot.slane %v306_v19, 10  ;;  %v353_v28 = vmul.f32 %v622_v16, %v349_v15  ;;  %v285_v37 = vunpack.c.l.bf16 %v283_v33  ;;  %v303_v38 = vunpack.c.l.bf16 %v301_v34  ;;  %v577_v41 = vld [vmem:[%s710_s28 + $0x4] sm:$0x2]  ;;  %v625_v45 = vld [vmem:[%s768_s1 + $0x8] ss:$0 sm:$0xff]  ;;  %s565_s23 = sshll.u32 %s777_s15, 1 }
  0x15   : > { %v566_v24 = vrot.slane %v288_v18, 9  ;;  %v574_v42 = vrot.slane %v335_v23, 9  ;;  %v396_v44 = vunpack.c.l.bf16 %v586_v26  ;;  %v322_v46 = vunpack.c.l.bf16 %v571_v39  ;;  %v583_v55 = vld [vmem:[%s710_s28 + $0x6] sm:$0x3]  ;;  %v627_v22 = vld [vmem:[%s770_s3] ss:$0 sm:$0xff]  ;;  %s271_s26 = scalar_lea.vmem %s771_s4, %s565_s23 }
  0x16   : > { %v332_v47 = vunpack.c.l.bf16 %v573_v40  ;;  %v279_v49 = vmul.f32 %v617_v0, %v275_v32  ;;  %v289_v50 = vmul.f32 %v618_v1, %v285_v37  ;;  %v307_v51 = vmul.f32 %v619_v2, %v303_v38  ;;  %v581_v60 = vld [vmem:[%s710_s28 + $0x6] sm:$0x1]  ;;  %v587_v4 = vld [vmem:[%s710_s28 + $0x6] sm:$0x2] }
  0x17   : > { %v298_v35 = vadd.f32 %v566_v24, %v278_v17  ;;  %v578_v52 = vrot.slane %v353_v28, 10  ;;  %v382_v53 = vmul.f32 %v624_v31, %v378_v30  ;;  %v350_v54 = vunpack.c.l.bf16 %v577_v41 }
  0x18   : > { %v567_v57 = vrot.slane %v289_v50, 9  ;;  %v569_v58 = vrot.slane %v307_v51, 10  ;;  %v336_v59 = vmul.f32 %v621_v3, %v332_v47  ;;  %v372_v61 = vmul.f32 %v623_v43, %v368_v29 }
  0x19   : > { %v316_v48 = vadd.f32 %v568_v25, %v298_v35  ;;  %v400_v62 = vmul.f32 %v625_v45, %v396_v44  ;;  %v326_v63 = vmul.f32 %v620_v13, %v322_v46  ;;  %v354_v7 = vmul.f32 %v622_v16, %v350_v54  ;;  %v626_v13 = vld [vmem:[%s769_s2] ss:$0 sm:$0xff] }
  0x1a   : > { %v299_v6 = vadd.f32 %v567_v57, %v279_v49  ;;  %v379_v8 = vunpack.c.l.bf16 %v583_v55  ;;  %v584_v0 = vrot.slane %v382_v53, 9  ;;  %v369_v1 = vunpack.c.l.bf16 %v581_v60 }
  0x1b   : > { %v327_v56 = vadd.f32 %v325_v36, %v316_v48  ;;  %v575_v10 = vrot.slane %v336_v59, 9  ;;  %v397_v11 = vunpack.c.l.bf16 %v587_v4  ;;  %v588_v12 = vrot.slane %v400_v62, 10 }
  0x1c   : > { %v317_v9 = vadd.f32 %v569_v58, %v299_v6  ;;  %v579_v17 = vrot.slane %v354_v7, 10  ;;  %v383_v3 = vmul.f32 %v624_v31, %v379_v8  ;;  %v373_v20 = vmul.f32 %v623_v43, %v369_v1 }
  0x1d   : > { %v345_v5 = vadd.f32 %v574_v42, %v327_v56  ;;  %v401_v16 = vmul.f32 %v625_v45, %v397_v11 }
  0x1e   : > { %v328_v15 = vadd.f32 %v326_v63, %v317_v9  ;;  %v585_v24 = vrot.slane %v383_v3, 9 }
  0x1f   : > { %v363_v2 = vadd.f32 %v578_v52, %v345_v5  ;;  %v589_v27 = vrot.slane %v401_v16, 10 }
  0x20   : > { %v346_v19 = vadd.f32 %v575_v10, %v328_v15 }
  0x21   : > { %v374_v14 = vadd.f32 %v372_v61, %v363_v2 }
  0x22   : > { %v364_v23 = vadd.f32 %v579_v17, %v346_v19 }
  0x23   : > { %v392_v18 = vadd.f32 %v584_v0, %v374_v14 }
  0x24   : > { %v375_v26 = vadd.f32 %v373_v20, %v364_v23 }
  0x25   : > { %v410_v21 = vadd.f32 %v588_v12, %v392_v18 }
  0x26   : > { %v393_v29 = vadd.f32 %v585_v24, %v375_v26 }
  0x27   : > { %v416_v25 = vmul.f32 %v626_v13, %v410_v21 }
  0x28   : > { %v411_v31 = vadd.f32 %v589_v27, %v393_v29 }
  0x29   : > { %v422_v28 = vadd.f32 %v627_v22, %v416_v25 }
  0x2a   : > { %v417_v33 = vmul.f32 %v626_v13, %v411_v31 }
  0x2b   : > { %v424_v30 = vadd.f32 3.0, %v422_v28 }
  0x2c   : > { %v423_v35 = vadd.f32 %v627_v22, %v417_v33 }
  0x2d   : > { %v426_v32 = vmax.f32 %v424_v30, 0.0 }
  0x2e   : > { %v425_v37 = vadd.f32 3.0, %v423_v35 }
  0x2f   : > { %v428_v34 = vmin.f32 %v426_v32, 6.0 }
  0x30   : > { %v427_v39 = vmax.f32 %v425_v37, 0.0 }
  0x31   : > { %v430_v36 = vmul.f32 %v428_v34, %v422_v28 }
  0x32   : > { %v429_v41 = vmin.f32 %v427_v39, 6.0 }
  0x33   : > { %v432_v38 = vmul.f32 0.16666667, %v430_v36 }
  0x34   : > { %v431_v42 = vmul.f32 %v429_v41, %v423_v35 }
  0x35   : > { %v434_v40 = vpack.c.bf16 %v432_v38, %v432_v38 }
  0x36   : > { %v433_v43 = vmul.f32 0.16666667, %v431_v42 }
  0x37   : > { %436 = vst [vmem:[%s271_s26] sm:$0x1] %v434_v40 }
  0x38   : > { %v435_v44 = vpack.c.bf16 %v433_v43, %v433_v43 }
  0x3a   : > { %437 = vst [vmem:[%s271_s26 + $0x1] sm:$0x1] %v435_v44 }
  0x3b PF: > { %s14_s17 = sadd.s32 1, %s650_s17   ;;  %s772_s15 = smov %s646_s16 }
  0x3c   : > { %p11_p5 = scmp.ge.s32.totalorder %s14_s17, 4   ;;  %s773_s16 = smov %s775_s18 }
  0x3e   :  { %13 = sbr.rel (!%p11_p5) target bundleno = 2 (0x2), region = 77 }

// kernel: mobilenet_v3_forward.32
= control target key start
LH: loop header
LB: loop body
LE: loop exit
PB: predicated region body
PF: predicated region fallthrough
CT: control target
= control target key end

     0   :  { %s629_s15 = smov 0   ;;  %s631_s16 = smov 0   ;;  %s772_s0 = inlined_call_operand.vmem [shape: bf16[2,8,128], index: 0, kind: input, shape index: {}]   ;;  %s773_s1 = inlined_call_operand.vmem [shape: bf16[128,256], index: 1, kind: input, shape index: {}]   ;;  %s774_s2 = inlined_call_operand.vmem [shape: f32[1,256], index: 2, kind: input, shape index: {}]   ;;  %s775_s3 = inlined_call_operand.vmem [shape: f32[1,256], index: 3, kind: input, shape index: {}]   ;;  %s776_s4 = inlined_call_operand.vmem [shape: bf16[2,8,256], index: 4, kind: output, shape index: {}]  }
   0x1   :  { %s633_s17 = smov 0  }
   0x2 LB: > { %s26_s18 = sadd.s32 1, %s598_s16  ;;  %p469_p0 = scmp.ge.s32.totalorder %s602_s17, 1  ;;  %s602_s17 = sphi %s633_s17, %s14_s17   ;;  %s598_s16 = sphi %s631_s16, %s778_s16   ;;  %s594_s15 = sphi %s629_s15, %s777_s15  }
   0x3   : > { %p28_p1 = scmp.ge.s32.totalorder %s26_s18, 2  ;;  %p180_p2 = scmp.lt.s32.totalorder %s602_s17, 3 }
   0x5   : > { %s780_s18 = smov (%p28_p1, %s26_s18), 0  ;;  %p181_p3 = pnand %p469_p0, %p180_p2 }
   0x6   : > { %p212_p4 = scmp.lt.s32.totalorder (!%p181_p3), %s594_s15, 1 }
   0x7   : > { %184 = sbr.rel (%p181_p3) target bundleno = 190 (0xbe), region = 36 }
   0xc   : > { %v531_v0 = vld [vmem:[%s773_s1 + $0x70] sm:$0xf]  ;;  %v555_v1 = vld [vmem:[%s773_s1 + $0x74] sm:$0xf0]  ;;  %v554_v2 = vld [vmem:[%s773_s1 + $0x74] sm:$0xf] }
   0xd   : > { %v532_v3 = vor.u32 %v555_v1, %v531_v0  ;;  %v533_v4 = vld [vmem:[%s773_s1 + $0x78] sm:$0xf0]  ;;  %v523_v5 = vld [vmem:[%s773_s1 + $0x60] sm:$0xf]  ;;  %v553_v6 = vld [vmem:[%s773_s1 + $0x64] sm:$0xf0] }
   0xe   : > { %v536_v7 = vor.u32 %v554_v2, %v533_v4  ;;  %v552_v8 = vld [vmem:[%s773_s1 + $0x64] sm:$0xf]  ;;  %v525_v9 = vld [vmem:[%s773_s1 + $0x68] sm:$0xf0]  ;;  %v524_v10 = vor.u32 %v553_v6, %v523_v5  ;;  %v515_v12 = vld [vmem:[%s773_s1 + $0x50] sm:$0xf] }
   0xf   : > { %325 = vmatpush.bf16.msra.mxu0 %v532_v3  ;;  %v528_v11 = vor.u32 %v552_v8, %v525_v9  ;;  %v551_v13 = vld [vmem:[%s773_s1 + $0x54] sm:$0xf0]  ;;  %v550_v14 = vld [vmem:[%s773_s1 + $0x54] sm:$0xf]  ;;  %v517_v15 = vld [vmem:[%s773_s1 + $0x58] sm:$0xf0] }
  0x10   : > { %338 = vmatpush.bf16.msra.mxu1 %v536_v7  ;;  %v516_v16 = vor.u32 %v551_v13, %v515_v12  ;;  %v520_v17 = vor.u32 %v550_v14, %v517_v15  ;;  %v507_v18 = vld [vmem:[%s773_s1 + $0x40] sm:$0xf]  ;;  %v549_v19 = vld [vmem:[%s773_s1 + $0x44] sm:$0xf0]  ;;  %v548_v20 = vld [vmem:[%s773_s1 + $0x44] sm:$0xf] }
  0x11   : > { %v509_v21 = vld [vmem:[%s773_s1 + $0x48] sm:$0xf0]  ;;  %v508_v22 = vor.u32 %v549_v19, %v507_v18  ;;  %v499_v24 = vld [vmem:[%s773_s1 + $0x30] sm:$0xf]  ;;  %v547_v25 = vld [vmem:[%s773_s1 + $0x34] sm:$0xf0] }
  0x12   : > { %v512_v23 = vor.u32 %v548_v20, %v509_v21  ;;  %v546_v26 = vld [vmem:[%s773_s1 + $0x34] sm:$0xf]  ;;  %v501_v27 = vld [vmem:[%s773_s1 + $0x38] sm:$0xf0]  ;;  %v500_v28 = vor.u32 %v547_v25, %v499_v24  ;;  %v491_v30 = vld [vmem:[%s773_s1 + $0x20] sm:$0xf] }
  0x13   : > { %326 = vmatpush.bf16.msra.mxu0 %v524_v10  ;;  %v504_v29 = vor.u32 %v546_v26, %v501_v27  ;;  %v545_v31 = vld [vmem:[%s773_s1 + $0x24] sm:$0xf0]  ;;  %v544_v32 = vld [vmem:[%s773_s1 + $0x24] sm:$0xf]  ;;  %v493_v33 = vld [vmem:[%s773_s1 + $0x28] sm:$0xf0] }
  0x14   : > { %339 = vmatpush.bf16.msra.mxu1 %v528_v11  ;;  %v492_v34 = vor.u32 %v545_v31, %v491_v30  ;;  %v496_v35 = vor.u32 %v544_v32, %v493_v33  ;;  %v483_v36 = vld [vmem:[%s773_s1 + $0x10] sm:$0xf]  ;;  %v543_v37 = vld [vmem:[%s773_s1 + $0x14] sm:$0xf0]  ;;  %v542_v38 = vld [vmem:[%s773_s1 + $0x14] sm:$0xf] }
  0x15   : > { %v485_v39 = vld [vmem:[%s773_s1 + $0x18] sm:$0xf0]  ;;  %s782_s15 = smov (!%p212_p4, %s594_s15), 1  ;;  %v484_v40 = vor.u32 %v543_v37, %v483_v36  ;;  %v475_v42 = vld [vmem:[%s773_s1] sm:$0xf] }
  0x16   : > { %v488_v41 = vor.u32 %v542_v38, %v485_v39  ;;  %v541_v43 = vld [vmem:[%s773_s1 + $0x4] sm:$0xf0]  ;;  %v540_v44 = vld [vmem:[%s773_s1 + $0x4] sm:$0xf]  ;;  %v477_v45 = vld [vmem:[%s773_s1 + $0x8] sm:$0xf0] }
  0x17   : > { %327 = vmatpush.bf16.msra.mxu0 %v516_v16  ;;  %s470_s13 = sshll.u32 %s782_s15, 2  ;;  %v476_v46 = vor.u32 %v541_v43, %v475_v42  ;;  %v480_v47 = vor.u32 %v540_v44, %v477_v45  ;;  %v351_v49 = vld [vmem:[%s774_s2] sm:$0x3]  ;;  %s539_s25 = sshll.u32 %s782_s15, 3 }
  0x18   : > { %340 = vmatpush.bf16.msra.mxu1 %v520_v17  ;;  %s218_s20 = scalar_lea.vmem %s772_s0, %s470_s13  ;;  %v359_v50 = vld [vmem:[%s775_s3] sm:$0x3]  ;;  %v353_v51 = vperm.slane %v351_v49, 0  ;;  %v354_v52 = vperm.slane %v351_v49, 1  ;;  %s227_s28 = scalar_lea.vmem %s776_s4, %s539_s25 }
  0x19   : > { %v228_v48 = vld [vmem:[%s218_s20] sm:$0xf]  ;;  %v361_v53 = vperm.slane %v359_v50, 0  ;;  %v362_v55 = vperm.slane %v359_v50, 1 }
  0x1b   : > { %328 = vmatpush.bf16.msra.mxu0 %v508_v22 }
  0x1c   : > { %341 = vmatpush.bf16.msra.mxu1 %v512_v23 }
  0x1f   : > { %329 = vmatpush.bf16.msra.mxu0 %v500_v28 }
  0x20   : > { %342 = vmatpush.bf16.msra.mxu1 %v504_v29 }
  0x23   : > { %330 = vmatpush.bf16.msra.mxu0 %v492_v34 }
  0x24   : > { %343 = vmatpush.bf16.msra.mxu1 %v496_v35 }
  0x27   : > { %331 = vmatpush.bf16.msra.mxu0 %v484_v40 }
  0x28   : > { %344 = vmatpush.bf16.msra.mxu1 %v488_v41 }
  0x2b   : > { %332 = vmatpush.bf16.msra.mxu0 %v476_v46 }
  0x2c   : > { %345 = vmatpush.bf16.msra.mxu1 %v480_v47 }
  0x2e   : > { %333 = vmatmul.bf16.vlgmr.msra.gmra.mxu0 %v228_v48 }
  0x2f   : > { %346 = vmatmul.bf16.vlgmr.msra.gmra.mxu1 %v228_v48 }
  0xab   : > { %v334_v54 = vpop.f32.mrf.mxu0 }
  0xac   : > { %v357_v56 = vmul.f32 %v353_v51, %v334_v54  ;;  %v347_v57 = vpop.f32.mrf.mxu1 }
  0xad   : > { %v358_v58 = vmul.f32 %v354_v52, %v347_v57 }
  0xae   : > { %v365_v59 = vadd.f32 %v361_v53, %v357_v56 }
  0xaf   : > { %v366_v60 = vadd.f32 %v362_v55, %v358_v58 }
  0xb0   : > { %v367_v61 = vadd.f32 3.0, %v365_v59 }
  0xb1   : > { %v368_v62 = vadd.f32 3.0, %v366_v60 }
  0xb2   : > { %v369_v63 = vmax.f32 %v367_v61, 0.0 }
  0xb3   : > { %v370_v0 = vmax.f32 %v368_v62, 0.0  ;;  %v336_v1 = vpop.f32.mrf.mxu0 }
  0xb4   : > { %v371_v2 = vmin.f32 %v369_v63, 6.0  ;;  %v349_v3 = vpop.f32.mrf.mxu1 }
  0xb5   : > { %v372_v4 = vmin.f32 %v370_v0, 6.0 }
  0xb6   : > { %v373_v5 = vmul.f32 %v371_v2, %v365_v59 }
  0xb7   : > { %v374_v6 = vmul.f32 %v372_v4, %v366_v60 }
  0xb8   : > { %v375_v7 = vmul.f32 0.16666667, %v373_v5 }
  0xb9   : > { %v376_v8 = vmul.f32 0.16666667, %v374_v6 }
  0xbb   : > { %v377_v9 = vpack.c.bf16 %v376_v8, %v375_v7 }
  0xbd   : > { %378 = vst [vmem:[%s227_s28] sm:$0xff] %v377_v9 }
  0xbe PF: > { %s14_s17 = sadd.s32 1, %s602_s17   ;;  %s777_s15 = smov %s598_s16 }
  0xbf   : > { %p11_p5 = scmp.ge.s32.totalorder %s14_s17, 4   ;;  %s778_s16 = smov %s780_s18 }
  0xc1   :  { %13 = sbr.rel (!%p11_p5) target bundleno = 2 (0x2), region = 66 }

// kernel: mobilenet_v3_forward.30
= control target key start
LH: loop header
LB: loop body
LE: loop exit
PB: predicated region body
PF: predicated region fallthrough
CT: control target
= control target key end

     0   :  { %s652_s18 = smov 0   ;;  %s654_s19 = smov 0   ;;  %s743_s0 = inlined_call_operand.vmem [shape: bf16[2,8,128], index: 0, kind: input, shape index: {}]   ;;  %s744_s1 = inlined_call_operand.vmem [shape: bf16[128,128], index: 1, kind: input, shape index: {}]   ;;  %s745_s2 = inlined_call_operand.vmem [shape: f32[1,128], index: 2, kind: input, shape index: {}]   ;;  %s746_s3 = inlined_call_operand.vmem [shape: bf16[128,128], index: 3, kind: input, shape index: {}]   ;;  %s747_s4 = inlined_call_operand.vmem [shape: f32[1,128], index: 4, kind: input, shape index: {}]   ;;  %s748_s5 = inlined_call_operand.vmem [shape: f32[2,1,128], index: 5, kind: output, shape index: {}]  }
   0x1   :  { %s656_s20 = smov 0  }
   0x2 LB: > { %s27_s21 = sadd.s32 1, %s615_s19  ;;  %p488_p0 = scmp.ge.s32.totalorder %s619_s20, 1  ;;  %s619_s20 = sphi %s656_s20, %s15_s20   ;;  %s615_s19 = sphi %s654_s19, %s750_s19   ;;  %s611_s18 = sphi %s652_s18, %s749_s18  }
   0x3   : > { %p29_p1 = scmp.ge.s32.totalorder %s27_s21, 2  ;;  %p203_p2 = scmp.lt.s32.totalorder %s619_s20, 3 }
   0x5   : > { %s752_s21 = smov (%p29_p1, %s27_s21), 0  ;;  %p204_p3 = pnand %p488_p0, %p203_p2 }
   0x6   : > { %p231_p4 = scmp.lt.s32.totalorder (!%p204_p3), %s611_s18, 1 }
   0x7   : > { %207 = sbr.rel (%p204_p3) target bundleno = 313 (0x139), region = 40 }
   0xc   : > { %v563_v0 = vld [vmem:[%s744_s1 + $0x38] sm:$0xff]  ;;  %v621_v1 = vmov 0.0   ;;  %v562_v2 = vld [vmem:[%s744_s1 + $0x30] sm:$0xff]  ;;  %s754_s18 = smov (!%p231_p4, %s611_s18), 1  ;;  %v561_v5 = vld [vmem:[%s744_s1 + $0x28] sm:$0xff] }
   0xd   : > { %245 = vst [vmem:[#allocation2] sm:$0x1] %v621_v1  ;;  %328 = vmatpush.bf16.msra.mxu0 %v563_v0  ;;  %v571_v3 = vld [vmem:[%s746_s3 + $0x38] sm:$0xff]  ;;  %s489_s28 = sshll.u32 %s754_s18, 2  ;;  %v570_v4 = vld [vmem:[%s746_s3 + $0x30] sm:$0xff]  ;;  %v569_v9 = vld [vmem:[%s746_s3 + $0x28] sm:$0xff]  ;;  %s240_s22 = scalar_lea.vmem %s748_s5, %s754_s18 }
   0xe   : > { %s237_s6 = scalar_lea.vmem %s743_s0, %s489_s28  ;;  %408 = vmatpush.bf16.msra.mxu1 %v571_v3  ;;  %v560_v10 = vld [vmem:[%s744_s1 + $0x20] sm:$0xff]  ;;  %v559_v14 = vld [vmem:[%s744_s1 + $0x18] sm:$0xff]  ;;  %v558_v18 = vld [vmem:[%s744_s1 + $0x10] sm:$0xff] }
   0xf   : > { %v247_v6 = vld [vmem:[%s237_s6] sm:$0xf]  ;;  %v567_v17 = vld [vmem:[%s746_s3 + $0x18] sm:$0xff]  ;;  %v566_v22 = vld [vmem:[%s746_s3 + $0x10] sm:$0xff] }
  0x10   : > { %v248_v7 = vunpack.c.l.bf16 %v247_v6  ;;  %v568_v13 = vld [vmem:[%s746_s3 + $0x20] sm:$0xff]  ;;  %v557_v23 = vld [vmem:[%s744_s1 + $0x8] sm:$0xff] }
  0x11   : > { %329 = vmatpush.bf16.msra.mxu0 %v562_v2  ;;  %v556_v24 = vld [vmem:[%s744_s1] sm:$0xff]  ;;  %v565_v28 = vld [vmem:[%s746_s3 + $0x8] sm:$0xff] }
  0x12   : > { %v249_v8 = vrot.slane %v248_v7, 4  ;;  %409 = vmatpush.bf16.msra.mxu1 %v570_v4  ;;  %v564_v29 = vld [vmem:[%s746_s3] sm:$0xff] }
  0x13   : > { %v279_v30 = vld [vmem:[%s745_s2] sm:$0x1] }
  0x14   : > { %v250_v11 = vadd.f32 %v249_v8, %v248_v7  ;;  %v246_v19 = vld [vmem:[#allocation2] sm:$0x1] }
  0x15   : > { %330 = vmatpush.bf16.msra.mxu0 %v561_v5  ;;  %v359_v36 = vld [vmem:[%s747_s4] sm:$0x1] }
  0x16   : > { %v251_v12 = vrot.slane %v250_v11, 2  ;;  %410 = vmatpush.bf16.msra.mxu1 %v569_v9 }
  0x18   : > { %v252_v15 = vadd.f32 %v251_v12, %v250_v11 }
  0x19   : > { %331 = vmatpush.bf16.msra.mxu0 %v560_v10 }
  0x1a   : > { %v253_v16 = vrot.slane %v252_v15, 1  ;;  %411 = vmatpush.bf16.msra.mxu1 %v568_v13 }
  0x1c   : > { %v254_v20 = vadd.f32 %v253_v16, %v252_v15 }
  0x1d   : > { %332 = vmatpush.bf16.msra.mxu0 %v559_v14 }
  0x1e   : > { %v255_v21 = vadd.f32 %v254_v20, %v246_v19  ;;  %412 = vmatpush.bf16.msra.mxu1 %v567_v17 }
  0x20   : > { %256 = vst [vmem:[#allocation2] sm:$0x1] %v255_v21 }
  0x21   : > { %333 = vmatpush.bf16.msra.mxu0 %v558_v18 }
  0x22   : > { %413 = vmatpush.bf16.msra.mxu1 %v566_v22 }
  0x25   : > { %334 = vmatpush.bf16.msra.mxu0 %v557_v23 }
  0x26   : > { %414 = vmatpush.bf16.msra.mxu1 %v565_v28 }
  0x27   : > { %v260_v25 = vld [vmem:[#allocation2] sm:$0x1] }
  0x28   : > { %v261_v26 = vmul.f32 0.25, %v260_v25 }
  0x29   : > { %335 = vmatpush.bf16.msra.mxu0 %v556_v24 }
  0x2a   : > { %v262_v27 = vpack.c.bf16 %v261_v26, %v261_v26  ;;  %415 = vmatpush.bf16.msra.mxu1 %v564_v29 }
  0x2c   : > { %336 = vmatmul.bf16.vlgmr.msra.gmra.mxu0 %v262_v27 }
  0xa9   : > { %v337_v31 = vpop.f32.mrf.mxu0 }
  0xaa   : > { %v338_v32 = vadd.f32 %v337_v31, %v279_v30 }
  0xac   : > { %v341_v33 = vmax.f32 %v338_v32, 0.0 }
  0xae   : > { %v342_v34 = vpack.c.bf16 %v341_v33, %v341_v33 }
  0xb0   : > { %416 = vmatmul.bf16.vlgmr.msra.gmra.mxu1 %v342_v34 }
  0xb1   : > { %v339_v35 = vpop.f32.mrf.mxu0 }
 0x12d   : > { %v417_v37 = vpop.f32.mrf.mxu1 }
 0x12e   : > { %v418_v38 = vadd.f32 %v417_v37, %v359_v36 }
 0x130   : > { %v421_v39 = vadd.f32 3.0, %v418_v38 }
 0x132   : > { %v422_v40 = vmax.f32 %v421_v39, 0.0 }
 0x134   : > { %v423_v41 = vmin.f32 %v422_v40, 6.0 }
 0x135   : > { %v419_v42 = vpop.f32.mrf.mxu1 }
 0x136   : > { %v424_v43 = vmul.f32 0.16666667, %v423_v41 }
 0x138   : > { %425 = vst [vmem:[%s240_s22] sm:$0x1] %v424_v43 }
 0x139 PF: > { %s15_s20 = sadd.s32 1, %s619_s20   ;;  %s749_s18 = smov %s615_s19 }
 0x13a   : > { %p12_p5 = scmp.ge.s32.totalorder %s15_s20, 4   ;;  %s750_s19 = smov %s752_s21 }
 0x13c   :  { %14 = sbr.rel (!%p12_p5) target bundleno = 2 (0x2), region = 78 }

// kernel: mobilenet_v3_forward.33
= control target key start
LH: loop header
LB: loop body
LE: loop exit
PB: predicated region body
PF: predicated region fallthrough
CT: control target
= control target key end

     0   :  { %10 = vsyncpa [#allocation4], 0  ;;  %s1102_s0 = inlined_call_operand.vmem [shape: bf16[2,8,256], index: 0, kind: input, shape index: {}]   ;;  %s1103_s1 = inlined_call_operand.vmem [shape: bf16[256,128], index: 1, kind: input, shape index: {}]   ;;  %s1104_s2 = inlined_call_operand.vmem [shape: f32[1,128], index: 2, kind: input, shape index: {}]   ;;  %s1105_s3 = inlined_call_operand.vmem [shape: bf16[128,128], index: 3, kind: input, shape index: {}]   ;;  %s1106_s4 = inlined_call_operand.vmem [shape: f32[1,128], index: 4, kind: input, shape index: {}]   ;;  %s1107_s5 = inlined_call_operand.hbm [shape: f32[2,1,128], index: 5, kind: output, shape index: {}]  }
   0x1   :  { %12 = vsyncpa [#allocation4 + $0x1], 0  ;;  %s919_s18 = smov 0   ;;  %s921_s19 = smov 0  }
   0x2   :  { %s923_s20 = smov 0   ;;  %s925_s21 = smov 0  }
   0x3   :  { %s927_s22 = smov 0   ;;  %s929_s23 = smov 0  }
   0x4 LB: > { %s622_s24 = sadd.s32 4294967295, %s886_s23   ;;  %s623_s25 = sadd.s32 4294967294, %s886_s23   ;;  %s886_s23 = sphi %s929_s23, %s18_s23   ;;  %s882_s22 = sphi %s927_s22, %s1116_s22   ;;  %s878_s21 = sphi %s925_s21, %s1115_s21   ;;  %s874_s20 = sphi %s923_s20, %s1114_s20   ;;  %s870_s19 = sphi %s921_s19, %s1113_s19   ;;  %s866_s18 = sphi %s919_s18, %s1112_s18  }
   0x5   : > { %s30_s26 = sadd.s32 1, %s882_s22  ;;  %s149_s27 = sadd.s32 1, %s874_s20 }
   0x6   : > { %p32_p0 = scmp.ge.s32.totalorder %s30_s26, 2  ;;  %p159_p1 = scmp.ne.s32.totalorder %s874_s20, %s870_s19 }
   0x7   : > { %p160_p2 = scmp.eq.s32.totalorder %s622_s24, 1  ;;  %p165_p3 = scmp.ne.s32.totalorder %s870_s19, %s866_s18 }
   0x8   : > { %s1118_s26 = smov (%p32_p0, %s30_s26), 0  ;;  %p166_p5 = scmp.eq.s32.totalorder %s623_s25, 1 }
   0x9   : > { %p959_p4 = por %p160_p2, %p159_p1  ;;  %s146_s29 = ssub.s32 %s882_s22, %s1118_s26 }
   0xa   : > { %p626_p6 = scmp.ge.s32.totalorder %s886_s23, 1  ;;  %p147_p7 = scmp.eq.s32.totalorder %s146_s29, 0 }
   0xb   : > { %p966_p8 = por %p166_p5, %p165_p3  ;;  %p208_p9 = scmp.lt.s32.totalorder %s886_s23, 3 }
   0xc   : > { %s972_s6 = scalar_select %p147_p7, %s874_s20, %s149_s27  }
   0xd   : > { %p209_p10 = pnand %p626_p6, %p208_p9 }
   0xe   : > { %p239_p11 = scmp.lt.s32.totalorder (!%p209_p10), %s878_s21, 1  ;;  %s237_s17 = sand.u32 (!%p209_p10), 1, %s870_s19  }
   0xf   : > { %212 = sbr.rel (%p209_p10) target bundleno = 340 (0x154), region = 40  ;;  %s546_s27 = scalar_lea.hbm (!%p209_p10), %s1107_s5, %s878_s21 }
  0x10   : > { %s238_s8 = scalar_lea.vmem (!%p209_p10), [#allocation3], %s237_s17  ;;  %s550_s10 = sshll.u32 (!%p209_p10), %s546_s27, 4  ;;  %s551_s10 = int_to_ptr.hbm [resolvable:$true] %s550_s10 }
  0x11   : > { %s548_s9 = sshll.u32 (!%p209_p10), %s238_s8, 4  ;;  %s538_s11 = scalar_lea.sflag (!%p209_p10), [#allocation4], %s237_s17  ;;  %s549_s9 = int_to_ptr.vmem [resolvable:$true] %s548_s9 }
  0x12   : > { %s822_s12 = sshra.s32 (!%p209_p10), %s551_s10, 4  ;;  %s823_s12 = int_to_ptr.hbm [resolvable:$true] %s822_s12 }
  0x13   : > { %s824_s13 = scalar_lea.hbm (!%p209_p10), %s823_s12, 1  ;;  %p829_p1 = scmp.lt.s32.totalorder (!%p209_p10), %s823_s12, %s1107_s5 }
  0x14   : > { %v735_v0 = vld [vmem:[%s1103_s1 + $0x38] sm:$0xff]  ;;  %v252_v2 = vlaneseq  ;;  %v734_v3 = vld [vmem:[%s1103_s1 + $0x30] sm:$0xff]  ;;  %s240_s15 = scalar_select %p239_p11, %s878_s21, 1  ;;  %v888_v6 = vmov 0.0   ;;  %v733_v7 = vld [vmem:[%s1103_s1 + $0x28] sm:$0xff]  ;;  %vm276_vm1 = vcmask 1040384  }
  0x15   : > { %v743_v1 = vld [vmem:[%s1103_s1 + $0x78] sm:$0xff]  ;;  %426 = vmatpush.bf16.msra.mxu0 %v735_v0  ;;  %v742_v4 = vld [vmem:[%s1103_s1 + $0x70] sm:$0xff]  ;;  %v741_v8 = vld [vmem:[%s1103_s1 + $0x68] sm:$0xff]  ;;  %p825_p12 = scmp.ne.s32.totalorder %s823_s12, %s824_s13 }
  0x16   : > { %439 = vmatpush.bf16.msra.mxu1 %v743_v1  ;;  %vm988_vm0 = vcmp.lt.s32.totalorder %v252_v2, 256  ;;  %s727_s16 = sshll.u32 %s240_s15, 3  ;;  %v751_v12 = vld [vmem:[%s1105_s3 + $0x38] sm:$0xff]  ;;  %v732_v15 = vld [vmem:[%s1103_s1 + $0x20] sm:$0xff]  ;;  %v750_v19 = vld [vmem:[%s1105_s3 + $0x30] sm:$0xff]  ;;  %s828_s15 = scalar_lea.hbm %s1107_s5, 2 }
  0x17   : > { %256 = vst.msk [vmem:[#allocation2] sm:$0x3] %vm988_vm0, %v888_v6  ;;  %s247_s25 = scalar_lea.vmem %s1102_s0, %s727_s16  ;;  %v740_v16 = vld [vmem:[%s1103_s1 + $0x60] sm:$0xff]  ;;  %523 = vmatpush.bf16.msra.mxu2 %v751_v12  ;;  %v731_v22 = vld [vmem:[%s1103_s1 + $0x18] sm:$0xff]  ;;  %v749_v26 = vld [vmem:[%s1105_s3 + $0x28] sm:$0xff]  ;;  %p826_p13 = pnand %p825_p12, %p959_p4 }
  0x18   : > { %v258_v9 = vld [vmem:[%s247_s25] sm:$0xff]  ;;  %v739_v23 = vld [vmem:[%s1103_s1 + $0x58] sm:$0xff]  ;;  %v730_v29 = vld [vmem:[%s1103_s1 + $0x10] sm:$0xff]  ;;  %p830_p2 = scmp.lt.s32.totalorder %s828_s15, %s824_s13 }
  0x19   : > { %427 = vmatpush.bf16.msra.mxu0 %v734_v3  ;;  %v259_v10 = vunpack.c.l.bf16 %v258_v9  ;;  %v260_v11 = vunpack.c.h.bf16 %v258_v9  ;;  %v738_v30 = vld [vmem:[%s1103_s1 + $0x50] sm:$0xff]  ;;  %v748_v33 = vld [vmem:[%s1105_s3 + $0x20] sm:$0xff]  ;;  %v729_v36 = vld [vmem:[%s1103_s1 + $0x8] sm:$0xff]  ;;  %p827_p0 = pneg %p826_p13 }
  0x1a   : > { %440 = vmatpush.bf16.msra.mxu1 %v742_v4  ;;  %v737_v37 = vld [vmem:[%s1103_s1 + $0x48] sm:$0xff]  ;;  %v728_v40 = vld [vmem:[%s1103_s1] sm:$0xff]  ;;  %v747_v48 = vld [vmem:[%s1105_s3 + $0x18] sm:$0xff]  ;;  %p831_p3 = por %p830_p2, %p829_p1 }
  0x1b   : > { %v261_v13 = vrot.slane %v259_v10, 4  ;;  %v267_v14 = vrot.slane %v260_v11, 4  ;;  %524 = vmatpush.bf16.msra.mxu2 %v750_v19  ;;  %v736_v41 = vld [vmem:[%s1103_s1 + $0x40] sm:$0xff]  ;;  %v746_v49 = vld [vmem:[%s1105_s3 + $0x10] sm:$0xff]  ;;  %v745_v50 = vld [vmem:[%s1105_s3 + $0x8] sm:$0xff] }
  0x1c   : > { %v744_v51 = vld [vmem:[%s1105_s3] sm:$0xff]  ;;  %p832_p5 = pnand %p831_p3, %p827_p0 }
  0x1d   : > { %428 = vmatpush.bf16.msra.mxu0 %v733_v7  ;;  %v262_v17 = vadd.f32 %v261_v13, %v259_v10  ;;  %v268_v18 = vadd.f32 %v267_v14, %v260_v11  ;;  %v329_v52 = vld [vmem:[%s1104_s2] sm:$0x1] }
  0x1e   : > { %441 = vmatpush.bf16.msra.mxu1 %v741_v8  ;;  %v257_v34 = vld [vmem:[#allocation2] sm:$0x3] }
  0x1f   : > { %v263_v20 = vrot.slane %v262_v17, 2  ;;  %v269_v21 = vrot.slane %v268_v18, 2  ;;  %525 = vmatpush.bf16.msra.mxu2 %v749_v26  ;;  %v474_v1 = vld [vmem:[%s1106_s4] sm:$0x1] }
  0x21   : > { %429 = vmatpush.bf16.msra.mxu0 %v732_v15  ;;  %v264_v24 = vadd.f32 %v263_v20, %v262_v17  ;;  %v270_v25 = vadd.f32 %v269_v21, %v268_v18 }
  0x22   : > { %442 = vmatpush.bf16.msra.mxu1 %v740_v16 }
  0x23   : > { %v265_v27 = vrot.slane %v264_v24, 1  ;;  %v271_v28 = vrot.slane %v270_v25, 1  ;;  %526 = vmatpush.bf16.msra.mxu2 %v748_v33 }
  0x25   : > { %430 = vmatpush.bf16.msra.mxu0 %v731_v22  ;;  %v266_v31 = vadd.f32 %v265_v27, %v264_v24  ;;  %v272_v32 = vadd.f32 %v271_v28, %v270_v25 }
  0x26   : > { %443 = vmatpush.bf16.msra.mxu1 %v739_v23 }
  0x27   : > { %v275_v35 = vrot.slane %v272_v32, 7  ;;  %527 = vmatpush.bf16.msra.mxu2 %v747_v48 }
  0x29   : > { %431 = vmatpush.bf16.msra.mxu0 %v730_v29  ;;  %v277_v38 = vsel %vm276_vm1, %v266_v31, %v275_v35 }
  0x2a   : > { %444 = vmatpush.bf16.msra.mxu1 %v738_v30  ;;  %v279_v39 = vadd.f32 %v277_v38, %v257_v34 }
  0x2b   : > { %528 = vmatpush.bf16.msra.mxu2 %v746_v49 }
  0x2c   : > { %284 = vst.msk [vmem:[#allocation2] sm:$0x3] %vm988_vm0, %v279_v39 }
  0x2d   : > { %432 = vmatpush.bf16.msra.mxu0 %v729_v36 }
  0x2e   : > { %445 = vmatpush.bf16.msra.mxu1 %v737_v37 }
  0x2f   : > { %529 = vmatpush.bf16.msra.mxu2 %v745_v50 }
  0x31   : > { %433 = vmatpush.bf16.msra.mxu0 %v728_v40 }
  0x32   : > { %446 = vmatpush.bf16.msra.mxu1 %v736_v41 }
  0x33   : > { %v288_v42 = vld [vmem:[#allocation2] sm:$0x3]  ;;  %530 = vmatpush.bf16.msra.mxu2 %v744_v51 }
  0x34   : > { %v289_v43 = vmul.f32 0.25, %v288_v42 }
  0x36   : > { %v291_v44 = vperm.slane %v289_v43, 0  ;;  %v292_v45 = vperm.slane %v289_v43, 1 }
  0x38   : > { %v295_v46 = vpack.c.bf16 %v291_v44, %v291_v44  ;;  %v296_v47 = vpack.c.bf16 %v292_v45, %v292_v45 }
  0x3a   : > { %434 = vmatmul.bf16.vlgmr.msra.gmra.mxu0 %v295_v46  ;;  %447 = vmatmul.bf16.vlgmr.msra.gmra.mxu1 %v296_v47 }
  0xb7   : > { %v435_v53 = vpop.f32.mrf.mxu0  ;;  %v448_v54 = vpop.f32.mrf.mxu1 }
  0xb8   : > { %v436_v55 = vadd.f32 %v435_v53, %v329_v52 }
  0xba   : > { %v449_v56 = vadd.f32 %v448_v54, %v436_v55 }
  0xbc   : > { %v452_v57 = vadd.f32 3.0, %v449_v56 }
  0xbe   : > { %v453_v58 = vmax.f32 %v452_v57, 0.0 }
  0xbf   : > { %v437_v59 = vpop.f32.mrf.mxu0  ;;  %v450_v60 = vpop.f32.mrf.mxu1 }
  0xc0   : > { %v454_v61 = vmin.f32 %v453_v58, 6.0 }
  0xc2   : > { %v455_v62 = vmul.f32 %v454_v61, %v449_v56 }
  0xc4   : > { %v456_v63 = vmul.f32 0.16666667, %v455_v62 }
  0xc6   : > { %v457_v0 = vpack.c.bf16 %v456_v63, %v456_v63 }
  0xc8   : > { %531 = vmatmul.bf16.vlgmr.msra.gmra.mxu2 %v457_v0 }
 0x14b   : > { %v532_v2 = vpop.f32.mrf.mxu2 }
 0x14c   : > { %v533_v3 = vadd.f32 %v532_v2, %v474_v1 }
 0x14e   : > { %536 = vst [vmem:[%s238_s8] sm:$0x1] %v533_v3 }
 0x14f   : > { %835 = shalt.err (!%p832_p5)
}
 0x150   : > { %752 = dma.vmem_to_hbm [thread:$0]  (%p959_p4), %s549_s9, 16, %s551_s10, %s538_s11  }
 0x153   : > { %v534_v4 = vpop.f32.mrf.mxu2 }
 0x154 PF: > { %p758_p6 = scmp.ge.s32.totalorder %s886_s23, 2  ;;  %s562_s17 = sand.u32 1, %s866_s18  }
 0x155   : > { %s563_s25 = scalar_lea.sflag [#allocation4], %s562_s17 }
 0x156   : > { %p755_p7 = pnand %p758_p6, %p966_p8 }
 0x158   : > { %p756_p9 = pneg %p755_p7 }
 0x15a   : > { %861 = dma.done.wait (%p756_p9), %s563_s25, 16  }
 0x15b   : > { %863 = vsyncadd (%p756_p9), %s563_s25, 4294967280  ;;  %s18_s23 = sadd.s32 1, %s886_s23   ;;  %s1112_s18 = smov %s870_s19 }
 0x15c   : > { %p15_p10 = scmp.ge.s32.totalorder %s18_s23, 4   ;;  %s1113_s19 = smov %s874_s20 }
 0x15d   : > { %s1114_s20 = smov %s972_s6  ;;  %s1115_s21 = smov %s882_s22 }
 0x15e   : > { %s1116_s22 = smov %s1118_s26  ;;  %17 = sbr.rel (!%p15_p10) target bundleno = 4 (0x4), region = 83 }
 0x163   :  { %568 = vsyncpa [#allocation4], 1 }
 0x164   :  { %570 = vsyncpa [#allocation4 + $0x1], 1 }

</bundles_post_ra>
